<compile_context>
chip_gen: v5e
topology: v5e:2x2
jax: 0.10.0
libtpu: 0.0.40
codegen_flags: <defaults>
</compile_context>

<pallas_src>
import numpy as np

import jax
import jax.numpy as jnp
from jax.experimental import pallas as pl

NUM_CLASSES = 3
NUM_PRIORS = 2                                   # priors (anchors) per location
HEADER_COUT = NUM_PRIORS * (NUM_CLASSES + 4)     # 6 cls + 8 reg = 14


# ----------------------------------------------------------------------------
# Trace-time constant builders (pure numpy)
# ----------------------------------------------------------------------------
def _out_dim(d_in, stride):
    # 3x3 conv, padding=1:  floor((d_in + 2 - 3)/stride) + 1
    return (d_in - 1) // stride + 1


def _make_tap_masks(n, h, w):
    """(9, n*h*w) 0/1 mask: 1 where tap t=(i,j) reads an in-bounds pixel of the
    SAME image (zeros cover padding, image edges and cross-image wrap)."""
    hw = h * w
    m = np.zeros((9, n * hw), np.float32)
    y = np.arange(h)[:, None]
    x = np.arange(w)[None, :]
    for i in range(3):
        for j in range(3):
            valid = ((y + i - 1 >= 0) & (y + i - 1 < h) &
                     (x + j - 1 >= 0) & (x + j - 1 < w)).astype(np.float32)
            m[3 * i + j] = np.tile(valid.reshape(-1), n)
    return m


def _make_subsample(n, h_in, w_in, stride):
    """0/1 lane-selection matrix P (n*h_in*w_in, n*h_out*w_out):
    y_strided = y_full @ P  picks the stride-2 conv output positions."""
    h_out, w_out = _out_dim(h_in, stride), _out_dim(w_in, stride)
    p = np.zeros((n * h_in * w_in, n * h_out * w_out), np.float32)
    for img in range(n):
        for yo in range(h_out):
            for xo in range(w_out):
                qi = img * h_in * w_in + (yo * stride) * w_in + xo * stride
                qo = img * h_out * w_out + yo * w_out + xo
                p[qi, qo] = 1.0
    return p


# ----------------------------------------------------------------------------
# Fused kernel
# ----------------------------------------------------------------------------
def _shift_lanes(a, s):
    """out[:, q] = a[:, (q + s) mod L].  Written as two static lane slices +
    one concat (== a roll); wrapped lanes are later zeroed by the tap mask."""
    lanes = a.shape[1]
    sp = s % lanes
    if sp == 0:
        return a
    return jnp.concatenate([a[:, sp:], a[:, :sp]], axis=1)


def _make_kernel(meta):
    """meta: per-conv dicts, execution order.  Kernel args:
       (x_ref, *operand_refs, out_ref)."""

    def kernel(*refs):
        x_ref = refs[0]
        out_ref = refs[-1]
        op_refs = refs[1:-1]

        a = x_ref[...]                                 # (Cin, N*H*W) bf16
        pos = 0
        for m in meta:
            w_ref, b_ref, mask_ref = op_refs[pos], op_refs[pos + 1], op_refs[pos + 2]
            pos += 3
            masks = mask_ref[...]                      # (9, N*HW) bf16 0/1

            # im2col: 9 lane-shifted, boundary-masked copies stacked on sublanes.
            slabs = []
            for t, s in enumerate(m["shifts"]):
                g = _shift_lanes(a, s)
                if t != 4:                             # center tap mask is all-ones
                    g = g * masks[t:t + 1, :]
                slabs.append(g)
            bmat = jnp.concatenate(slabs, axis=0)      # (9*Cin, N*HW) bf16

            # ONE MXU matmul per conv; f32 accumulate; bias broadcast over lanes.
            y = jnp.dot(w_ref[...], bmat, preferred_element_type=jnp.float32)
            y = y + b_ref[...]                         # (Cout, 1) f32
            if m["relu"]:
                y = jnp.maximum(y, 0.0)

            if m["stride"] == 2:                       # stride-2: lane-select matmul
                p_ref = op_refs[pos]
                pos += 1
                y = jnp.dot(y.astype(jnp.bfloat16), p_ref[...],
                            preferred_element_type=jnp.float32)

            if m["out_off"] is not None:               # header: write into the slab
                width = y.shape[1]
                out_ref[:, m["out_off"]:m["out_off"] + width] = y.astype(out_ref.dtype)
            if m["chain"]:                             # trunk conv feeds next layer
                a = y.astype(jnp.bfloat16)

    return kernel


# ----------------------------------------------------------------------------
# Plan builder (mirrors the PyTorch SSD.forward control flow, is_test=False)
# ----------------------------------------------------------------------------
def _build_plan(params, n, h_in, w_in):
    operands = []      # flat per-conv: [W(Cout,9Cin) bf16, b(Cout,1) f32, masks(9,NHW) bf16, (P bf16)]
    meta = []
    header_hws = []    # per-header source spatial size (h*w)
    out_cols = [0]     # running lane offset in the output slab

    def add_conv(w, b, stride, relu, hin, win, chain, is_header):
        cin, cout = w.shape[2], w.shape[3]
        # (3,3,Cin,Cout) -> (Cout, 9*Cin), row index o, col index t*Cin + c.
        w9t = jnp.transpose(w, (3, 0, 1, 2)).reshape(cout, 9 * cin).astype(jnp.bfloat16)
        bias = jnp.asarray(b, jnp.float32).reshape(cout, 1)
        masks = jnp.asarray(_make_tap_masks(n, hin, win), dtype=jnp.bfloat16)
        operands.extend([w9t, bias, masks])
        shifts = tuple((i - 1) * win + (j - 1) for i in range(3) for j in range(3))
        m = dict(relu=relu, stride=stride, chain=chain, shifts=shifts, out_off=None)
        if stride == 2:
            operands.append(
                jnp.asarray(_make_subsample(n, hin, win, stride), dtype=jnp.bfloat16))
        if is_header:
            m["out_off"] = out_cols[0]
            out_cols[0] += n * hin * win               # stride-1 headers keep size
            header_hws.append(hin * win)
        meta.append(m)
        return _out_dim(hin, stride), _out_dim(win, stride)

    def add_header(idx, hin, win):
        cls = params["classification_headers"][idx]
        reg = params["regression_headers"][idx]
        w = jnp.concatenate([cls["w"], reg["w"]], axis=-1)   # (3,3,Cin,14)
        b = jnp.concatenate([cls["b"], reg["b"]], axis=-1)   # (1,14)
        add_conv(w, b, 1, False, hin, win, chain=False, is_header=True)

    cur_h, cur_w = h_in, w_in
    start_layer_index = 0
    header_index = 0
    end_layer_index = 0
    for end_layer_index in params["source_layer_indexes"]:
        for layer in params["base_net"][start_layer_index:end_layer_index]:
            cur_h, cur_w = add_conv(layer["w"], layer["b"], layer["stride"],
                                    layer["relu"], cur_h, cur_w, True, False)
        start_layer_index = end_layer_index
        add_header(header_index, cur_h, cur_w)
        header_index += 1
    for layer in params["base_net"][end_layer_index:]:
        cur_h, cur_w = add_conv(layer["w"], layer["b"], layer["stride"],
                                layer["relu"], cur_h, cur_w, True, False)
    for layer in params["extras"]:
        cur_h, cur_w = add_conv(layer["w"], layer["b"], layer["stride"],
                                layer["relu"], cur_h, cur_w, True, False)
        add_header(header_index, cur_h, cur_w)
        header_index += 1
    return operands, meta, header_hws, out_cols[0]


def ssd_forward(params, x_nhwc):
    """x_nhwc: (N, H, W, Cin).  Returns (confidences (N,A,3), locations (N,A,4))."""
    n, h, w, c_in = x_nhwc.shape
    operands, meta, header_hws, total_cols = _build_plan(params, n, h, w)

    # (N,H,W,C) -> channel-major (C, N*H*W) bf16: spatial axis on MXU/VPU lanes.
    x_cm = jnp.transpose(x_nhwc, (3, 0, 1, 2)).reshape(c_in, n * h * w).astype(jnp.bfloat16)

    # No grid: whole (tiny) network in one invocation; all operands land in VMEM
    # once (single-buffered) and only the (14, total_cols) slab goes back to HBM.
    out = pl.pallas_call(
        _make_kernel(meta),
        out_shape=jax.ShapeDtypeStruct((HEADER_COUT, total_cols), jnp.float32),
    )(x_cm, *operands)

    # Split the lane-dense slab into per-scale (N, HW, 14) blocks (wrapper-side,
    # tiny XLA ops) and reproduce PyTorch's permute(0,2,3,1).view ordering.
    cls_w = NUM_PRIORS * NUM_CLASSES
    confs, locs = [], []
    off = 0
    for hw in header_hws:
        cols = n * hw
        slab = out[:, off:off + cols]                                  # (14, n*hw)
        slab = slab.reshape(HEADER_COUT, n, hw).transpose(1, 2, 0)     # (n, hw, 14)
        confs.append(slab[..., :cls_w].reshape(n, hw * NUM_PRIORS, NUM_CLASSES))
        locs.append(slab[..., cls_w:].reshape(n, hw * NUM_PRIORS, 4))
        off += cols
    return jnp.concatenate(confs, axis=1), jnp.concatenate(locs, axis=1)


# ----------------------------------------------------------------------------
# Deterministic parameter construction (synthetic SSD instantiation)
# ----------------------------------------------------------------------------
def _init_conv(key, kh, kw, cin, cout):
    kw_key, kb_key = jax.random.split(key)
    fan_in = float(kh * kw * cin)
    w = jax.random.normal(kw_key, (kh, kw, cin, cout), jnp.float32) / jnp.sqrt(fan_in)
    b = 0.1 * jax.random.normal(kb_key, (1, cout), jnp.float32)
    return {"w": w, "b": b}


def make_ssd_params(key):
    keys = jax.random.split(key, 16)
    base_net = [
        dict(_init_conv(keys[0], 3, 3, 4, 8), stride=1, relu=True),    # 16x16x8
        dict(_init_conv(keys[1], 3, 3, 8, 16), stride=2, relu=True),   # 8x8x16  <- source 0
        dict(_init_conv(keys[2], 3, 3, 16, 16), stride=2, relu=True),  # 4x4x16  <- source 1
    ]
    extras = [
        dict(_init_conv(keys[3], 3, 3, 16, 16), stride=2, relu=True),  # 2x2x16  <- source 2
    ]
    cls_headers = [
        dict(_init_conv(keys[4 + i], 3, 3, 16, NUM_PRIORS * NUM_CLASSES), stride=1, relu=False)
        for i in range(3)
    ]
    reg_headers = [
        dict(_init_conv(keys[8 + i], 3, 3, 16, NUM_PRIORS * 4), stride=1, relu=False)
        for i in range(3)
    ]
    return dict(
        base_net=base_net,
        extras=extras,
        classification_headers=cls_headers,
        regression_headers=reg_headers,
        source_layer_indexes=[2, 3],
    )


# ----------------------------------------------------------------------------
# Pure-JAX reference (for correctness check only)
# ----------------------------------------------------------------------------
def _ref_conv(x, layer):
    out = jax.lax.conv_general_dilated(
        x, layer["w"], (layer["stride"], layer["stride"]), ((1, 1), (1, 1)),
        dimension_numbers=("NHWC", "HWIO", "NHWC"))
    out = out + layer["b"].reshape(1, 1, 1, -1)
    if layer["relu"]:
        out = jnp.maximum(out, 0.0)
    return out


def ssd_forward_reference(params, x):
    confidences, locations = [], []
    start_layer_index = 0
    header_index = 0
    end_layer_index = 0
    for end_layer_index in params["source_layer_indexes"]:
        for layer in params["base_net"][start_layer_index:end_layer_index]:
            x = _ref_conv(x, layer)
        y = x
        start_layer_index = end_layer_index
        conf = _ref_conv(y, params["classification_headers"][header_index])
        conf = conf.reshape(conf.shape[0], -1, NUM_CLASSES)
        loc = _ref_conv(y, params["regression_headers"][header_index])
        loc = loc.reshape(loc.shape[0], -1, 4)
        header_index += 1
        confidences.append(conf)
        locations.append(loc)
    for layer in params["base_net"][end_layer_index:]:
        x = _ref_conv(x, layer)
    for layer in params["extras"]:
        x = _ref_conv(x, layer)
        conf = _ref_conv(x, params["classification_headers"][header_index])
        conf = conf.reshape(conf.shape[0], -1, NUM_CLASSES)
        loc = _ref_conv(x, params["regression_headers"][header_index])
        loc = loc.reshape(loc.shape[0], -1, 4)
        header_index += 1
        confidences.append(conf)
        locations.append(loc)
    return jnp.concatenate(confidences, axis=1), jnp.concatenate(locations, axis=1)


# ----------------------------------------------------------------------------
if __name__ == "__main__":
    key = jax.random.PRNGKey(0)
    x_key, p_key = jax.random.split(key)

    # PyTorch-style NCHW input, small shapes: batch=2, channels=4, spatial=16x16.
    x_nchw = jax.random.normal(x_key, (2, 4, 16, 16), jnp.float32)
    x_nhwc = jnp.transpose(x_nchw, (0, 2, 3, 1))   # NCHW -> NHWC

    params = make_ssd_params(p_key)

    fwd = jax.jit(lambda inp: ssd_forward(params, inp))
    conf, loc = fwd(x_nhwc)
    jax.block_until_ready((conf, loc))

    # 8*8*2 + 4*4*2 + 2*2*2 = 168 anchors.
    assert conf.shape == (2, 168, NUM_CLASSES), conf.shape
    assert loc.shape == (2, 168, 4), loc.shape
    assert conf.dtype == jnp.float32 and loc.dtype == jnp.float32

    conf_ref, loc_ref = ssd_forward_reference(params, x_nhwc)
    np.testing.assert_allclose(np.asarray(conf), np.asarray(conf_ref), atol=5e-2, rtol=5e-2)
    np.testing.assert_allclose(np.asarray(loc), np.asarray(loc_ref), atol=5e-2, rtol=5e-2)

    print("KERNEL_OK")
</pallas_src>

<mosaic_0001>
module attributes {stable_mosaic.version = 11 : i64} {
  func.func @kernel(%arg0: memref<4x512xbf16, #tpu.memory_space<vmem>>, %arg1: memref<8x36xbf16, #tpu.memory_space<vmem>>, %arg2: memref<8x1xf32, #tpu.memory_space<vmem>>, %arg3: memref<9x512xbf16, #tpu.memory_space<vmem>>, %arg4: memref<16x72xbf16, #tpu.memory_space<vmem>>, %arg5: memref<16x1xf32, #tpu.memory_space<vmem>>, %arg6: memref<9x512xbf16, #tpu.memory_space<vmem>>, %arg7: memref<512x128xbf16, #tpu.memory_space<vmem>>, %arg8: memref<14x144xbf16, #tpu.memory_space<vmem>>, %arg9: memref<14x1xf32, #tpu.memory_space<vmem>>, %arg10: memref<9x128xbf16, #tpu.memory_space<vmem>>, %arg11: memref<16x144xbf16, #tpu.memory_space<vmem>>, %arg12: memref<16x1xf32, #tpu.memory_space<vmem>>, %arg13: memref<9x128xbf16, #tpu.memory_space<vmem>>, %arg14: memref<128x32xbf16, #tpu.memory_space<vmem>>, %arg15: memref<14x144xbf16, #tpu.memory_space<vmem>>, %arg16: memref<14x1xf32, #tpu.memory_space<vmem>>, %arg17: memref<9x32xbf16, #tpu.memory_space<vmem>>, %arg18: memref<16x144xbf16, #tpu.memory_space<vmem>>, %arg19: memref<16x1xf32, #tpu.memory_space<vmem>>, %arg20: memref<9x32xbf16, #tpu.memory_space<vmem>>, %arg21: memref<32x8xbf16, #tpu.memory_space<vmem>>, %arg22: memref<14x144xbf16, #tpu.memory_space<vmem>>, %arg23: memref<14x1xf32, #tpu.memory_space<vmem>>, %arg24: memref<9x8xbf16, #tpu.memory_space<vmem>>, %arg25: memref<14x168xf32, #tpu.memory_space<vmem>>) attributes {dimension_semantics = [], scalar_prefetch = 0 : i64, scratch_operands = 0 : i64, tpu.core_type = #tpu.core_type<tc>} {
    %c0 = arith.constant 0 : index
    %c0_0 = arith.constant 0 : index
    %0 = vector.load %arg0[%c0, %c0_0] : memref<4x512xbf16, #tpu.memory_space<vmem>>, vector<4x512xbf16>
    %c0_1 = arith.constant 0 : index
    %c0_2 = arith.constant 0 : index
    %1 = vector.load %arg3[%c0_1, %c0_2] : memref<9x512xbf16, #tpu.memory_space<vmem>>, vector<9x512xbf16>
    %2 = vector.extract_strided_slice %0 {offsets = [0, 495], sizes = [4, 17], strides = [1, 1]} : vector<4x512xbf16> to vector<4x17xbf16>
    %3 = vector.extract_strided_slice %0 {offsets = [0, 0], sizes = [4, 495], strides = [1, 1]} : vector<4x512xbf16> to vector<4x495xbf16>
    %4 = tpu.concatenate %2, %3 in 1 : vector<4x17xbf16>, vector<4x495xbf16> -> vector<4x512xbf16>
    %5 = vector.extract_strided_slice %1 {offsets = [0, 0], sizes = [1, 512], strides = [1, 1]} : vector<9x512xbf16> to vector<1x512xbf16>
    %6 = vector.broadcast %5 : vector<1x512xbf16> to vector<4x512xbf16>
    %7 = arith.mulf %4, %6 : vector<4x512xbf16>
    %8 = vector.extract_strided_slice %0 {offsets = [0, 496], sizes = [4, 16], strides = [1, 1]} : vector<4x512xbf16> to vector<4x16xbf16>
    %9 = vector.extract_strided_slice %0 {offsets = [0, 0], sizes = [4, 496], strides = [1, 1]} : vector<4x512xbf16> to vector<4x496xbf16>
    %10 = tpu.concatenate %8, %9 in 1 : vector<4x16xbf16>, vector<4x496xbf16> -> vector<4x512xbf16>
    %11 = vector.extract_strided_slice %1 {offsets = [1, 0], sizes = [1, 512], strides = [1, 1]} : vector<9x512xbf16> to vector<1x512xbf16>
    %12 = vector.broadcast %11 : vector<1x512xbf16> to vector<4x512xbf16>
    %13 = arith.mulf %10, %12 : vector<4x512xbf16>
    %14 = vector.extract_strided_slice %0 {offsets = [0, 497], sizes = [4, 15], strides = [1, 1]} : vector<4x512xbf16> to vector<4x15xbf16>
    %15 = vector.extract_strided_slice %0 {offsets = [0, 0], sizes = [4, 497], strides = [1, 1]} : vector<4x512xbf16> to vector<4x497xbf16>
    %16 = tpu.concatenate %14, %15 in 1 : vector<4x15xbf16>, vector<4x497xbf16> -> vector<4x512xbf16>
    %17 = vector.extract_strided_slice %1 {offsets = [2, 0], sizes = [1, 512], strides = [1, 1]} : vector<9x512xbf16> to vector<1x512xbf16>
    %18 = vector.broadcast %17 : vector<1x512xbf16> to vector<4x512xbf16>
    %19 = arith.mulf %16, %18 : vector<4x512xbf16>
    %20 = vector.extract_strided_slice %0 {offsets = [0, 511], sizes = [4, 1], strides = [1, 1]} : vector<4x512xbf16> to vector<4x1xbf16>
    %21 = vector.extract_strided_slice %0 {offsets = [0, 0], sizes = [4, 511], strides = [1, 1]} : vector<4x512xbf16> to vector<4x511xbf16>
    %22 = tpu.concatenate %20, %21 in 1 : vector<4x1xbf16>, vector<4x511xbf16> -> vector<4x512xbf16>
    %23 = vector.extract_strided_slice %1 {offsets = [3, 0], sizes = [1, 512], strides = [1, 1]} : vector<9x512xbf16> to vector<1x512xbf16>
    %24 = vector.broadcast %23 : vector<1x512xbf16> to vector<4x512xbf16>
    %25 = arith.mulf %22, %24 : vector<4x512xbf16>
    %26 = vector.extract_strided_slice %0 {offsets = [0, 1], sizes = [4, 511], strides = [1, 1]} : vector<4x512xbf16> to vector<4x511xbf16>
    %27 = vector.extract_strided_slice %0 {offsets = [0, 0], sizes = [4, 1], strides = [1, 1]} : vector<4x512xbf16> to vector<4x1xbf16>
    %28 = tpu.concatenate %26, %27 in 1 : vector<4x511xbf16>, vector<4x1xbf16> -> vector<4x512xbf16>
    %29 = vector.extract_strided_slice %1 {offsets = [5, 0], sizes = [1, 512], strides = [1, 1]} : vector<9x512xbf16> to vector<1x512xbf16>
    %30 = vector.broadcast %29 : vector<1x512xbf16> to vector<4x512xbf16>
    %31 = arith.mulf %28, %30 : vector<4x512xbf16>
    %32 = vector.extract_strided_slice %0 {offsets = [0, 15], sizes = [4, 497], strides = [1, 1]} : vector<4x512xbf16> to vector<4x497xbf16>
    %33 = vector.extract_strided_slice %0 {offsets = [0, 0], sizes = [4, 15], strides = [1, 1]} : vector<4x512xbf16> to vector<4x15xbf16>
    %34 = tpu.concatenate %32, %33 in 1 : vector<4x497xbf16>, vector<4x15xbf16> -> vector<4x512xbf16>
    %35 = vector.extract_strided_slice %1 {offsets = [6, 0], sizes = [1, 512], strides = [1, 1]} : vector<9x512xbf16> to vector<1x512xbf16>
    %36 = vector.broadcast %35 : vector<1x512xbf16> to vector<4x512xbf16>
    %37 = arith.mulf %34, %36 : vector<4x512xbf16>
    %38 = vector.extract_strided_slice %0 {offsets = [0, 16], sizes = [4, 496], strides = [1, 1]} : vector<4x512xbf16> to vector<4x496xbf16>
    %39 = vector.extract_strided_slice %0 {offsets = [0, 0], sizes = [4, 16], strides = [1, 1]} : vector<4x512xbf16> to vector<4x16xbf16>
    %40 = tpu.concatenate %38, %39 in 1 : vector<4x496xbf16>, vector<4x16xbf16> -> vector<4x512xbf16>
    %41 = vector.extract_strided_slice %1 {offsets = [7, 0], sizes = [1, 512], strides = [1, 1]} : vector<9x512xbf16> to vector<1x512xbf16>
    %42 = vector.broadcast %41 : vector<1x512xbf16> to vector<4x512xbf16>
    %43 = arith.mulf %40, %42 : vector<4x512xbf16>
    %44 = vector.extract_strided_slice %0 {offsets = [0, 17], sizes = [4, 495], strides = [1, 1]} : vector<4x512xbf16> to vector<4x495xbf16>
    %45 = vector.extract_strided_slice %0 {offsets = [0, 0], sizes = [4, 17], strides = [1, 1]} : vector<4x512xbf16> to vector<4x17xbf16>
    %46 = tpu.concatenate %44, %45 in 1 : vector<4x495xbf16>, vector<4x17xbf16> -> vector<4x512xbf16>
    %47 = vector.extract_strided_slice %1 {offsets = [8, 0], sizes = [1, 512], strides = [1, 1]} : vector<9x512xbf16> to vector<1x512xbf16>
    %48 = vector.broadcast %47 : vector<1x512xbf16> to vector<4x512xbf16>
    %49 = arith.mulf %46, %48 : vector<4x512xbf16>
    %50 = tpu.concatenate %7, %13, %19, %25, %0, %31, %37, %43, %49 in 0 : vector<4x512xbf16>, vector<4x512xbf16>, vector<4x512xbf16>, vector<4x512xbf16>, vector<4x512xbf16>, vector<4x512xbf16>, vector<4x512xbf16>, vector<4x512xbf16>, vector<4x512xbf16> -> vector<36x512xbf16>
    %c0_3 = arith.constant 0 : index
    %c0_4 = arith.constant 0 : index
    %51 = vector.load %arg1[%c0_3, %c0_4] : memref<8x36xbf16, #tpu.memory_space<vmem>>, vector<8x36xbf16>
    %cst = arith.constant dense<0.000000e+00> : vector<8x512xf32>
    %52 = tpu.matmul %51, %50, %cst {dimension_numbers = #tpu.dot_dimension_numbers<[1], [0], [0], [1], [0, 0, 1, 1], [], []>} : vector<8x36xbf16>, vector<36x512xbf16>, vector<8x512xf32> -> vector<8x512xf32>
    %c0_5 = arith.constant 0 : index
    %c0_6 = arith.constant 0 : index
    %53 = vector.load %arg2[%c0_5, %c0_6] : memref<8x1xf32, #tpu.memory_space<vmem>>, vector<8x1xf32>
    %54 = vector.broadcast %53 : vector<8x1xf32> to vector<8x512xf32>
    %55 = arith.addf %52, %54 : vector<8x512xf32>
    %cst_7 = arith.constant 0.000000e+00 : f32
    %56 = vector.broadcast %cst_7 : f32 to vector<8x512xf32>
    %57 = arith.maximumf %55, %56 : vector<8x512xf32>
    %58 = arith.truncf %57 : vector<8x512xf32> to vector<8x512xbf16>
    %c0_8 = arith.constant 0 : index
    %c0_9 = arith.constant 0 : index
    %59 = vector.load %arg6[%c0_8, %c0_9] : memref<9x512xbf16, #tpu.memory_space<vmem>>, vector<9x512xbf16>
    %60 = vector.extract_strided_slice %58 {offsets = [0, 495], sizes = [8, 17], strides = [1, 1]} : vector<8x512xbf16> to vector<8x17xbf16>
    %61 = vector.extract_strided_slice %58 {offsets = [0, 0], sizes = [8, 495], strides = [1, 1]} : vector<8x512xbf16> to vector<8x495xbf16>
    %62 = tpu.concatenate %60, %61 in 1 : vector<8x17xbf16>, vector<8x495xbf16> -> vector<8x512xbf16>
    %63 = vector.extract_strided_slice %59 {offsets = [0, 0], sizes = [1, 512], strides = [1, 1]} : vector<9x512xbf16> to vector<1x512xbf16>
    %64 = vector.broadcast %63 : vector<1x512xbf16> to vector<8x512xbf16>
    %65 = arith.mulf %62, %64 : vector<8x512xbf16>
    %66 = vector.extract_strided_slice %58 {offsets = [0, 496], sizes = [8, 16], strides = [1, 1]} : vector<8x512xbf16> to vector<8x16xbf16>
    %67 = vector.extract_strided_slice %58 {offsets = [0, 0], sizes = [8, 496], strides = [1, 1]} : vector<8x512xbf16> to vector<8x496xbf16>
    %68 = tpu.concatenate %66, %67 in 1 : vector<8x16xbf16>, vector<8x496xbf16> -> vector<8x512xbf16>
    %69 = vector.extract_strided_slice %59 {offsets = [1, 0], sizes = [1, 512], strides = [1, 1]} : vector<9x512xbf16> to vector<1x512xbf16>
    %70 = vector.broadcast %69 : vector<1x512xbf16> to vector<8x512xbf16>
    %71 = arith.mulf %68, %70 : vector<8x512xbf16>
    %72 = vector.extract_strided_slice %58 {offsets = [0, 497], sizes = [8, 15], strides = [1, 1]} : vector<8x512xbf16> to vector<8x15xbf16>
    %73 = vector.extract_strided_slice %58 {offsets = [0, 0], sizes = [8, 497], strides = [1, 1]} : vector<8x512xbf16> to vector<8x497xbf16>
    %74 = tpu.concatenate %72, %73 in 1 : vector<8x15xbf16>, vector<8x497xbf16> -> vector<8x512xbf16>
    %75 = vector.extract_strided_slice %59 {offsets = [2, 0], sizes = [1, 512], strides = [1, 1]} : vector<9x512xbf16> to vector<1x512xbf16>
    %76 = vector.broadcast %75 : vector<1x512xbf16> to vector<8x512xbf16>
    %77 = arith.mulf %74, %76 : vector<8x512xbf16>
    %78 = vector.extract_strided_slice %58 {offsets = [0, 511], sizes = [8, 1], strides = [1, 1]} : vector<8x512xbf16> to vector<8x1xbf16>
    %79 = vector.extract_strided_slice %58 {offsets = [0, 0], sizes = [8, 511], strides = [1, 1]} : vector<8x512xbf16> to vector<8x511xbf16>
    %80 = tpu.concatenate %78, %79 in 1 : vector<8x1xbf16>, vector<8x511xbf16> -> vector<8x512xbf16>
    %81 = vector.extract_strided_slice %59 {offsets = [3, 0], sizes = [1, 512], strides = [1, 1]} : vector<9x512xbf16> to vector<1x512xbf16>
    %82 = vector.broadcast %81 : vector<1x512xbf16> to vector<8x512xbf16>
    %83 = arith.mulf %80, %82 : vector<8x512xbf16>
    %84 = vector.extract_strided_slice %58 {offsets = [0, 1], sizes = [8, 511], strides = [1, 1]} : vector<8x512xbf16> to vector<8x511xbf16>
    %85 = vector.extract_strided_slice %58 {offsets = [0, 0], sizes = [8, 1], strides = [1, 1]} : vector<8x512xbf16> to vector<8x1xbf16>
    %86 = tpu.concatenate %84, %85 in 1 : vector<8x511xbf16>, vector<8x1xbf16> -> vector<8x512xbf16>
    %87 = vector.extract_strided_slice %59 {offsets = [5, 0], sizes = [1, 512], strides = [1, 1]} : vector<9x512xbf16> to vector<1x512xbf16>
    %88 = vector.broadcast %87 : vector<1x512xbf16> to vector<8x512xbf16>
    %89 = arith.mulf %86, %88 : vector<8x512xbf16>
    %90 = vector.extract_strided_slice %58 {offsets = [0, 15], sizes = [8, 497], strides = [1, 1]} : vector<8x512xbf16> to vector<8x497xbf16>
    %91 = vector.extract_strided_slice %58 {offsets = [0, 0], sizes = [8, 15], strides = [1, 1]} : vector<8x512xbf16> to vector<8x15xbf16>
    %92 = tpu.concatenate %90, %91 in 1 : vector<8x497xbf16>, vector<8x15xbf16> -> vector<8x512xbf16>
    %93 = vector.extract_strided_slice %59 {offsets = [6, 0], sizes = [1, 512], strides = [1, 1]} : vector<9x512xbf16> to vector<1x512xbf16>
    %94 = vector.broadcast %93 : vector<1x512xbf16> to vector<8x512xbf16>
    %95 = arith.mulf %92, %94 : vector<8x512xbf16>
    %96 = vector.extract_strided_slice %58 {offsets = [0, 16], sizes = [8, 496], strides = [1, 1]} : vector<8x512xbf16> to vector<8x496xbf16>
    %97 = vector.extract_strided_slice %58 {offsets = [0, 0], sizes = [8, 16], strides = [1, 1]} : vector<8x512xbf16> to vector<8x16xbf16>
    %98 = tpu.concatenate %96, %97 in 1 : vector<8x496xbf16>, vector<8x16xbf16> -> vector<8x512xbf16>
    %99 = vector.extract_strided_slice %59 {offsets = [7, 0], sizes = [1, 512], strides = [1, 1]} : vector<9x512xbf16> to vector<1x512xbf16>
    %100 = vector.broadcast %99 : vector<1x512xbf16> to vector<8x512xbf16>
    %101 = arith.mulf %98, %100 : vector<8x512xbf16>
    %102 = vector.extract_strided_slice %58 {offsets = [0, 17], sizes = [8, 495], strides = [1, 1]} : vector<8x512xbf16> to vector<8x495xbf16>
    %103 = vector.extract_strided_slice %58 {offsets = [0, 0], sizes = [8, 17], strides = [1, 1]} : vector<8x512xbf16> to vector<8x17xbf16>
    %104 = tpu.concatenate %102, %103 in 1 : vector<8x495xbf16>, vector<8x17xbf16> -> vector<8x512xbf16>
    %105 = vector.extract_strided_slice %59 {offsets = [8, 0], sizes = [1, 512], strides = [1, 1]} : vector<9x512xbf16> to vector<1x512xbf16>
    %106 = vector.broadcast %105 : vector<1x512xbf16> to vector<8x512xbf16>
    %107 = arith.mulf %104, %106 : vector<8x512xbf16>
    %108 = tpu.concatenate %65, %71, %77, %83, %58, %89, %95, %101, %107 in 0 : vector<8x512xbf16>, vector<8x512xbf16>, vector<8x512xbf16>, vector<8x512xbf16>, vector<8x512xbf16>, vector<8x512xbf16>, vector<8x512xbf16>, vector<8x512xbf16>, vector<8x512xbf16> -> vector<72x512xbf16>
    %c0_10 = arith.constant 0 : index
    %c0_11 = arith.constant 0 : index
    %109 = vector.load %arg4[%c0_10, %c0_11] : memref<16x72xbf16, #tpu.memory_space<vmem>>, vector<16x72xbf16>
    %cst_12 = arith.constant dense<0.000000e+00> : vector<16x512xf32>
    %110 = tpu.matmul %109, %108, %cst_12 {dimension_numbers = #tpu.dot_dimension_numbers<[1], [0], [0], [1], [0, 0, 1, 1], [], []>} : vector<16x72xbf16>, vector<72x512xbf16>, vector<16x512xf32> -> vector<16x512xf32>
    %c0_13 = arith.constant 0 : index
    %c0_14 = arith.constant 0 : index
    %111 = vector.load %arg5[%c0_13, %c0_14] : memref<16x1xf32, #tpu.memory_space<vmem>>, vector<16x1xf32>
    %112 = vector.broadcast %111 : vector<16x1xf32> to vector<16x512xf32>
    %113 = arith.addf %110, %112 : vector<16x512xf32>
    %cst_15 = arith.constant 0.000000e+00 : f32
    %114 = vector.broadcast %cst_15 : f32 to vector<16x512xf32>
    %115 = arith.maximumf %113, %114 : vector<16x512xf32>
    %116 = arith.truncf %115 : vector<16x512xf32> to vector<16x512xbf16>
    %c0_16 = arith.constant 0 : index
    %c0_17 = arith.constant 0 : index
    %117 = vector.load %arg7[%c0_16, %c0_17] : memref<512x128xbf16, #tpu.memory_space<vmem>>, vector<512x128xbf16>
    %cst_18 = arith.constant dense<0.000000e+00> : vector<16x128xf32>
    %118 = tpu.matmul %116, %117, %cst_18 {dimension_numbers = #tpu.dot_dimension_numbers<[1], [0], [0], [1], [0, 0, 1, 1], [], []>} : vector<16x512xbf16>, vector<512x128xbf16>, vector<16x128xf32> -> vector<16x128xf32>
    %119 = arith.truncf %118 : vector<16x128xf32> to vector<16x128xbf16>
    %c0_19 = arith.constant 0 : index
    %c0_20 = arith.constant 0 : index
    %120 = vector.load %arg10[%c0_19, %c0_20] : memref<9x128xbf16, #tpu.memory_space<vmem>>, vector<9x128xbf16>
    %121 = vector.extract_strided_slice %119 {offsets = [0, 119], sizes = [16, 9], strides = [1, 1]} : vector<16x128xbf16> to vector<16x9xbf16>
    %122 = vector.extract_strided_slice %119 {offsets = [0, 0], sizes = [16, 119], strides = [1, 1]} : vector<16x128xbf16> to vector<16x119xbf16>
    %123 = tpu.concatenate %121, %122 in 1 : vector<16x9xbf16>, vector<16x119xbf16> -> vector<16x128xbf16>
    %124 = vector.extract_strided_slice %120 {offsets = [0, 0], sizes = [1, 128], strides = [1, 1]} : vector<9x128xbf16> to vector<1x128xbf16>
    %125 = vector.broadcast %124 : vector<1x128xbf16> to vector<16x128xbf16>
    %126 = arith.mulf %123, %125 : vector<16x128xbf16>
    %127 = vector.extract_strided_slice %119 {offsets = [0, 120], sizes = [16, 8], strides = [1, 1]} : vector<16x128xbf16> to vector<16x8xbf16>
    %128 = vector.extract_strided_slice %119 {offsets = [0, 0], sizes = [16, 120], strides = [1, 1]} : vector<16x128xbf16> to vector<16x120xbf16>
    %129 = tpu.concatenate %127, %128 in 1 : vector<16x8xbf16>, vector<16x120xbf16> -> vector<16x128xbf16>
    %130 = vector.extract_strided_slice %120 {offsets = [1, 0], sizes = [1, 128], strides = [1, 1]} : vector<9x128xbf16> to vector<1x128xbf16>
    %131 = vector.broadcast %130 : vector<1x128xbf16> to vector<16x128xbf16>
    %132 = arith.mulf %129, %131 : vector<16x128xbf16>
    %133 = vector.extract_strided_slice %119 {offsets = [0, 121], sizes = [16, 7], strides = [1, 1]} : vector<16x128xbf16> to vector<16x7xbf16>
    %134 = vector.extract_strided_slice %119 {offsets = [0, 0], sizes = [16, 121], strides = [1, 1]} : vector<16x128xbf16> to vector<16x121xbf16>
    %135 = tpu.concatenate %133, %134 in 1 : vector<16x7xbf16>, vector<16x121xbf16> -> vector<16x128xbf16>
    %136 = vector.extract_strided_slice %120 {offsets = [2, 0], sizes = [1, 128], strides = [1, 1]} : vector<9x128xbf16> to vector<1x128xbf16>
    %137 = vector.broadcast %136 : vector<1x128xbf16> to vector<16x128xbf16>
    %138 = arith.mulf %135, %137 : vector<16x128xbf16>
    %139 = vector.extract_strided_slice %119 {offsets = [0, 127], sizes = [16, 1], strides = [1, 1]} : vector<16x128xbf16> to vector<16x1xbf16>
    %140 = vector.extract_strided_slice %119 {offsets = [0, 0], sizes = [16, 127], strides = [1, 1]} : vector<16x128xbf16> to vector<16x127xbf16>
    %141 = tpu.concatenate %139, %140 in 1 : vector<16x1xbf16>, vector<16x127xbf16> -> vector<16x128xbf16>
    %142 = vector.extract_strided_slice %120 {offsets = [3, 0], sizes = [1, 128], strides = [1, 1]} : vector<9x128xbf16> to vector<1x128xbf16>
    %143 = vector.broadcast %142 : vector<1x128xbf16> to vector<16x128xbf16>
    %144 = arith.mulf %141, %143 : vector<16x128xbf16>
    %145 = vector.extract_strided_slice %119 {offsets = [0, 1], sizes = [16, 127], strides = [1, 1]} : vector<16x128xbf16> to vector<16x127xbf16>
    %146 = vector.extract_strided_slice %119 {offsets = [0, 0], sizes = [16, 1], strides = [1, 1]} : vector<16x128xbf16> to vector<16x1xbf16>
    %147 = tpu.concatenate %145, %146 in 1 : vector<16x127xbf16>, vector<16x1xbf16> -> vector<16x128xbf16>
    %148 = vector.extract_strided_slice %120 {offsets = [5, 0], sizes = [1, 128], strides = [1, 1]} : vector<9x128xbf16> to vector<1x128xbf16>
    %149 = vector.broadcast %148 : vector<1x128xbf16> to vector<16x128xbf16>
    %150 = arith.mulf %147, %149 : vector<16x128xbf16>
    %151 = vector.extract_strided_slice %119 {offsets = [0, 7], sizes = [16, 121], strides = [1, 1]} : vector<16x128xbf16> to vector<16x121xbf16>
    %152 = vector.extract_strided_slice %119 {offsets = [0, 0], sizes = [16, 7], strides = [1, 1]} : vector<16x128xbf16> to vector<16x7xbf16>
    %153 = tpu.concatenate %151, %152 in 1 : vector<16x121xbf16>, vector<16x7xbf16> -> vector<16x128xbf16>
    %154 = vector.extract_strided_slice %120 {offsets = [6, 0], sizes = [1, 128], strides = [1, 1]} : vector<9x128xbf16> to vector<1x128xbf16>
    %155 = vector.broadcast %154 : vector<1x128xbf16> to vector<16x128xbf16>
    %156 = arith.mulf %153, %155 : vector<16x128xbf16>
    %157 = vector.extract_strided_slice %119 {offsets = [0, 8], sizes = [16, 120], strides = [1, 1]} : vector<16x128xbf16> to vector<16x120xbf16>
    %158 = vector.extract_strided_slice %119 {offsets = [0, 0], sizes = [16, 8], strides = [1, 1]} : vector<16x128xbf16> to vector<16x8xbf16>
    %159 = tpu.concatenate %157, %158 in 1 : vector<16x120xbf16>, vector<16x8xbf16> -> vector<16x128xbf16>
    %160 = vector.extract_strided_slice %120 {offsets = [7, 0], sizes = [1, 128], strides = [1, 1]} : vector<9x128xbf16> to vector<1x128xbf16>
    %161 = vector.broadcast %160 : vector<1x128xbf16> to vector<16x128xbf16>
    %162 = arith.mulf %159, %161 : vector<16x128xbf16>
    %163 = vector.extract_strided_slice %119 {offsets = [0, 9], sizes = [16, 119], strides = [1, 1]} : vector<16x128xbf16> to vector<16x119xbf16>
    %164 = vector.extract_strided_slice %119 {offsets = [0, 0], sizes = [16, 9], strides = [1, 1]} : vector<16x128xbf16> to vector<16x9xbf16>
    %165 = tpu.concatenate %163, %164 in 1 : vector<16x119xbf16>, vector<16x9xbf16> -> vector<16x128xbf16>
    %166 = vector.extract_strided_slice %120 {offsets = [8, 0], sizes = [1, 128], strides = [1, 1]} : vector<9x128xbf16> to vector<1x128xbf16>
    %167 = vector.broadcast %166 : vector<1x128xbf16> to vector<16x128xbf16>
    %168 = arith.mulf %165, %167 : vector<16x128xbf16>
    %169 = tpu.concatenate %126, %132, %138, %144, %119, %150, %156, %162, %168 in 0 : vector<16x128xbf16>, vector<16x128xbf16>, vector<16x128xbf16>, vector<16x128xbf16>, vector<16x128xbf16>, vector<16x128xbf16>, vector<16x128xbf16>, vector<16x128xbf16>, vector<16x128xbf16> -> vector<144x128xbf16>
    %c0_21 = arith.constant 0 : index
    %c0_22 = arith.constant 0 : index
    %170 = vector.load %arg8[%c0_21, %c0_22] : memref<14x144xbf16, #tpu.memory_space<vmem>>, vector<14x144xbf16>
    %cst_23 = arith.constant dense<0.000000e+00> : vector<14x128xf32>
    %171 = tpu.matmul %170, %169, %cst_23 {dimension_numbers = #tpu.dot_dimension_numbers<[1], [0], [0], [1], [0, 0, 1, 1], [], []>} : vector<14x144xbf16>, vector<144x128xbf16>, vector<14x128xf32> -> vector<14x128xf32>
    %c0_24 = arith.constant 0 : index
    %c0_25 = arith.constant 0 : index
    %172 = vector.load %arg9[%c0_24, %c0_25] : memref<14x1xf32, #tpu.memory_space<vmem>>, vector<14x1xf32>
    %173 = vector.broadcast %172 : vector<14x1xf32> to vector<14x128xf32>
    %174 = arith.addf %171, %173 : vector<14x128xf32>
    %c0_26 = arith.constant 0 : index
    %c0_27 = arith.constant 0 : index
    %175 = vector.load %arg25[%c0_26, %c0_27] : memref<14x168xf32, #tpu.memory_space<vmem>>, vector<14x128xf32>
    tpu.vector_store %arg25[%c0_26, %c0_27], %174 {strides = array<i32>} : memref<14x168xf32, #tpu.memory_space<vmem>>, vector<14x128xf32>,
    %c0_28 = arith.constant 0 : index
    %c0_29 = arith.constant 0 : index
    %176 = vector.load %arg13[%c0_28, %c0_29] : memref<9x128xbf16, #tpu.memory_space<vmem>>, vector<9x128xbf16>
    %177 = vector.extract_strided_slice %119 {offsets = [0, 119], sizes = [16, 9], strides = [1, 1]} : vector<16x128xbf16> to vector<16x9xbf16>
    %178 = vector.extract_strided_slice %119 {offsets = [0, 0], sizes = [16, 119], strides = [1, 1]} : vector<16x128xbf16> to vector<16x119xbf16>
    %179 = tpu.concatenate %177, %178 in 1 : vector<16x9xbf16>, vector<16x119xbf16> -> vector<16x128xbf16>
    %180 = vector.extract_strided_slice %176 {offsets = [0, 0], sizes = [1, 128], strides = [1, 1]} : vector<9x128xbf16> to vector<1x128xbf16>
    %181 = vector.broadcast %180 : vector<1x128xbf16> to vector<16x128xbf16>
    %182 = arith.mulf %179, %181 : vector<16x128xbf16>
    %183 = vector.extract_strided_slice %119 {offsets = [0, 120], sizes = [16, 8], strides = [1, 1]} : vector<16x128xbf16> to vector<16x8xbf16>
    %184 = vector.extract_strided_slice %119 {offsets = [0, 0], sizes = [16, 120], strides = [1, 1]} : vector<16x128xbf16> to vector<16x120xbf16>
    %185 = tpu.concatenate %183, %184 in 1 : vector<16x8xbf16>, vector<16x120xbf16> -> vector<16x128xbf16>
    %186 = vector.extract_strided_slice %176 {offsets = [1, 0], sizes = [1, 128], strides = [1, 1]} : vector<9x128xbf16> to vector<1x128xbf16>
    %187 = vector.broadcast %186 : vector<1x128xbf16> to vector<16x128xbf16>
    %188 = arith.mulf %185, %187 : vector<16x128xbf16>
    %189 = vector.extract_strided_slice %119 {offsets = [0, 121], sizes = [16, 7], strides = [1, 1]} : vector<16x128xbf16> to vector<16x7xbf16>
    %190 = vector.extract_strided_slice %119 {offsets = [0, 0], sizes = [16, 121], strides = [1, 1]} : vector<16x128xbf16> to vector<16x121xbf16>
    %191 = tpu.concatenate %189, %190 in 1 : vector<16x7xbf16>, vector<16x121xbf16> -> vector<16x128xbf16>
    %192 = vector.extract_strided_slice %176 {offsets = [2, 0], sizes = [1, 128], strides = [1, 1]} : vector<9x128xbf16> to vector<1x128xbf16>
    %193 = vector.broadcast %192 : vector<1x128xbf16> to vector<16x128xbf16>
    %194 = arith.mulf %191, %193 : vector<16x128xbf16>
    %195 = vector.extract_strided_slice %119 {offsets = [0, 127], sizes = [16, 1], strides = [1, 1]} : vector<16x128xbf16> to vector<16x1xbf16>
    %196 = vector.extract_strided_slice %119 {offsets = [0, 0], sizes = [16, 127], strides = [1, 1]} : vector<16x128xbf16> to vector<16x127xbf16>
    %197 = tpu.concatenate %195, %196 in 1 : vector<16x1xbf16>, vector<16x127xbf16> -> vector<16x128xbf16>
    %198 = vector.extract_strided_slice %176 {offsets = [3, 0], sizes = [1, 128], strides = [1, 1]} : vector<9x128xbf16> to vector<1x128xbf16>
    %199 = vector.broadcast %198 : vector<1x128xbf16> to vector<16x128xbf16>
    %200 = arith.mulf %197, %199 : vector<16x128xbf16>
    %201 = vector.extract_strided_slice %119 {offsets = [0, 1], sizes = [16, 127], strides = [1, 1]} : vector<16x128xbf16> to vector<16x127xbf16>
    %202 = vector.extract_strided_slice %119 {offsets = [0, 0], sizes = [16, 1], strides = [1, 1]} : vector<16x128xbf16> to vector<16x1xbf16>
    %203 = tpu.concatenate %201, %202 in 1 : vector<16x127xbf16>, vector<16x1xbf16> -> vector<16x128xbf16>
    %204 = vector.extract_strided_slice %176 {offsets = [5, 0], sizes = [1, 128], strides = [1, 1]} : vector<9x128xbf16> to vector<1x128xbf16>
    %205 = vector.broadcast %204 : vector<1x128xbf16> to vector<16x128xbf16>
    %206 = arith.mulf %203, %205 : vector<16x128xbf16>
    %207 = vector.extract_strided_slice %119 {offsets = [0, 7], sizes = [16, 121], strides = [1, 1]} : vector<16x128xbf16> to vector<16x121xbf16>
    %208 = vector.extract_strided_slice %119 {offsets = [0, 0], sizes = [16, 7], strides = [1, 1]} : vector<16x128xbf16> to vector<16x7xbf16>
    %209 = tpu.concatenate %207, %208 in 1 : vector<16x121xbf16>, vector<16x7xbf16> -> vector<16x128xbf16>
    %210 = vector.extract_strided_slice %176 {offsets = [6, 0], sizes = [1, 128], strides = [1, 1]} : vector<9x128xbf16> to vector<1x128xbf16>
    %211 = vector.broadcast %210 : vector<1x128xbf16> to vector<16x128xbf16>
    %212 = arith.mulf %209, %211 : vector<16x128xbf16>
    %213 = vector.extract_strided_slice %119 {offsets = [0, 8], sizes = [16, 120], strides = [1, 1]} : vector<16x128xbf16> to vector<16x120xbf16>
    %214 = vector.extract_strided_slice %119 {offsets = [0, 0], sizes = [16, 8], strides = [1, 1]} : vector<16x128xbf16> to vector<16x8xbf16>
    %215 = tpu.concatenate %213, %214 in 1 : vector<16x120xbf16>, vector<16x8xbf16> -> vector<16x128xbf16>
    %216 = vector.extract_strided_slice %176 {offsets = [7, 0], sizes = [1, 128], strides = [1, 1]} : vector<9x128xbf16> to vector<1x128xbf16>
    %217 = vector.broadcast %216 : vector<1x128xbf16> to vector<16x128xbf16>
    %218 = arith.mulf %215, %217 : vector<16x128xbf16>
    %219 = vector.extract_strided_slice %119 {offsets = [0, 9], sizes = [16, 119], strides = [1, 1]} : vector<16x128xbf16> to vector<16x119xbf16>
    %220 = vector.extract_strided_slice %119 {offsets = [0, 0], sizes = [16, 9], strides = [1, 1]} : vector<16x128xbf16> to vector<16x9xbf16>
    %221 = tpu.concatenate %219, %220 in 1 : vector<16x119xbf16>, vector<16x9xbf16> -> vector<16x128xbf16>
    %222 = vector.extract_strided_slice %176 {offsets = [8, 0], sizes = [1, 128], strides = [1, 1]} : vector<9x128xbf16> to vector<1x128xbf16>
    %223 = vector.broadcast %222 : vector<1x128xbf16> to vector<16x128xbf16>
    %224 = arith.mulf %221, %223 : vector<16x128xbf16>
    %225 = tpu.concatenate %182, %188, %194, %200, %119, %206, %212, %218, %224 in 0 : vector<16x128xbf16>, vector<16x128xbf16>, vector<16x128xbf16>, vector<16x128xbf16>, vector<16x128xbf16>, vector<16x128xbf16>, vector<16x128xbf16>, vector<16x128xbf16>, vector<16x128xbf16> -> vector<144x128xbf16>
    %c0_30 = arith.constant 0 : index
    %c0_31 = arith.constant 0 : index
    %226 = vector.load %arg11[%c0_30, %c0_31] : memref<16x144xbf16, #tpu.memory_space<vmem>>, vector<16x144xbf16>
    %cst_32 = arith.constant dense<0.000000e+00> : vector<16x128xf32>
    %227 = tpu.matmul %226, %225, %cst_32 {dimension_numbers = #tpu.dot_dimension_numbers<[1], [0], [0], [1], [0, 0, 1, 1], [], []>} : vector<16x144xbf16>, vector<144x128xbf16>, vector<16x128xf32> -> vector<16x128xf32>
    %c0_33 = arith.constant 0 : index
    %c0_34 = arith.constant 0 : index
    %228 = vector.load %arg12[%c0_33, %c0_34] : memref<16x1xf32, #tpu.memory_space<vmem>>, vector<16x1xf32>
    %229 = vector.broadcast %228 : vector<16x1xf32> to vector<16x128xf32>
    %230 = arith.addf %227, %229 : vector<16x128xf32>
    %cst_35 = arith.constant 0.000000e+00 : f32
    %231 = vector.broadcast %cst_35 : f32 to vector<16x128xf32>
    %232 = arith.maximumf %230, %231 : vector<16x128xf32>
    %233 = arith.truncf %232 : vector<16x128xf32> to vector<16x128xbf16>
    %c0_36 = arith.constant 0 : index
    %c0_37 = arith.constant 0 : index
    %234 = vector.load %arg14[%c0_36, %c0_37] : memref<128x32xbf16, #tpu.memory_space<vmem>>, vector<128x32xbf16>
    %cst_38 = arith.constant dense<0.000000e+00> : vector<16x32xf32>
    %235 = tpu.matmul %233, %234, %cst_38 {dimension_numbers = #tpu.dot_dimension_numbers<[1], [0], [0], [1], [0, 0, 1, 1], [], []>} : vector<16x128xbf16>, vector<128x32xbf16>, vector<16x32xf32> -> vector<16x32xf32>
    %236 = arith.truncf %235 : vector<16x32xf32> to vector<16x32xbf16>
    %c0_39 = arith.constant 0 : index
    %c0_40 = arith.constant 0 : index
    %237 = vector.load %arg17[%c0_39, %c0_40] : memref<9x32xbf16, #tpu.memory_space<vmem>>, vector<9x32xbf16>
    %238 = vector.extract_strided_slice %236 {offsets = [0, 27], sizes = [16, 5], strides = [1, 1]} : vector<16x32xbf16> to vector<16x5xbf16>
    %239 = vector.extract_strided_slice %236 {offsets = [0, 0], sizes = [16, 27], strides = [1, 1]} : vector<16x32xbf16> to vector<16x27xbf16>
    %240 = tpu.concatenate %238, %239 in 1 : vector<16x5xbf16>, vector<16x27xbf16> -> vector<16x32xbf16>
    %241 = vector.extract_strided_slice %237 {offsets = [0, 0], sizes = [1, 32], strides = [1, 1]} : vector<9x32xbf16> to vector<1x32xbf16>
    %242 = vector.broadcast %241 : vector<1x32xbf16> to vector<16x32xbf16>
    %243 = arith.mulf %240, %242 : vector<16x32xbf16>
    %244 = vector.extract_strided_slice %236 {offsets = [0, 28], sizes = [16, 4], strides = [1, 1]} : vector<16x32xbf16> to vector<16x4xbf16>
    %245 = vector.extract_strided_slice %236 {offsets = [0, 0], sizes = [16, 28], strides = [1, 1]} : vector<16x32xbf16> to vector<16x28xbf16>
    %246 = tpu.concatenate %244, %245 in 1 : vector<16x4xbf16>, vector<16x28xbf16> -> vector<16x32xbf16>
    %247 = vector.extract_strided_slice %237 {offsets = [1, 0], sizes = [1, 32], strides = [1, 1]} : vector<9x32xbf16> to vector<1x32xbf16>
    %248 = vector.broadcast %247 : vector<1x32xbf16> to vector<16x32xbf16>
    %249 = arith.mulf %246, %248 : vector<16x32xbf16>
    %250 = vector.extract_strided_slice %236 {offsets = [0, 29], sizes = [16, 3], strides = [1, 1]} : vector<16x32xbf16> to vector<16x3xbf16>
    %251 = vector.extract_strided_slice %236 {offsets = [0, 0], sizes = [16, 29], strides = [1, 1]} : vector<16x32xbf16> to vector<16x29xbf16>
    %252 = tpu.concatenate %250, %251 in 1 : vector<16x3xbf16>, vector<16x29xbf16> -> vector<16x32xbf16>
    %253 = vector.extract_strided_slice %237 {offsets = [2, 0], sizes = [1, 32], strides = [1, 1]} : vector<9x32xbf16> to vector<1x32xbf16>
    %254 = vector.broadcast %253 : vector<1x32xbf16> to vector<16x32xbf16>
    %255 = arith.mulf %252, %254 : vector<16x32xbf16>
    %256 = vector.extract_strided_slice %236 {offsets = [0, 31], sizes = [16, 1], strides = [1, 1]} : vector<16x32xbf16> to vector<16x1xbf16>
    %257 = vector.extract_strided_slice %236 {offsets = [0, 0], sizes = [16, 31], strides = [1, 1]} : vector<16x32xbf16> to vector<16x31xbf16>
    %258 = tpu.concatenate %256, %257 in 1 : vector<16x1xbf16>, vector<16x31xbf16> -> vector<16x32xbf16>
    %259 = vector.extract_strided_slice %237 {offsets = [3, 0], sizes = [1, 32], strides = [1, 1]} : vector<9x32xbf16> to vector<1x32xbf16>
    %260 = vector.broadcast %259 : vector<1x32xbf16> to vector<16x32xbf16>
    %261 = arith.mulf %258, %260 : vector<16x32xbf16>
    %262 = vector.extract_strided_slice %236 {offsets = [0, 1], sizes = [16, 31], strides = [1, 1]} : vector<16x32xbf16> to vector<16x31xbf16>
    %263 = vector.extract_strided_slice %236 {offsets = [0, 0], sizes = [16, 1], strides = [1, 1]} : vector<16x32xbf16> to vector<16x1xbf16>
    %264 = tpu.concatenate %262, %263 in 1 : vector<16x31xbf16>, vector<16x1xbf16> -> vector<16x32xbf16>
    %265 = vector.extract_strided_slice %237 {offsets = [5, 0], sizes = [1, 32], strides = [1, 1]} : vector<9x32xbf16> to vector<1x32xbf16>
    %266 = vector.broadcast %265 : vector<1x32xbf16> to vector<16x32xbf16>
    %267 = arith.mulf %264, %266 : vector<16x32xbf16>
    %268 = vector.extract_strided_slice %236 {offsets = [0, 3], sizes = [16, 29], strides = [1, 1]} : vector<16x32xbf16> to vector<16x29xbf16>
    %269 = vector.extract_strided_slice %236 {offsets = [0, 0], sizes = [16, 3], strides = [1, 1]} : vector<16x32xbf16> to vector<16x3xbf16>
    %270 = tpu.concatenate %268, %269 in 1 : vector<16x29xbf16>, vector<16x3xbf16> -> vector<16x32xbf16>
    %271 = vector.extract_strided_slice %237 {offsets = [6, 0], sizes = [1, 32], strides = [1, 1]} : vector<9x32xbf16> to vector<1x32xbf16>
    %272 = vector.broadcast %271 : vector<1x32xbf16> to vector<16x32xbf16>
    %273 = arith.mulf %270, %272 : vector<16x32xbf16>
    %274 = vector.extract_strided_slice %236 {offsets = [0, 4], sizes = [16, 28], strides = [1, 1]} : vector<16x32xbf16> to vector<16x28xbf16>
    %275 = vector.extract_strided_slice %236 {offsets = [0, 0], sizes = [16, 4], strides = [1, 1]} : vector<16x32xbf16> to vector<16x4xbf16>
    %276 = tpu.concatenate %274, %275 in 1 : vector<16x28xbf16>, vector<16x4xbf16> -> vector<16x32xbf16>
    %277 = vector.extract_strided_slice %237 {offsets = [7, 0], sizes = [1, 32], strides = [1, 1]} : vector<9x32xbf16> to vector<1x32xbf16>
    %278 = vector.broadcast %277 : vector<1x32xbf16> to vector<16x32xbf16>
    %279 = arith.mulf %276, %278 : vector<16x32xbf16>
    %280 = vector.extract_strided_slice %236 {offsets = [0, 5], sizes = [16, 27], strides = [1, 1]} : vector<16x32xbf16> to vector<16x27xbf16>
    %281 = vector.extract_strided_slice %236 {offsets = [0, 0], sizes = [16, 5], strides = [1, 1]} : vector<16x32xbf16> to vector<16x5xbf16>
    %282 = tpu.concatenate %280, %281 in 1 : vector<16x27xbf16>, vector<16x5xbf16> -> vector<16x32xbf16>
    %283 = vector.extract_strided_slice %237 {offsets = [8, 0], sizes = [1, 32], strides = [1, 1]} : vector<9x32xbf16> to vector<1x32xbf16>
    %284 = vector.broadcast %283 : vector<1x32xbf16> to vector<16x32xbf16>
    %285 = arith.mulf %282, %284 : vector<16x32xbf16>
    %286 = tpu.concatenate %243, %249, %255, %261, %236, %267, %273, %279, %285 in 0 : vector<16x32xbf16>, vector<16x32xbf16>, vector<16x32xbf16>, vector<16x32xbf16>, vector<16x32xbf16>, vector<16x32xbf16>, vector<16x32xbf16>, vector<16x32xbf16>, vector<16x32xbf16> -> vector<144x32xbf16>
    %c0_41 = arith.constant 0 : index
    %c0_42 = arith.constant 0 : index
    %287 = vector.load %arg15[%c0_41, %c0_42] : memref<14x144xbf16, #tpu.memory_space<vmem>>, vector<14x144xbf16>
    %cst_43 = arith.constant dense<0.000000e+00> : vector<14x32xf32>
    %288 = tpu.matmul %287, %286, %cst_43 {dimension_numbers = #tpu.dot_dimension_numbers<[1], [0], [0], [1], [0, 0, 1, 1], [], []>} : vector<14x144xbf16>, vector<144x32xbf16>, vector<14x32xf32> -> vector<14x32xf32>
    %c0_44 = arith.constant 0 : index
    %c0_45 = arith.constant 0 : index
    %289 = vector.load %arg16[%c0_44, %c0_45] : memref<14x1xf32, #tpu.memory_space<vmem>>, vector<14x1xf32>
    %290 = vector.broadcast %289 : vector<14x1xf32> to vector<14x32xf32>
    %291 = arith.addf %288, %290 : vector<14x32xf32>
    %c0_46 = arith.constant 0 : index
    %c128 = arith.constant 128 : index
    %292 = vector.load %arg25[%c0_46, %c128] : memref<14x168xf32, #tpu.memory_space<vmem>>, vector<14x32xf32>
    tpu.vector_store %arg25[%c0_46, %c128], %291 {strides = array<i32>} : memref<14x168xf32, #tpu.memory_space<vmem>>, vector<14x32xf32>,
    %c0_47 = arith.constant 0 : index
    %c0_48 = arith.constant 0 : index
    %293 = vector.load %arg20[%c0_47, %c0_48] : memref<9x32xbf16, #tpu.memory_space<vmem>>, vector<9x32xbf16>
    %294 = vector.extract_strided_slice %236 {offsets = [0, 27], sizes = [16, 5], strides = [1, 1]} : vector<16x32xbf16> to vector<16x5xbf16>
    %295 = vector.extract_strided_slice %236 {offsets = [0, 0], sizes = [16, 27], strides = [1, 1]} : vector<16x32xbf16> to vector<16x27xbf16>
    %296 = tpu.concatenate %294, %295 in 1 : vector<16x5xbf16>, vector<16x27xbf16> -> vector<16x32xbf16>
    %297 = vector.extract_strided_slice %293 {offsets = [0, 0], sizes = [1, 32], strides = [1, 1]} : vector<9x32xbf16> to vector<1x32xbf16>
    %298 = vector.broadcast %297 : vector<1x32xbf16> to vector<16x32xbf16>
    %299 = arith.mulf %296, %298 : vector<16x32xbf16>
    %300 = vector.extract_strided_slice %236 {offsets = [0, 28], sizes = [16, 4], strides = [1, 1]} : vector<16x32xbf16> to vector<16x4xbf16>
    %301 = vector.extract_strided_slice %236 {offsets = [0, 0], sizes = [16, 28], strides = [1, 1]} : vector<16x32xbf16> to vector<16x28xbf16>
    %302 = tpu.concatenate %300, %301 in 1 : vector<16x4xbf16>, vector<16x28xbf16> -> vector<16x32xbf16>
    %303 = vector.extract_strided_slice %293 {offsets = [1, 0], sizes = [1, 32], strides = [1, 1]} : vector<9x32xbf16> to vector<1x32xbf16>
    %304 = vector.broadcast %303 : vector<1x32xbf16> to vector<16x32xbf16>
    %305 = arith.mulf %302, %304 : vector<16x32xbf16>
    %306 = vector.extract_strided_slice %236 {offsets = [0, 29], sizes = [16, 3], strides = [1, 1]} : vector<16x32xbf16> to vector<16x3xbf16>
    %307 = vector.extract_strided_slice %236 {offsets = [0, 0], sizes = [16, 29], strides = [1, 1]} : vector<16x32xbf16> to vector<16x29xbf16>
    %308 = tpu.concatenate %306, %307 in 1 : vector<16x3xbf16>, vector<16x29xbf16> -> vector<16x32xbf16>
    %309 = vector.extract_strided_slice %293 {offsets = [2, 0], sizes = [1, 32], strides = [1, 1]} : vector<9x32xbf16> to vector<1x32xbf16>
    %310 = vector.broadcast %309 : vector<1x32xbf16> to vector<16x32xbf16>
    %311 = arith.mulf %308, %310 : vector<16x32xbf16>
    %312 = vector.extract_strided_slice %236 {offsets = [0, 31], sizes = [16, 1], strides = [1, 1]} : vector<16x32xbf16> to vector<16x1xbf16>
    %313 = vector.extract_strided_slice %236 {offsets = [0, 0], sizes = [16, 31], strides = [1, 1]} : vector<16x32xbf16> to vector<16x31xbf16>
    %314 = tpu.concatenate %312, %313 in 1 : vector<16x1xbf16>, vector<16x31xbf16> -> vector<16x32xbf16>
    %315 = vector.extract_strided_slice %293 {offsets = [3, 0], sizes = [1, 32], strides = [1, 1]} : vector<9x32xbf16> to vector<1x32xbf16>
    %316 = vector.broadcast %315 : vector<1x32xbf16> to vector<16x32xbf16>
    %317 = arith.mulf %314, %316 : vector<16x32xbf16>
    %318 = vector.extract_strided_slice %236 {offsets = [0, 1], sizes = [16, 31], strides = [1, 1]} : vector<16x32xbf16> to vector<16x31xbf16>
    %319 = vector.extract_strided_slice %236 {offsets = [0, 0], sizes = [16, 1], strides = [1, 1]} : vector<16x32xbf16> to vector<16x1xbf16>
    %320 = tpu.concatenate %318, %319 in 1 : vector<16x31xbf16>, vector<16x1xbf16> -> vector<16x32xbf16>
    %321 = vector.extract_strided_slice %293 {offsets = [5, 0], sizes = [1, 32], strides = [1, 1]} : vector<9x32xbf16> to vector<1x32xbf16>
    %322 = vector.broadcast %321 : vector<1x32xbf16> to vector<16x32xbf16>
    %323 = arith.mulf %320, %322 : vector<16x32xbf16>
    %324 = vector.extract_strided_slice %236 {offsets = [0, 3], sizes = [16, 29], strides = [1, 1]} : vector<16x32xbf16> to vector<16x29xbf16>
    %325 = vector.extract_strided_slice %236 {offsets = [0, 0], sizes = [16, 3], strides = [1, 1]} : vector<16x32xbf16> to vector<16x3xbf16>
    %326 = tpu.concatenate %324, %325 in 1 : vector<16x29xbf16>, vector<16x3xbf16> -> vector<16x32xbf16>
    %327 = vector.extract_strided_slice %293 {offsets = [6, 0], sizes = [1, 32], strides = [1, 1]} : vector<9x32xbf16> to vector<1x32xbf16>
    %328 = vector.broadcast %327 : vector<1x32xbf16> to vector<16x32xbf16>
    %329 = arith.mulf %326, %328 : vector<16x32xbf16>
    %330 = vector.extract_strided_slice %236 {offsets = [0, 4], sizes = [16, 28], strides = [1, 1]} : vector<16x32xbf16> to vector<16x28xbf16>
    %331 = vector.extract_strided_slice %236 {offsets = [0, 0], sizes = [16, 4], strides = [1, 1]} : vector<16x32xbf16> to vector<16x4xbf16>
    %332 = tpu.concatenate %330, %331 in 1 : vector<16x28xbf16>, vector<16x4xbf16> -> vector<16x32xbf16>
    %333 = vector.extract_strided_slice %293 {offsets = [7, 0], sizes = [1, 32], strides = [1, 1]} : vector<9x32xbf16> to vector<1x32xbf16>
    %334 = vector.broadcast %333 : vector<1x32xbf16> to vector<16x32xbf16>
    %335 = arith.mulf %332, %334 : vector<16x32xbf16>
    %336 = vector.extract_strided_slice %236 {offsets = [0, 5], sizes = [16, 27], strides = [1, 1]} : vector<16x32xbf16> to vector<16x27xbf16>
    %337 = vector.extract_strided_slice %236 {offsets = [0, 0], sizes = [16, 5], strides = [1, 1]} : vector<16x32xbf16> to vector<16x5xbf16>
    %338 = tpu.concatenate %336, %337 in 1 : vector<16x27xbf16>, vector<16x5xbf16> -> vector<16x32xbf16>
    %339 = vector.extract_strided_slice %293 {offsets = [8, 0], sizes = [1, 32], strides = [1, 1]} : vector<9x32xbf16> to vector<1x32xbf16>
    %340 = vector.broadcast %339 : vector<1x32xbf16> to vector<16x32xbf16>
    %341 = arith.mulf %338, %340 : vector<16x32xbf16>
    %342 = tpu.concatenate %299, %305, %311, %317, %236, %323, %329, %335, %341 in 0 : vector<16x32xbf16>, vector<16x32xbf16>, vector<16x32xbf16>, vector<16x32xbf16>, vector<16x32xbf16>, vector<16x32xbf16>, vector<16x32xbf16>, vector<16x32xbf16>, vector<16x32xbf16> -> vector<144x32xbf16>
    %c0_49 = arith.constant 0 : index
    %c0_50 = arith.constant 0 : index
    %343 = vector.load %arg18[%c0_49, %c0_50] : memref<16x144xbf16, #tpu.memory_space<vmem>>, vector<16x144xbf16>
    %cst_51 = arith.constant dense<0.000000e+00> : vector<16x32xf32>
    %344 = tpu.matmul %343, %342, %cst_51 {dimension_numbers = #tpu.dot_dimension_numbers<[1], [0], [0], [1], [0, 0, 1, 1], [], []>} : vector<16x144xbf16>, vector<144x32xbf16>, vector<16x32xf32> -> vector<16x32xf32>
    %c0_52 = arith.constant 0 : index
    %c0_53 = arith.constant 0 : index
    %345 = vector.load %arg19[%c0_52, %c0_53] : memref<16x1xf32, #tpu.memory_space<vmem>>, vector<16x1xf32>
    %346 = vector.broadcast %345 : vector<16x1xf32> to vector<16x32xf32>
    %347 = arith.addf %344, %346 : vector<16x32xf32>
    %cst_54 = arith.constant 0.000000e+00 : f32
    %348 = vector.broadcast %cst_54 : f32 to vector<16x32xf32>
    %349 = arith.maximumf %347, %348 : vector<16x32xf32>
    %350 = arith.truncf %349 : vector<16x32xf32> to vector<16x32xbf16>
    %c0_55 = arith.constant 0 : index
    %c0_56 = arith.constant 0 : index
    %351 = vector.load %arg21[%c0_55, %c0_56] : memref<32x8xbf16, #tpu.memory_space<vmem>>, vector<32x8xbf16>
    %cst_57 = arith.constant dense<0.000000e+00> : vector<16x8xf32>
    %352 = tpu.matmul %350, %351, %cst_57 {dimension_numbers = #tpu.dot_dimension_numbers<[1], [0], [0], [1], [0, 0, 1, 1], [], []>} : vector<16x32xbf16>, vector<32x8xbf16>, vector<16x8xf32> -> vector<16x8xf32>
    %353 = arith.truncf %352 : vector<16x8xf32> to vector<16x8xbf16>
    %c0_58 = arith.constant 0 : index
    %c0_59 = arith.constant 0 : index
    %354 = vector.load %arg24[%c0_58, %c0_59] : memref<9x8xbf16, #tpu.memory_space<vmem>>, vector<9x8xbf16>
    %355 = vector.extract_strided_slice %353 {offsets = [0, 5], sizes = [16, 3], strides = [1, 1]} : vector<16x8xbf16> to vector<16x3xbf16>
    %356 = vector.extract_strided_slice %353 {offsets = [0, 0], sizes = [16, 5], strides = [1, 1]} : vector<16x8xbf16> to vector<16x5xbf16>
    %357 = tpu.concatenate %355, %356 in 1 : vector<16x3xbf16>, vector<16x5xbf16> -> vector<16x8xbf16>
    %358 = vector.extract_strided_slice %354 {offsets = [0, 0], sizes = [1, 8], strides = [1, 1]} : vector<9x8xbf16> to vector<1x8xbf16>
    %359 = vector.broadcast %358 : vector<1x8xbf16> to vector<16x8xbf16>
    %360 = arith.mulf %357, %359 : vector<16x8xbf16>
    %361 = vector.extract_strided_slice %353 {offsets = [0, 6], sizes = [16, 2], strides = [1, 1]} : vector<16x8xbf16> to vector<16x2xbf16>
    %362 = vector.extract_strided_slice %353 {offsets = [0, 0], sizes = [16, 6], strides = [1, 1]} : vector<16x8xbf16> to vector<16x6xbf16>
    %363 = tpu.concatenate %361, %362 in 1 : vector<16x2xbf16>, vector<16x6xbf16> -> vector<16x8xbf16>
    %364 = vector.extract_strided_slice %354 {offsets = [1, 0], sizes = [1, 8], strides = [1, 1]} : vector<9x8xbf16> to vector<1x8xbf16>
    %365 = vector.broadcast %364 : vector<1x8xbf16> to vector<16x8xbf16>
    %366 = arith.mulf %363, %365 : vector<16x8xbf16>
    %367 = vector.extract_strided_slice %353 {offsets = [0, 7], sizes = [16, 1], strides = [1, 1]} : vector<16x8xbf16> to vector<16x1xbf16>
    %368 = vector.extract_strided_slice %353 {offsets = [0, 0], sizes = [16, 7], strides = [1, 1]} : vector<16x8xbf16> to vector<16x7xbf16>
    %369 = tpu.concatenate %367, %368 in 1 : vector<16x1xbf16>, vector<16x7xbf16> -> vector<16x8xbf16>
    %370 = vector.extract_strided_slice %354 {offsets = [2, 0], sizes = [1, 8], strides = [1, 1]} : vector<9x8xbf16> to vector<1x8xbf16>
    %371 = vector.broadcast %370 : vector<1x8xbf16> to vector<16x8xbf16>
    %372 = arith.mulf %369, %371 : vector<16x8xbf16>
    %373 = vector.extract_strided_slice %353 {offsets = [0, 7], sizes = [16, 1], strides = [1, 1]} : vector<16x8xbf16> to vector<16x1xbf16>
    %374 = vector.extract_strided_slice %353 {offsets = [0, 0], sizes = [16, 7], strides = [1, 1]} : vector<16x8xbf16> to vector<16x7xbf16>
    %375 = tpu.concatenate %373, %374 in 1 : vector<16x1xbf16>, vector<16x7xbf16> -> vector<16x8xbf16>
    %376 = vector.extract_strided_slice %354 {offsets = [3, 0], sizes = [1, 8], strides = [1, 1]} : vector<9x8xbf16> to vector<1x8xbf16>
    %377 = vector.broadcast %376 : vector<1x8xbf16> to vector<16x8xbf16>
    %378 = arith.mulf %375, %377 : vector<16x8xbf16>
    %379 = vector.extract_strided_slice %353 {offsets = [0, 1], sizes = [16, 7], strides = [1, 1]} : vector<16x8xbf16> to vector<16x7xbf16>
    %380 = vector.extract_strided_slice %353 {offsets = [0, 0], sizes = [16, 1], strides = [1, 1]} : vector<16x8xbf16> to vector<16x1xbf16>
    %381 = tpu.concatenate %379, %380 in 1 : vector<16x7xbf16>, vector<16x1xbf16> -> vector<16x8xbf16>
    %382 = vector.extract_strided_slice %354 {offsets = [5, 0], sizes = [1, 8], strides = [1, 1]} : vector<9x8xbf16> to vector<1x8xbf16>
    %383 = vector.broadcast %382 : vector<1x8xbf16> to vector<16x8xbf16>
    %384 = arith.mulf %381, %383 : vector<16x8xbf16>
    %385 = vector.extract_strided_slice %353 {offsets = [0, 1], sizes = [16, 7], strides = [1, 1]} : vector<16x8xbf16> to vector<16x7xbf16>
    %386 = vector.extract_strided_slice %353 {offsets = [0, 0], sizes = [16, 1], strides = [1, 1]} : vector<16x8xbf16> to vector<16x1xbf16>
    %387 = tpu.concatenate %385, %386 in 1 : vector<16x7xbf16>, vector<16x1xbf16> -> vector<16x8xbf16>
    %388 = vector.extract_strided_slice %354 {offsets = [6, 0], sizes = [1, 8], strides = [1, 1]} : vector<9x8xbf16> to vector<1x8xbf16>
    %389 = vector.broadcast %388 : vector<1x8xbf16> to vector<16x8xbf16>
    %390 = arith.mulf %387, %389 : vector<16x8xbf16>
    %391 = vector.extract_strided_slice %353 {offsets = [0, 2], sizes = [16, 6], strides = [1, 1]} : vector<16x8xbf16> to vector<16x6xbf16>
    %392 = vector.extract_strided_slice %353 {offsets = [0, 0], sizes = [16, 2], strides = [1, 1]} : vector<16x8xbf16> to vector<16x2xbf16>
    %393 = tpu.concatenate %391, %392 in 1 : vector<16x6xbf16>, vector<16x2xbf16> -> vector<16x8xbf16>
    %394 = vector.extract_strided_slice %354 {offsets = [7, 0], sizes = [1, 8], strides = [1, 1]} : vector<9x8xbf16> to vector<1x8xbf16>
    %395 = vector.broadcast %394 : vector<1x8xbf16> to vector<16x8xbf16>
    %396 = arith.mulf %393, %395 : vector<16x8xbf16>
    %397 = vector.extract_strided_slice %353 {offsets = [0, 3], sizes = [16, 5], strides = [1, 1]} : vector<16x8xbf16> to vector<16x5xbf16>
    %398 = vector.extract_strided_slice %353 {offsets = [0, 0], sizes = [16, 3], strides = [1, 1]} : vector<16x8xbf16> to vector<16x3xbf16>
    %399 = tpu.concatenate %397, %398 in 1 : vector<16x5xbf16>, vector<16x3xbf16> -> vector<16x8xbf16>
    %400 = vector.extract_strided_slice %354 {offsets = [8, 0], sizes = [1, 8], strides = [1, 1]} : vector<9x8xbf16> to vector<1x8xbf16>
    %401 = vector.broadcast %400 : vector<1x8xbf16> to vector<16x8xbf16>
    %402 = arith.mulf %399, %401 : vector<16x8xbf16>
    %403 = tpu.concatenate %360, %366, %372, %378, %353, %384, %390, %396, %402 in 0 : vector<16x8xbf16>, vector<16x8xbf16>, vector<16x8xbf16>, vector<16x8xbf16>, vector<16x8xbf16>, vector<16x8xbf16>, vector<16x8xbf16>, vector<16x8xbf16>, vector<16x8xbf16> -> vector<144x8xbf16>
    %c0_60 = arith.constant 0 : index
    %c0_61 = arith.constant 0 : index
    %404 = vector.load %arg22[%c0_60, %c0_61] : memref<14x144xbf16, #tpu.memory_space<vmem>>, vector<14x144xbf16>
    %cst_62 = arith.constant dense<0.000000e+00> : vector<14x8xf32>
    %405 = tpu.matmul %404, %403, %cst_62 {dimension_numbers = #tpu.dot_dimension_numbers<[1], [0], [0], [1], [0, 0, 1, 1], [], []>} : vector<14x144xbf16>, vector<144x8xbf16>, vector<14x8xf32> -> vector<14x8xf32>
    %c0_63 = arith.constant 0 : index
    %c0_64 = arith.constant 0 : index
    %406 = vector.load %arg23[%c0_63, %c0_64] : memref<14x1xf32, #tpu.memory_space<vmem>>, vector<14x1xf32>
    %407 = vector.broadcast %406 : vector<14x1xf32> to vector<14x8xf32>
    %408 = arith.addf %405, %407 : vector<14x8xf32>
    %c0_65 = arith.constant 0 : index
    %c160 = arith.constant 160 : index
    %409 = vector.load %arg25[%c0_65, %c160] : memref<14x168xf32, #tpu.memory_space<vmem>>, vector<14x8xf32>
    tpu.vector_store %arg25[%c0_65, %c160], %408 {strides = array<i32>} : memref<14x168xf32, #tpu.memory_space<vmem>>, vector<14x8xf32>,
    return
  }
}

</mosaic_0001>

<bundles_post_ra>
// kernel: _lambda_.1
= control target key start
LH: loop header
LB: loop body
LE: loop exit
PB: predicated region body
PF: predicated region fallthrough
CT: control target
= control target key end

     0   :  { %s5119_s0 = inlined_call_operand.vmem [shape: bf16[4,512], index: 0, kind: input, shape index: {}]   ;;  %s5120_s1 = inlined_call_operand.hbm [shape: bf16[8,36], index: 1, kind: input, shape index: {}]   ;;  %s5121_s2 = inlined_call_operand.vmem [shape: f32[8,1], index: 2, kind: input, shape index: {}]   ;;  %s5122_s3 = inlined_call_operand.vmem [shape: bf16[9,512], index: 3, kind: input, shape index: {}, may-alias: {3,6}]   ;;  %s5123_s4 = inlined_call_operand.hbm [shape: bf16[16,72], index: 4, kind: input, shape index: {}]   ;;  %s5124_s5 = inlined_call_operand.vmem [shape: f32[16,1], index: 5, kind: input, shape index: {}]   ;;  %s5125_s6 = inlined_call_operand.vmem [shape: bf16[9,512], index: 6, kind: input, shape index: {}, may-alias: {3,6}]   ;;  %s5126_s7 = inlined_call_operand.vmem [shape: bf16[512,128], index: 7, kind: input, shape index: {}]   ;;  %s5127_s8 = inlined_call_operand.vmem [shape: bf16[14,144], index: 8, kind: input, shape index: {}]   ;;  %s5128_s9 = inlined_call_operand.vmem [shape: f32[14,1], index: 9, kind: input, shape index: {}]   ;;  %s5129_s10 = inlined_call_operand.hbm [shape: bf16[9,128], index: 10, kind: input, shape index: {}, may-alias: {10,13}]   ;;  %s5130_s11 = inlined_call_operand.hbm [shape: bf16[16,144], index: 11, kind: input, shape index: {}]   ;;  %s5131_s12 = inlined_call_operand.hbm [shape: f32[16,1], index: 12, kind: input, shape index: {}]   ;;  %s5132_s13 = inlined_call_operand.hbm [shape: bf16[9,128], index: 13, kind: input, shape index: {}, may-alias: {10,13}]   ;;  %s5133_s14 = inlined_call_operand.vmem [shape: bf16[128,32], index: 14, kind: input, shape index: {}]   ;;  %s5134_s15 = inlined_call_operand.hbm [shape: bf16[14,144], index: 15, kind: input, shape index: {}]   ;;  %s5135_s16 = inlined_call_operand.hbm [shape: f32[14,1], index: 16, kind: input, shape index: {}]   ;;  %s5136_s17 = inlined_call_operand.hbm [shape: bf16[9,32], index: 17, kind: input, shape index: {}, may-alias: {17,20}]   ;;  %s5137_s18 = inlined_call_operand.hbm [shape: bf16[16,144], index: 18, kind: input, shape index: {}]   ;;  %s5138_s19 = inlined_call_operand.hbm [shape: f32[16,1], index: 19, kind: input, shape index: {}]   ;;  %s5139_s20 = inlined_call_operand.hbm [shape: bf16[9,32], index: 20, kind: input, shape index: {}, may-alias: {17,20}]   ;;  %s5140_s21 = inlined_call_operand.hbm [shape: bf16[32,8], index: 21, kind: input, shape index: {}]   ;;  %s5141_s22 = inlined_call_operand.hbm [shape: bf16[14,144], index: 22, kind: input, shape index: {}]   ;;  %s5142_s23 = inlined_call_operand.hbm [shape: f32[14,1], index: 23, kind: input, shape index: {}]   ;;  %s5143_s24 = inlined_call_operand.hbm [shape: bf16[9,8], index: 24, kind: input, shape index: {}]   ;;  %s5144_s25 = inlined_call_operand.vmem [shape: f32[14,168], index: 25, kind: output, shape index: {}]  }
   0x1   :  { %5151 = sst [smem:[#allocation36_spill]] %s5119_s0 }
   0x2   :  { %5152 = sst [smem:[#allocation37_spill]] %s5120_s1 }
   0x3   :  { %5153 = sst [smem:[#allocation38_spill]] %s5121_s2 }
   0x4   :  { %5154 = sst [smem:[#allocation39_spill]] %s5122_s3 }
   0x5   :  { %5155 = sst [smem:[#allocation40_spill]] %s5123_s4 }
   0x6   :  { %5156 = sst [smem:[#allocation41_spill]] %s5124_s5 }
   0x7   :  { %5157 = sst [smem:[#allocation42_spill]] %s5125_s6 }
   0x8   :  { %5158 = sst [smem:[#allocation43_spill]] %s5126_s7 }
   0x9   :  { %5159 = sst [smem:[#allocation44_spill]] %s5127_s8 }
   0xa   :  { %5160 = sst [smem:[#allocation45_spill]] %s5128_s9 }
   0xb   :  { %30 = vsyncpa [#allocation3], 0 }
   0xc   :  { %31 = vsyncpa [#allocation5], 0 }
   0xd   :  { %32 = vsyncpa [#allocation8], 0 }
   0xe   :  { %33 = vsyncpa [#allocation11], 0 }
   0xf   :  { %34 = vsyncpa [#allocation14], 0 }
  0x10   :  { %35 = vsyncpa [#allocation17], 0 }
  0x11   :  { %36 = vsyncpa [#allocation20], 0 }
  0x12   :  { %37 = vsyncpa [#allocation23], 0  ;;  %s5161_s6 = sld [smem:[#allocation40_spill]] }
  0x18   :  { %s60_s30 = sshll.u32 %s5161_s6, 4  ;;  %s61_s30 = int_to_ptr.hbm [resolvable:$true] %s60_s30 }
  0x19   :  { %38 = vsyncpa [#allocation26], 0  ;;  %s3879_s7 = smov [#allocation4]   ;;  %s96_s8 = sshll.u32 %s5130_s11, 4  ;;  %s97_s8 = int_to_ptr.hbm [resolvable:$true] %s96_s8 }
  0x1a   :  { %s62_s3 = sshll.u32 %s3879_s7, 4  ;;  %s3880_s27 = smov 64   ;;  %s63_s3 = int_to_ptr.vmem [resolvable:$true] %s62_s3 }
  0x1b   :  { %s3881_s4 = smov 4   ;;  %s3882_s28 = smov [#allocation7]  }
  0x1c   :  { %68 = dma.hbm_to_vmem [thread:$0]  %s61_s30, 128, %s63_s3, [#allocation5], %s3880_s27, %s3880_s27, %s3881_s4  }
  0x1d   :  { %s98_s9 = sshll.u32 %s3882_s28, 4  ;;  %s3883_s5 = smov 128   ;;  %s99_s9 = int_to_ptr.vmem [resolvable:$true] %s98_s9 }
  0x1e   :  { %s3884_s0 = smov 8   ;;  %s122_s11 = sshll.u32 %s5132_s13, 4  ;;  %s123_s11 = int_to_ptr.hbm [resolvable:$true] %s122_s11 }
  0x1f   :  { %104 = dma.hbm_to_vmem [thread:$0]  %s97_s8, 256, %s99_s9, [#allocation8], %s3883_s5, %s3883_s5, %s3884_s0  }
  0x20   :  { %s3885_s6 = smov [#allocation10]   ;;  %s150_s3 = sshll.u32 %s5135_s16, 4  ;;  %s151_s3 = int_to_ptr.hbm [resolvable:$true] %s150_s3 }
  0x21   :  { %s124_s7 = sshll.u32 %s3885_s6, 4  ;;  %s3886_s1 = smov [#allocation13]   ;;  %s125_s7 = int_to_ptr.vmem [resolvable:$true] %s124_s7 }
  0x22   :  { %130 = dma.hbm_to_vmem [thread:$0]  %s123_s11, 128, %s125_s7, [#allocation11], %s3880_s27, %s3880_s27, %s3881_s4  }
  0x23   :  { %s152_s28 = sshll.u32 %s3886_s1, 4  ;;  %s176_s29 = sshll.u32 %s5137_s18, 4  ;;  %s153_s28 = int_to_ptr.vmem [resolvable:$true] %s152_s28  ;;  %s177_s29 = int_to_ptr.hbm [resolvable:$true] %s176_s29 }
  0x24   :  { %158 = dma.hbm_to_vmem [thread:$0]  %s151_s3, 256, %s153_s28, [#allocation14], %s3883_s5, %s3883_s5, %s3884_s0  }
  0x25   :  { %s202_s16 = sshll.u32 %s5139_s20, 4  ;;  %s3887_s6 = smov [#allocation16]   ;;  %s203_s16 = int_to_ptr.hbm [resolvable:$true] %s202_s16 }
  0x26   :  { %s178_s26 = sshll.u32 %s3887_s6, 4  ;;  %s3888_s11 = smov [#allocation19]   ;;  %s179_s26 = int_to_ptr.vmem [resolvable:$true] %s178_s26 }
  0x27   :  { %184 = dma.hbm_to_vmem [thread:$0]  %s177_s29, 256, %s179_s26, [#allocation17], %s3883_s5, %s3883_s5, %s3884_s0  }
  0x28   :  { %s204_s18 = sshll.u32 %s3888_s11, 4  ;;  %s228_s1 = sshll.u32 %s5141_s22, 4  ;;  %s205_s18 = int_to_ptr.vmem [resolvable:$true] %s204_s18  ;;  %s229_s1 = int_to_ptr.hbm [resolvable:$true] %s228_s1 }
  0x29   :  { %210 = dma.hbm_to_vmem [thread:$0]  %s203_s16, 128, %s205_s18, [#allocation20], %s3880_s27, %s3880_s27, %s3881_s4  }
  0x2a   :  { %s5162_s28 = sld [smem:[#allocation37_spill]]  ;;  %s3889_s9 = smov [#allocation22]  }
  0x2b   :  { %s230_s13 = sshll.u32 %s3889_s9, 4  ;;  %s3890_s29 = smov [#allocation2]   ;;  %s231_s13 = int_to_ptr.vmem [resolvable:$true] %s230_s13 }
  0x2c   :  { %236 = dma.hbm_to_vmem [thread:$0]  %s229_s1, 256, %s231_s13, [#allocation23], %s3883_s5, %s3883_s5, %s3884_s0  }
  0x2d   :  { %s48_s22 = sshll.u32 %s3890_s29, 4  ;;  %s83_s26 = sshll.u32 %s5129_s10, 4  ;;  %s49_s22 = int_to_ptr.vmem [resolvable:$true] %s48_s22  ;;  %s84_s26 = int_to_ptr.hbm [resolvable:$true] %s83_s26 }
  0x2e   :  { %s109_s18 = sshll.u32 %s5131_s12, 4  ;;  %s3891_s7 = smov [#allocation6]   ;;  %s110_s18 = int_to_ptr.hbm [resolvable:$true] %s109_s18 }
  0x2f   :  { %s85_s30 = sshll.u32 %s3891_s7, 4  ;;  %s3892_s1 = smov [#allocation9]   ;;  %s86_s30 = int_to_ptr.vmem [resolvable:$true] %s85_s30 }
  0x30   :  { %s46_s8 = sshll.u32 %s5162_s28, 4  ;;  %s111_s20 = sshll.u32 %s3892_s1, 4  ;;  %s47_s8 = int_to_ptr.hbm [resolvable:$true] %s46_s8  ;;  %s112_s20 = int_to_ptr.vmem [resolvable:$true] %s111_s20 }
  0x31   :  { %51 = dma.hbm_to_vmem [thread:$0]  %s47_s8, 64, %s49_s22, [#allocation3]  }
  0x32   :  { %91 = dma.hbm_to_vmem [thread:$0]  %s84_s26, 128, %s86_s30, [#allocation5], %s3880_s27, %s3880_s27, %s3881_s4  }
  0x33   :  { %s137_s10 = sshll.u32 %s5134_s15, 4  ;;  %s163_s9 = sshll.u32 %s5136_s17, 4  ;;  %s138_s10 = int_to_ptr.hbm [resolvable:$true] %s137_s10  ;;  %s164_s9 = int_to_ptr.hbm [resolvable:$true] %s163_s9 }
  0x34   :  { %117 = dma.hbm_to_vmem [thread:$0]  %s110_s18, 256, %s112_s20, [#allocation8], %s3883_s5, %s3883_s5, %s3884_s0  }
  0x35   :  { %s3893_s13 = smov [#allocation12]   ;;  %s3894_s22 = smov [#allocation15]  }
  0x36   :  { %s139_s29 = sshll.u32 %s3893_s13, 4  ;;  %s165_s15 = sshll.u32 %s3894_s22, 4  ;;  %s140_s29 = int_to_ptr.vmem [resolvable:$true] %s139_s29  ;;  %s166_s15 = int_to_ptr.vmem [resolvable:$true] %s165_s15 }
  0x37   :  { %145 = dma.hbm_to_vmem [thread:$0]  %s138_s10, 256, %s140_s29, [#allocation11], %s3883_s5, %s3883_s5, %s3884_s0  }
  0x38   :  { %s189_s26 = sshll.u32 %s5138_s19, 4  ;;  %s215_s11 = sshll.u32 %s5140_s21, 4  ;;  %s190_s26 = int_to_ptr.hbm [resolvable:$true] %s189_s26  ;;  %s216_s11 = int_to_ptr.hbm [resolvable:$true] %s215_s11 }
  0x39   :  { %171 = dma.hbm_to_vmem [thread:$0]  %s164_s9, 128, %s166_s15, [#allocation14], %s3880_s27, %s3880_s27, %s3881_s4  }
  0x3a   :  { %s3895_s18 = smov [#allocation18]   ;;  %s3896_s30 = smov [#allocation21]  }
  0x3b   :  { %s191_s7 = sshll.u32 %s3895_s18, 4  ;;  %s217_s19 = sshll.u32 %s3896_s30, 4  ;;  %s192_s7 = int_to_ptr.vmem [resolvable:$true] %s191_s7  ;;  %s218_s19 = int_to_ptr.vmem [resolvable:$true] %s217_s19 }
  0x3c   :  { %197 = dma.hbm_to_vmem [thread:$0]  %s190_s26, 256, %s192_s7, [#allocation17], %s3883_s5, %s3883_s5, %s3884_s0  }
  0x3d   :  { %s241_s3 = sshll.u32 %s5142_s23, 4  ;;  %s254_s10 = sshll.u32 %s5143_s24, 4  ;;  %s242_s3 = int_to_ptr.hbm [resolvable:$true] %s241_s3  ;;  %s255_s10 = int_to_ptr.hbm [resolvable:$true] %s254_s10 }
  0x3e   :  { %223 = dma.hbm_to_vmem [thread:$0]  %s216_s11, 256, %s218_s19, [#allocation20], %s3880_s27, %s3880_s27, %s3881_s4  }
  0x3f   :  { %s3897_s12 = smov [#allocation24]   ;;  %s3898_s9 = smov [#allocation25]  }
  0x40   :  { %s243_s8 = sshll.u32 %s3897_s12, 4  ;;  %s256_s23 = sshll.u32 %s3898_s9, 4  ;;  %s244_s8 = int_to_ptr.vmem [resolvable:$true] %s243_s8  ;;  %s257_s23 = int_to_ptr.vmem [resolvable:$true] %s256_s23 }
  0x41   :  { %249 = dma.hbm_to_vmem [thread:$0]  %s242_s3, 256, %s244_s8, [#allocation23], %s3883_s5, %s3883_s5, %s3884_s0  }
  0x42   :  { %262 = dma.hbm_to_vmem [thread:$0]  %s255_s10, 128, %s257_s23, [#allocation26], %s3880_s27, %s3880_s27, %s3881_s4  }
  0x43   :  { %3861 = dma.done.wait [#allocation3], 64  }
  0x44   :  { %3862 = vsyncadd [#allocation3], 4294967232 }
  0x45   :  { %3863 = dma.done.wait [#allocation5], 256  }
  0x46   :  { %3864 = vsyncadd [#allocation5], 4294967040 }
  0x47   :  { %3865 = dma.done.wait [#allocation8], 512  }
  0x48   :  { %3866 = vsyncadd [#allocation8], 4294966784 }
  0x49   :  { %3867 = dma.done.wait [#allocation11], 384  }
  0x4a   :  { %3868 = vsyncadd [#allocation11], 4294966912 }
  0x4b   :  { %3869 = dma.done.wait [#allocation14], 384  }
  0x4c   :  { %3870 = vsyncadd [#allocation14], 4294966912 }
  0x4d   :  { %3871 = dma.done.wait [#allocation17], 512  }
  0x4e   :  { %3872 = vsyncadd [#allocation17], 4294966784 }
  0x4f   :  { %3873 = dma.done.wait [#allocation20], 384  }
  0x50   :  { %3874 = vsyncadd [#allocation20], 4294966912 }
  0x51   :  { %3875 = dma.done.wait [#allocation23], 512  }
  0x52   :  { %3876 = vsyncadd [#allocation23], 4294966784 }
  0x53   :  { %3877 = dma.done.wait [#allocation26], 128  }
  0x54   :  { %3878 = vsyncadd [#allocation26], 4294967168  ;;  %s5163_s5 = sld [smem:[#allocation36_spill]]  ;;  %s3899_s13 = smov 17   ;;  %vm356_vm0 = vcmask 138240   ;;  %vm430_vm1 = vcmask 130048  }
  0x55   :  { %s3900_s29 = smov 16   ;;  %s3901_s22 = smov 15   ;;  %vm907_vm2 = vcmask 1041408   ;;  %vm494_vm3 = vcmask 121856   ;;  %vm920_vm4 = vcmask 1043456   ;;  %vm546_vm5 = vcmask 7168  }
  0x56   :  { %s3902_s15 = smov 1   ;;  %s3903_s2 = smov 127   ;;  %vm593_vm6 = vcmask 1039360   ;;  %vm645_vm7 = vcmask 924672   ;;  %vm697_vm8 = vcmask 916480   ;;  %vm749_vm9 = vcmask 908288  }
  0x57   :  { %s3904_s6 = smov 113   ;;  %s3905_s26 = smov 112   ;;  %vm929_vm10 = vcmask 1045504   ;;  %vm977_vm11 = vcmask 293888   ;;  %vm1572_vm12 = vcmask 588800   ;;  %vm2550_vm13 = vcmask 228352  }
  0x58   :  { %s5164_s11 = sld [smem:[#allocation39_spill]]  ;;  %s3906_s18 = smov 111   ;;  %vm2533_vm14 = vcmask 236544   ;;  %vm2516_vm15 = vcmask 252928  }
  0x59   :  { %s5165_s10 = sld [smem:[#allocation38_spill]]  ;;  %s3919_s17 = smov 31  }
  0x5a   :  { %v4157_v0 = vld [vmem:[%s5163_s5] sm:$0xff]  ;;  %s5166_s9 = sld [smem:[#allocation41_spill]]  ;;  %s3909_s5 = smov 120  }
  0x5b   :  { %334 = vst [vmem:[#allocation1] ss:$4 sm:$0xff] %v4157_v0  ;;  %s5167_s27 = sld [smem:[#allocation42_spill]]  ;;  %s3920_s16 = smov 3  }
  0x5c   :  { %s5168_s7 = sld [smem:[#allocation43_spill]]  ;;  %s3923_s30 = smov 27  }
  0x5d   :  { %s3924_s19 = smov 5   ;;  %s3927_s28 = smov 126  }
  0x5e   :  { %v330_v35 = vld [vmem:[%s5164_s11 + $0x8] sm:$0xff]  ;;  %v329_v58 = vld [vmem:[%s5164_s11] sm:$0xff] }
  0x5f   :  { %v373_v36 = vunpack.c.h.b16 %v330_v35  ;;  %v372_v37 = vunpack.c.l.b16 %v330_v35 }
  0x61   :  { %v377_v39 = vpack.c.b16 %v373_v36, %v373_v36  ;;  %v376_v40 = vpack.c.b16 %v372_v37, %v372_v37 }
  0x62   :  { %v4160_v1 = vld.sshfl [vmem:[#allocation1 + $0x18] sm:$0xff pattern:$0x73625140] }
  0x63   :  { %339 = vst [vmem:[#allocation1] ss:$4 sm:$0xff] %v4157_v0  ;;  %v4218_v41 = vpack.i.b16 %v377_v39, %v377_v39  ;;  %v4220_v42 = vpack.i.b16 %v376_v40, %v376_v40  ;;  %v454_v63 = vshrl.u32 %v377_v39, 16 }
  0x65   :  { %v393_v44 = vperm.slane %v4218_v41, 0  ;;  %v389_v45 = vperm.slane %v4220_v42, 0 }
  0x67   :  { %v401_v50 = vunpack.c.l.bf16 %v393_v44  ;;  %v400_v53 = vunpack.c.l.bf16 %v389_v45 }
  0x6a   :  { %v344_v2 = vld.sshfl [vmem:[#allocation1 + $0x10] sm:$0xff pattern:$0x73625140]  ;;  %v346_v3 = vld.sshfl [vmem:[#allocation1 + $0x18] sm:$0xff pattern:$0x73625140] }
  0x6b   :  { %352 = vrot.lane.b32.xlu1 %v344_v2, %s3899_s13  ;;  %v4164_v4 = vld.sshfl [vmem:[#allocation1] sm:$0xff pattern:$0x73625140]  ;;  %v342_v5 = vld.sshfl [vmem:[#allocation1 + $0x8] sm:$0xff pattern:$0x73625140]  ;;  %354 = vrot.lane.b32.xlu2 %v346_v3, %s3899_s13  ;;  %v370_v3 = vunpack.c.l.b16 %v329_v58 }
  0x6c   :  { %350 = vrot.lane.b32.xlu0 %v342_v5, %s3899_s13  ;;  %408 = vst [vmem:[#allocation1] ss:$4 sm:$0xff] %v4157_v0  ;;  %v450_v2 = vshrl.u32 %v376_v40, 16  ;;  %v371_v5 = vunpack.c.h.b16 %v329_v58 }
  0x73   :  { %v409_v6 = vld.sshfl [vmem:[#allocation1 + $0x18] sm:$0xff pattern:$0x73625140] }
  0x74   :  { %413 = vst [vmem:[#allocation1] ss:$4 sm:$0xff] %v4157_v0  ;;  %411 = vrot.lane.b32.xlu2 %v409_v6, %s3900_s29 }
  0x7b   :  { %v418_v7 = vld.sshfl [vmem:[#allocation1 + $0x10] sm:$0xff pattern:$0x73625140]  ;;  %v420_v8 = vld.sshfl [vmem:[#allocation1 + $0x18] sm:$0xff pattern:$0x73625140] }
  0x7c   :  { %426 = vrot.lane.b32.xlu1 %v418_v7, %s3900_s29  ;;  %v416_v9 = vld.sshfl [vmem:[#allocation1 + $0x8] sm:$0xff pattern:$0x73625140]  ;;  %v414_v10 = vld.sshfl [vmem:[#allocation1] sm:$0xff pattern:$0x73625140]  ;;  %428 = vrot.lane.b32.xlu2 %v420_v8, %s3900_s29  ;;  %v4242_v7 = vpack.i.b16 %v454_v63, %v454_v63  ;;  %v4244_v8 = vpack.i.b16 %v450_v2, %v450_v2 }
  0x7d   :  { %424 = vrot.lane.b32.xlu0 %v416_v9, %s3900_s29  ;;  %472 = vst [vmem:[#allocation1] ss:$4 sm:$0xff] %v4157_v0  ;;  %v4248_v9 = vpack.c.b16 %v371_v5, %v371_v5 }
  0x84   :  { %v4175_v11 = vld.sshfl [vmem:[#allocation1 + $0x18] sm:$0xff pattern:$0x73625140] }
  0x85   :  { %422 = vrot.lane.b32.xlu0 %v414_v10, %s3900_s29  ;;  %477 = vst [vmem:[#allocation1] ss:$4 sm:$0xff] %v4157_v0  ;;  %v457_v10 = vperm.slane %v4242_v7, 0 }
  0x8c   :  { %v4179_v12 = vld.sshfl [vmem:[#allocation1] sm:$0xff pattern:$0x73625140]  ;;  %v482_v13 = vld.sshfl [vmem:[#allocation1 + $0x10] sm:$0xff pattern:$0x73625140] }
  0x8d   :  { %v484_v14 = vld.sshfl [vmem:[#allocation1 + $0x18] sm:$0xff pattern:$0x73625140]  ;;  %v480_v15 = vld.sshfl [vmem:[#allocation1 + $0x8] sm:$0xff pattern:$0x73625140]  ;;  %490 = vrot.lane.b32.xlu2 %v482_v13, %s3901_s22 }
  0x8e   :  { %492 = vrot.lane.b32.xlu0 %v484_v14, %s3901_s22  ;;  %488 = vrot.lane.b32.xlu1 %v480_v15, %s3901_s22  ;;  %524 = vst [vmem:[#allocation1] ss:$4 sm:$0xff] %v4157_v0  ;;  %v446_v14 = vshrl.u32 %v4248_v9, 16 }
  0x95   :  { %v4185_v16 = vld.sshfl [vmem:[#allocation1 + $0x18] sm:$0xff pattern:$0x73625140] }
  0x96   :  { %529 = vst [vmem:[#allocation1] ss:$4 sm:$0xff] %v4157_v0 }
  0x9d   :  { %v4188_v17 = vld.sshfl [vmem:[#allocation1] sm:$0xff pattern:$0x73625140]  ;;  %v536_v18 = vld.sshfl [vmem:[#allocation1 + $0x18] sm:$0xff pattern:$0x73625140] }
  0x9e   :  { %v534_v19 = vld.sshfl [vmem:[#allocation1 + $0x10] sm:$0xff pattern:$0x73625140]  ;;  %v532_v20 = vld.sshfl [vmem:[#allocation1 + $0x8] sm:$0xff pattern:$0x73625140]  ;;  %544 = vrot.lane.b32.xlu2 %v536_v18, %s3902_s15 }
  0x9f   :  { %542 = vrot.lane.b32.xlu1 %v534_v19, %s3902_s15  ;;  %540 = vrot.lane.b32.xlu0 %v532_v20, %s3902_s15  ;;  %576 = vst [vmem:[#allocation1] ss:$4 sm:$0xff] %v4157_v0 }
  0xa6   :  { %v577_v21 = vld.sshfl [vmem:[#allocation1] sm:$0xff pattern:$0x73625140]  ;;  %v581_v22 = vld.sshfl [vmem:[#allocation1 + $0x10] sm:$0xff pattern:$0x73625140] }
  0xa7   :  { %589 = vrot.lane.b32.xlu0 %v581_v22, %s3903_s2  ;;  %v579_v23 = vld.sshfl [vmem:[#allocation1 + $0x8] sm:$0xff pattern:$0x73625140]  ;;  %v583_v24 = vld.sshfl [vmem:[#allocation1 + $0x18] sm:$0xff pattern:$0x73625140]  ;;  %v4262_v22 = vpack.i.b16 %v446_v14, %v446_v14 }
  0xa8   :  { %587 = vrot.lane.b32.xlu1 %v579_v23, %s3903_s2  ;;  %600 = vst [vmem:[#allocation1] ss:$4 sm:$0xff] %v4157_v0 }
  0xaf   :  { %591 = vrot.lane.b32.xlu0 %v583_v24, %s3903_s2  ;;  %v601_v25 = vld.sshfl [vmem:[#allocation1] sm:$0xff pattern:$0x73625140] }
  0xb0   :  { %603 = vrot.lane.b32.xlu1 %v601_v25, %s3903_s2  ;;  %628 = vst [vmem:[#allocation1] ss:$4 sm:$0xff] %v4157_v0 }
  0xb7   :  { %585 = vrot.lane.b32.xlu0 %v577_v21, %s3903_s2  ;;  %v635_v26 = vld.sshfl [vmem:[#allocation1 + $0x18] sm:$0xff pattern:$0x73625140]  ;;  %v633_v27 = vld.sshfl [vmem:[#allocation1 + $0x10] sm:$0xff pattern:$0x73625140] }
  0xb8   :  { %643 = vrot.lane.b32.xlu1 %v635_v26, %s3904_s6  ;;  %v631_v28 = vld.sshfl [vmem:[#allocation1 + $0x8] sm:$0xff pattern:$0x73625140]  ;;  %v629_v29 = vld.sshfl [vmem:[#allocation1] sm:$0xff pattern:$0x73625140] }
  0xb9   :  { %652 = vst [vmem:[#allocation1] ss:$4 sm:$0xff] %v4157_v0 }
  0xbf   :  { %641 = vrot.lane.b32.xlu0 %v633_v27, %s3904_s6 }
  0xc0   :  { %639 = vrot.lane.b32.xlu1 %v631_v28, %s3904_s6  ;;  %v653_v30 = vld.sshfl [vmem:[#allocation1] sm:$0xff pattern:$0x73625140]  ;;  %v449_v28 = vperm.slane %v4262_v22, 0 }
  0xc1   :  { %655 = vrot.lane.b32.xlu2 %v653_v30, %s3904_s6  ;;  %680 = vst [vmem:[#allocation1] ss:$4 sm:$0xff] %v4157_v0 }
  0xc2   :  { %v463_v35 = vunpack.c.l.bf16 %v449_v28 }
  0xc5   :  { %v355_v43 = vpop.permute.xlu2 %354 }
  0xc7   :  { %637 = vrot.lane.b32.xlu0 %v629_v29, %s3904_s6 }
  0xc8   :  { %v687_v31 = vld.sshfl [vmem:[#allocation1 + $0x18] sm:$0xff pattern:$0x73625140]  ;;  %v683_v32 = vld.sshfl [vmem:[#allocation1 + $0x8] sm:$0xff pattern:$0x73625140] }
  0xc9   :  { %695 = vrot.lane.b32.xlu1 %v687_v31, %s3905_s26  ;;  %691 = vrot.lane.b32.xlu2 %v683_v32, %s3905_s26  ;;  %v685_v33 = vld.sshfl [vmem:[#allocation1 + $0x10] sm:$0xff pattern:$0x73625140]  ;;  %v681_v34 = vld.sshfl [vmem:[#allocation1] sm:$0xff pattern:$0x73625140] }
  0xca   :  { %704 = vst [vmem:[#allocation1] ss:$4 sm:$0xff] %v4157_v0 }
  0xce   :  { %v412_v62 = vpop.permute.xlu2 %411 }
  0xcf   :  { %693 = vrot.lane.b32.xlu0 %v685_v33, %s3905_s26 }
  0xd1   :  { %689 = vrot.lane.b32.xlu1 %v681_v34, %s3905_s26  ;;  %v705_v38 = vld.sshfl [vmem:[#allocation1] sm:$0xff pattern:$0x73625140] }
  0xd2   :  { %707 = vrot.lane.b32.xlu2 %v705_v38, %s3905_s26  ;;  %732 = vst [vmem:[#allocation1] ss:$4 sm:$0xff] %v4157_v0 }
  0xd6   :  { %v429_v15 = vpop.permute.xlu2 %428 }
  0xd9   :  { %v739_v46 = vld.sshfl [vmem:[#allocation1 + $0x18] sm:$0xff pattern:$0x73625140]  ;;  %v737_v47 = vld.sshfl [vmem:[#allocation1 + $0x10] sm:$0xff pattern:$0x73625140] }
  0xda   :  { %747 = vrot.lane.b32.xlu2 %v739_v46, %s3906_s18  ;;  %745 = vrot.lane.b32.xlu1 %v737_v47, %s3906_s18  ;;  %v735_v48 = vld.sshfl [vmem:[#allocation1 + $0x8] sm:$0xff pattern:$0x73625140]  ;;  %v733_v49 = vld.sshfl [vmem:[#allocation1] sm:$0xff pattern:$0x73625140] }
  0xdb   :  { %743 = vrot.lane.b32.xlu0 %v735_v48, %s3906_s18  ;;  %756 = vst [vmem:[#allocation1] ss:$4 sm:$0xff] %v4157_v0 }
  0xdd   :  { %v353_v51 = vpop.permute.xlu1 %352 }
  0xde   :  { %v359_v52 = vsel %vm356_vm0, %v353_v51, %v355_v43  ;;  %v4229_v54 = vpop.permute.xlu0 %350 }
  0xdf   :  { %v397_v55 = vunpack.c.l.bf16 %v359_v52  ;;  %v358_v56 = vsel %vm356_vm0, %v4229_v54, %v353_v51  ;;  %v508_v51 = vperm.slane %v4220_v42, 1 }
  0xe0   :  { %v396_v57 = vunpack.c.l.bf16 %v358_v56 }
  0xe1   :  { %v405_v59 = vmul.f32 %v401_v50, %v397_v55  ;;  %v509_v50 = vperm.slane %v4218_v41, 1 }
  0xe2   :  { %337 = vrot.lane.b32.xlu1 %v4160_v1, %s3899_s13  ;;  %741 = vrot.lane.b32.xlu2 %v733_v49, %s3906_s18  ;;  %v757_v60 = vld.sshfl [vmem:[#allocation1] sm:$0xff pattern:$0x73625140]  ;;  %v404_v61 = vmul.f32 %v400_v53, %v396_v57  ;;  %v4246_v1 = vpack.c.b16 %v370_v3, %v370_v3 }
  0xe3   :  { %527 = vrot.lane.b32.xlu0 %v4185_v16, %s3902_s15  ;;  %854 = vst [vmem:[#allocation1] ss:$4 sm:$0xff] %v4157_v0  ;;  %v453_v0 = vperm.slane %v4244_v8, 0  ;;  %v465_v16 = vunpack.c.l.bf16 %v457_v10  ;;  %v517_v58 = vunpack.c.l.bf16 %v509_v50 }
  0xe4   :  { %v407_v6 = vpack.c.bf16 %v405_v59, %v404_v61  ;;  %v442_v13 = vshrl.u32 %v4246_v1, 16 }
  0xe6   :  { %v4260_v21 = vpack.i.b16 %v442_v13, %v442_v13  ;;  %v810_v29 = vunpack.c.l.b16 %v407_v6  ;;  %v811_v30 = vunpack.c.h.b16 %v407_v6 }
  0xe7   :  { %v491_v56 = vpop.permute.xlu2 %490 }
  0xe8   :  { %v445_v27 = vperm.slane %v4260_v21, 0  ;;  %v814_v37 = vpack.c.b16 %v810_v29, %v810_v29  ;;  %v815_v38 = vpack.c.b16 %v811_v30, %v811_v30 }
  0xea   :  { %538 = vrot.lane.b32.xlu1 %v4188_v17, %s3902_s15  ;;  %759 = vrot.lane.b32.xlu2 %v757_v60, %s3906_s18  ;;  %v464_v17 = vunpack.c.l.bf16 %v453_v0  ;;  %v462_v34 = vunpack.c.l.bf16 %v445_v27 }
  0xeb   :  { %486 = vrot.lane.b32.xlu0 %v4179_v12, %s3901_s22 }
  0xee   :  { %v427_v18 = vpop.permute.xlu1 %426 }
  0xef   :  { %v433_v19 = vsel %vm430_vm1, %v427_v18, %v429_v15  ;;  %v425_v20 = vpop.permute.xlu0 %424 }
  0xf0   :  { %v461_v23 = vunpack.c.l.bf16 %v433_v19  ;;  %v432_v12 = vsel %vm430_vm1, %v425_v20, %v427_v18 }
  0xf1   :  { %v460_v24 = vunpack.c.l.bf16 %v432_v12 }
  0xf2   :  { %348 = vrot.lane.b32.xlu2 %v4164_v4, %s3899_s13  ;;  %v469_v25 = vmul.f32 %v465_v16, %v461_v23 }
  0xf3   :  { %v468_v26 = vmul.f32 %v464_v17, %v460_v24 }
  0xf5   :  { %v471_v31 = vpack.c.bf16 %v469_v25, %v468_v26  ;;  %v561_v25 = vperm.slane %v4242_v7, 1  ;;  %v560_v26 = vperm.slane %v4244_v8, 1 }
  0xf7   :  { %v820_v32 = vunpack.c.l.b16 %v471_v31  ;;  %v821_v33 = vunpack.c.h.b16 %v471_v31  ;;  %v423_v36 = vpop.permute.xlu0 %422  ;;  %v569_v30 = vunpack.c.l.bf16 %v561_v25 }
  0xf8   :  { %v431_v39 = vsel %vm430_vm1, %v423_v36, %v425_v20  ;;  %v440_v4 = vsel %vm430_vm1, %v412_v62, %v423_v36  ;;  %v545_v16 = vpop.permute.xlu2 %544 }
  0xf9   :  { %v824_v40 = vpack.c.b16 %v820_v32, %v820_v32  ;;  %v825_v43 = vpack.c.b16 %v821_v33, %v821_v33  ;;  %v458_v44 = vunpack.c.l.bf16 %v440_v4  ;;  %v459_v45 = vunpack.c.l.bf16 %v431_v39 }
  0xfa   :  { %475 = vrot.lane.b32.xlu2 %v4175_v11, %s3901_s22  ;;  %v516_v11 = vunpack.c.l.bf16 %v508_v51  ;;  %v568_v32 = vunpack.c.l.bf16 %v560_v26  ;;  %v613_v39 = vperm.slane %v4242_v7, 2 }
  0xfb   :  { %v828_v46 = vrot.slane %v824_v40, 6  ;;  %v829_v47 = vrot.slane %v825_v43, 6  ;;  %v466_v48 = vmul.f32 %v462_v34, %v458_v44  ;;  %v467_v49 = vmul.f32 %v463_v35, %v459_v45  ;;  %v332_v40 = vld [vmem:[%s5164_s11 + $0x18] sm:$0x11] }
  0xfc   :  { %v610_v45 = vperm.slane %v4260_v21, 2 }
  0xfd   :  { %v4275_v52 = vpack.c.bf16 %v467_v49, %v466_v48  ;;  %v916_v53 = vsel %vm907_vm2, %v814_v37, %v828_v46  ;;  %v919_v55 = vsel %vm907_vm2, %v815_v38, %v829_v47  ;;  %v612_v38 = vperm.slane %v4244_v8, 2 }
  0xfe   :  { %v4315_v47 = vpack.i.b16 %v4248_v9, %v4248_v9  ;;  %v4319_v48 = vpack.i.b16 %v4246_v1, %v4246_v1  ;;  %v771_v49 = vunpack.c.h.b16 %v332_v40  ;;  %v665_v9 = vperm.slane %v4218_v41, 3 }
  0xff   :  { %v620_v50 = vunpack.c.l.bf16 %v612_v38 }
 0x100   :  { %v493_v57 = vpop.permute.xlu0 %492  ;;  %v4279_v59 = vpop.permute.xlu1 %488 }
 0x101   :  { %v497_v60 = vsel %vm494_vm3, %v491_v56, %v493_v57  ;;  %v496_v61 = vsel %vm494_vm3, %v4279_v59, %v491_v56  ;;  %v611_v56 = vperm.slane %v4262_v22, 2 }
 0x102   :  { %v513_v62 = vunpack.c.l.bf16 %v497_v60  ;;  %v512_v63 = vunpack.c.l.bf16 %v496_v61  ;;  %v618_v60 = vunpack.c.l.bf16 %v610_v45  ;;  %v664_v61 = vperm.slane %v4220_v42, 3 }
 0x103   :  { %v818_v42 = vunpack.c.l.b16 %v4275_v52  ;;  %v714_v45 = vperm.slane %v4260_v21, 3 }
 0x104   :  { %v521_v2 = vmul.f32 %v517_v58, %v513_v62  ;;  %v520_v3 = vmul.f32 %v516_v11, %v512_v63  ;;  %v663_v62 = vperm.slane %v4315_v47, 3  ;;  %v662_v63 = vperm.slane %v4319_v48, 3 }
 0x106   :  { %v523_v5 = vpack.c.bf16 %v521_v2, %v520_v3  ;;  %v775_v2 = vpack.c.b16 %v771_v49, %v771_v49 }
 0x108   :  { %v834_v6 = vunpack.c.l.b16 %v523_v5  ;;  %v835_v10 = vunpack.c.h.b16 %v523_v5  ;;  %v789_v25 = vpack.i.b16 %v775_v2, %v775_v2 }
 0x10a   :  { %v838_v0 = vpack.c.b16 %v834_v6, %v834_v6  ;;  %v839_v13 = vpack.c.b16 %v835_v10, %v835_v10 }
 0x10c   :  { %v4285_v14 = vsel %vm920_vm4, %v916_v53, %v838_v0  ;;  %v4288_v15 = vsel %vm920_vm4, %v919_v55, %v839_v13  ;;  %v621_v53 = vunpack.c.l.bf16 %v613_v39  ;;  %v331_v13 = vld [vmem:[%s5164_s11 + $0x10] sm:$0x11]  ;;  %v715_v39 = vperm.slane %v4262_v22, 3  ;;  %s3921_s11 = smov 99  }
 0x10d   :  { %v768_v26 = vunpack.c.l.b16 %v331_v13 }
 0x10f   :  { %v772_v49 = vpack.c.b16 %v768_v26, %v768_v26 }
 0x111   :  { %v543_v18 = vpop.permute.xlu1 %542  ;;  %v4290_v19 = vpop.permute.xlu0 %540 }
 0x112   :  { %v549_v28 = vsel %vm546_vm5, %v543_v18, %v545_v16  ;;  %v548_v29 = vsel %vm546_vm5, %v4290_v19, %v543_v18  ;;  %v619_v16 = vunpack.c.l.bf16 %v611_v56 }
 0x113   :  { %v565_v31 = vunpack.c.l.bf16 %v549_v28  ;;  %v564_v33 = vunpack.c.l.bf16 %v548_v29 }
 0x115   :  { %v573_v36 = vmul.f32 %v569_v30, %v565_v31  ;;  %v572_v37 = vmul.f32 %v568_v32, %v564_v33  ;;  %v670_v31 = vunpack.c.l.bf16 %v662_v63 }
 0x117   :  { %v575_v46 = vpack.c.bf16 %v573_v36, %v572_v37  ;;  %v717_v36 = vperm.slane %v4242_v7, 3  ;;  %v769_v37 = vunpack.c.h.b16 %v331_v13 }
 0x119   :  { %v590_v17 = vpop.permute.xlu0 %589  ;;  %v844_v3 = vunpack.c.l.b16 %v575_v46  ;;  %v845_v41 = vunpack.c.h.b16 %v575_v46  ;;  %v4351_v46 = vperm.slane %v789_v25, 0 }
 0x11a   :  { %v588_v20 = vpop.permute.xlu1 %587 }
 0x11b   :  { %v4292_v23 = vpop.permute.xlu2 %655  ;;  %v595_v11 = vsel %vm593_vm6, %v588_v20, %v590_v17  ;;  %v4340_v28 = vpack.c.b16 %v844_v3, %v844_v3  ;;  %v4342_v32 = vpack.c.b16 %v845_v41, %v845_v41  ;;  %v722_v3 = vunpack.c.l.bf16 %v714_v45 }
 0x11c   :  { %v615_v18 = vunpack.c.l.bf16 %v595_v11  ;;  %v773_v11 = vpack.c.b16 %v769_v37, %v769_v37 }
 0x11e   :  { %v623_v33 = vmul.f32 %v619_v16, %v615_v18 }
 0x121   :  { %v592_v12 = vpop.permute.xlu0 %591 }
 0x122   :  { %v604_v24 = vpop.permute.xlu1 %603  ;;  %v596_v43 = vsel %vm593_vm6, %v590_v17, %v592_v12  ;;  %v673_v17 = vunpack.c.l.bf16 %v665_v9  ;;  %v723_v9 = vunpack.c.l.bf16 %v715_v39 }
 0x123   :  { %v4296_v27 = vpop.permute.xlu2 %691  ;;  %v608_v44 = vsel %vm593_vm6, %v592_v12, %v604_v24  ;;  %v616_v51 = vunpack.c.l.bf16 %v596_v43  ;;  %v770_v12 = vunpack.c.l.b16 %v332_v40  ;;  %v4338_v24 = vunpack.c.l.bf16 %v663_v62 }
 0x124   :  { %v617_v55 = vunpack.c.l.bf16 %v608_v44  ;;  %v716_v40 = vperm.slane %v4244_v8, 3  ;;  %v725_v8 = vunpack.c.l.bf16 %v717_v36 }
 0x125   :  { %v624_v5 = vmul.f32 %v620_v50, %v616_v51  ;;  %v774_v43 = vpack.c.b16 %v770_v12, %v770_v12  ;;  %v852_v50 = vrot.slane %v4340_v28, 2  ;;  %v781_v12 = vpack.i.b16 %v773_v11, %v773_v11 }
 0x126   :  { %v625_v6 = vmul.f32 %v621_v53, %v617_v55 }
 0x127   :  { %v785_v62 = vpack.i.b16 %v774_v43, %v774_v43  ;;  %v783_v11 = vperm.slane %v781_v12, 0  ;;  %v856_v12 = vld.sshfl [vmem:[#allocation1 + $0x8] sm:$0xff pattern:$0x73625140] }
 0x128   :  { %v627_v29 = vpack.c.bf16 %v625_v6, %v624_v5  ;;  %v777_v5 = vpack.i.b16 %v772_v49, %v772_v49 }
 0x129   :  { %v586_v34 = vpop.permute.xlu0 %585 }
 0x12a   :  { %v4301_v35 = vpop.permute.xlu1 %643  ;;  %v594_v57 = vsel %vm593_vm6, %v586_v34, %v588_v20  ;;  %v672_v20 = vunpack.c.l.bf16 %v664_v61  ;;  %v863_v51 = vunpack.c.l.b16 %v627_v29  ;;  %v864_v7 = vunpack.c.h.b16 %v627_v29 }
 0x12b   :  { %v614_v10 = vunpack.c.l.bf16 %v594_v57  ;;  %v660_v55 = vsel %vm645_vm7, %v4301_v35, %v4292_v23  ;;  %v724_v61 = vunpack.c.l.bf16 %v716_v40  ;;  %v779_v37 = vperm.slane %v777_v5, 0 }
 0x12c   :  { %v4305_v4 = vpop.permute.xlu2 %707  ;;  %v669_v63 = vunpack.c.l.bf16 %v660_v55  ;;  %v867_v6 = vpack.c.b16 %v863_v51, %v863_v51  ;;  %v385_v51 = vperm.slane %v4315_v47, 0  ;;  %v381_v5 = vperm.slane %v4319_v48, 0 }
 0x12d   :  { %v622_v30 = vmul.f32 %v618_v60, %v614_v10  ;;  %v853_v60 = vrot.slane %v4342_v32, 2  ;;  %v868_v10 = vpack.c.b16 %v864_v7, %v864_v7 }
 0x12e   :  { %v871_v7 = vrot.slane %v867_v6, 6 }
 0x12f   :  { %v626_v53 = vpack.c.bf16 %v623_v33, %v622_v30  ;;  %v4369_v30 = vperm.slane %v785_v62, 0  ;;  %v677_v33 = vmul.f32 %v673_v17, %v669_v63  ;;  %v872_v17 = vrot.slane %v868_v10, 6  ;;  %v857_v62 = vld.sshfl [vmem:[#allocation1 + $0x10] sm:$0xff pattern:$0x73625140] }
 0x130   :  { %v855_v10 = vld.sshfl [vmem:[#allocation1] sm:$0xff pattern:$0x73625140] }
 0x131   :  { %v4323_v58 = vpop.permute.xlu0 %641  ;;  %v861_v23 = vunpack.c.l.b16 %v626_v53  ;;  %v862_v13 = vunpack.c.h.b16 %v626_v53 }
 0x132   :  { %v4328_v1 = vpop.permute.xlu1 %639  ;;  %v648_v38 = vsel %vm645_vm7, %v4323_v58, %v4301_v35  ;;  %v799_v35 = vunpack.c.l.bf16 %v4351_v46  ;;  %v559_v46 = vperm.slane %v4262_v22, 1 }
 0x133   :  { %v668_v57 = vunpack.c.l.bf16 %v648_v38  ;;  %v647_v16 = vsel %vm645_vm7, %v4328_v1, %v4323_v58  ;;  %v865_v38 = vpack.c.b16 %v861_v23, %v861_v23  ;;  %v866_v40 = vpack.c.b16 %v862_v13, %v862_v13  ;;  %v858_v23 = vld.sshfl [vmem:[#allocation1 + $0x18] sm:$0xff pattern:$0x73625140] }
 0x134   :  { %v4332_v0 = vpop.permute.xlu2 %747  ;;  %v667_v39 = vunpack.c.l.bf16 %v647_v16  ;;  %v796_v16 = vunpack.c.l.bf16 %v779_v37 }
 0x135   :  { %v676_v41 = vmul.f32 %v672_v20, %v668_v57  ;;  %v798_v57 = vunpack.c.l.bf16 %v4369_v30  ;;  %v869_v63 = vrot.slane %v865_v38, 6  ;;  %v870_v13 = vrot.slane %v866_v40, 6 }
 0x137   :  { %v679_v43 = vpack.c.bf16 %v677_v33, %v676_v41  ;;  %v4395_v37 = vsel %vm907_vm2, %v856_v12, %v870_v13  ;;  %v3907_v13 = vmov 0  }
 0x138   :  { %3474 = vset.pattern.permute.xlu1 %v3907_v13  ;;  %3475 = vset.pattern.permute.xlu2 %v3907_v13 }
 0x139   :  { %v638_v34 = vpop.permute.xlu0 %637  ;;  %v878_v41 = vunpack.c.h.b16 %v679_v43  ;;  %3476 = vset.pattern.permute.xlu0 %v3907_v13 }
 0x13a   :  { %v646_v2 = vsel %vm645_vm7, %v638_v34, %v4328_v1 }
 0x13b   :  { %v696_v44 = vpop.permute.xlu1 %695  ;;  %v666_v25 = vunpack.c.l.bf16 %v646_v2  ;;  %v675_v2 = vmul.f32 %v4338_v24, %v667_v39  ;;  %v4384_v24 = vsel %vm907_vm2, %v857_v62, %v871_v7  ;;  %v4399_v39 = vpack.c.b16 %v878_v41, %v878_v41 }
 0x13c   :  { %v4357_v56 = vpop.permute.xlu2 %741  ;;  %v712_v34 = vsel %vm697_vm8, %v696_v44, %v4305_v4  ;;  %v558_v62 = vperm.slane %v4260_v21, 1 }
 0x13d   :  { %v674_v53 = vmul.f32 %v670_v31, %v666_v25  ;;  %v721_v55 = vunpack.c.l.bf16 %v712_v34  ;;  %v877_v31 = vunpack.c.l.b16 %v679_v43  ;;  %v398_v34 = vunpack.c.l.bf16 %v381_v5 }
 0x13f   :  { %v4397_v38 = vpack.c.b16 %v877_v31, %v877_v31 }
 0x141   :  { %v694_v18 = vpop.permute.xlu0 %693 }
 0x142   :  { %v699_v26 = vsel %vm697_vm8, %v4296_v27, %v694_v18  ;;  %v700_v29 = vsel %vm697_vm8, %v694_v18, %v696_v44  ;;  %v4381_v18 = vunpack.c.l.bf16 %v385_v51 }
 0x143   :  { %v719_v36 = vunpack.c.l.bf16 %v699_v26  ;;  %v690_v20 = vpop.permute.xlu1 %689  ;;  %v720_v58 = vunpack.c.l.bf16 %v700_v29  ;;  %v797_v26 = vunpack.c.l.bf16 %v783_v11 }
 0x144   :  { %v698_v1 = vsel %vm697_vm8, %v690_v20, %v4296_v27  ;;  %v760_v49 = vpop.permute.xlu2 %759 }
 0x145   :  { %v718_v45 = vunpack.c.l.bf16 %v698_v1  ;;  %v727_v4 = vmul.f32 %v723_v9, %v719_v36  ;;  %v728_v27 = vmul.f32 %v724_v61, %v720_v58  ;;  %v764_v6 = vsel %vm749_vm9, %v4332_v0, %v760_v49 }
 0x146   :  { %v678_v9 = vpack.c.bf16 %v675_v2, %v674_v53  ;;  %v4387_v61 = vsel %vm907_vm2, %v858_v23, %v872_v17  ;;  %v795_v30 = vunpack.c.l.bf16 %v764_v6  ;;  %v4390_v36 = vsel %vm907_vm2, %v855_v10, %v869_v63 }
 0x147   :  { %v726_v44 = vmul.f32 %v722_v3, %v718_v45  ;;  %v729_v3 = vmul.f32 %v725_v8, %v721_v55 }
 0x148   :  { %v875_v43 = vunpack.c.l.b16 %v678_v9  ;;  %v803_v17 = vmul.f32 %v799_v35, %v795_v30  ;;  %v876_v63 = vunpack.c.h.b16 %v678_v9 }
 0x149   :  { %v730_v25 = vpack.c.bf16 %v727_v4, %v726_v44  ;;  %v731_v29 = vpack.c.bf16 %v729_v3, %v728_v27 }
 0x14a   :  { %v879_v5 = vpack.c.b16 %v875_v43, %v875_v43  ;;  %v880_v12 = vpack.c.b16 %v876_v63, %v876_v63 }
 0x14b   :  { %v885_v7 = vunpack.c.l.b16 %v730_v25  ;;  %v887_v55 = vunpack.c.l.b16 %v731_v29  ;;  %v888_v4 = vunpack.c.h.b16 %v731_v29 }
 0x14c   :  { %v746_v33 = vpop.permute.xlu1 %745  ;;  %v349_v51 = vpop.permute.xlu2 %348 }
 0x14d   :  { %v752_v8 = vsel %vm749_vm9, %v746_v33, %v4332_v0  ;;  %v744_v20 = vpop.permute.xlu0 %743  ;;  %v886_v0 = vunpack.c.h.b16 %v730_v25  ;;  %v357_v2 = vsel %vm356_vm0, %v349_v51, %v4229_v54  ;;  %v889_v35 = vpack.c.b16 %v885_v7, %v885_v7 }
 0x14e   :  { %v794_v58 = vunpack.c.l.bf16 %v752_v8  ;;  %v750_v1 = vsel %vm749_vm9, %v4357_v56, %v744_v20  ;;  %v751_v40 = vsel %vm749_vm9, %v744_v20, %v746_v33  ;;  %v971_v56 = vld [vmem:[%s5165_s10] sm:$0xff]  ;;  %v891_v31 = vpack.c.b16 %v887_v55, %v887_v55  ;;  %s3928_s10 = smov 2  }
 0x14f   :  { %v792_v45 = vunpack.c.l.bf16 %v750_v1  ;;  %v793_v49 = vunpack.c.l.bf16 %v751_v40  ;;  %v892_v41 = vpack.c.b16 %v888_v4, %v888_v4  ;;  %974 = vperm.xlu1 %3474, %v971_v56   ;;  %v395_v22 = vunpack.c.l.bf16 %v357_v2 }
 0x150   :  { %v802_v53 = vmul.f32 %v798_v57, %v794_v58  ;;  %v890_v57 = vpack.c.b16 %v886_v0, %v886_v0  ;;  %v893_v8 = vrot.slane %v889_v35, 2  ;;  %v895_v40 = vrot.slane %v891_v31, 2 }
 0x151   :  { %v800_v44 = vmul.f32 %v796_v16, %v792_v45  ;;  %v801_v11 = vmul.f32 %v797_v26, %v793_v49  ;;  %v896_v43 = vrot.slane %v892_v41, 2  ;;  %v507_v7 = vperm.slane %v4315_v47, 1 }
 0x152   :  { %v805_v27 = vpack.c.bf16 %v803_v17, %v802_v53  ;;  %v894_v20 = vrot.slane %v890_v57, 2  ;;  %v566_v0 = vunpack.c.l.bf16 %v558_v62  ;;  %v506_v17 = vperm.slane %v4319_v48, 1 }
 0x153   :  { %v804_v23 = vpack.c.bf16 %v801_v11, %v800_v44  ;;  %v955_v53 = vsel %vm920_vm4, %v4384_v24, %v4397_v38  ;;  %v403_v55 = vmul.f32 %v4381_v18, %v395_v22  ;;  %v567_v4 = vunpack.c.l.bf16 %v559_v46 }
 0x154   :  { %v338_v21 = vpop.permute.xlu1 %337  ;;  %v901_v6 = vunpack.c.l.b16 %v805_v27  ;;  %v902_v10 = vunpack.c.h.b16 %v805_v27  ;;  %v951_v44 = vsel %vm920_vm4, %v4390_v36, %v879_v5  ;;  %v953_v47 = vsel %vm920_vm4, %v4395_v37, %v880_v12  ;;  %v476_v62 = vpop.permute.xlu2 %475 }
 0x155   :  { %v366_v54 = vsel %vm356_vm0, %v338_v21, %v349_v51  ;;  %v528_v9 = vpop.permute.xlu0 %527  ;;  %v899_v3 = vunpack.c.l.b16 %v804_v23  ;;  %v900_v16 = vunpack.c.h.b16 %v804_v23  ;;  %v959_v48 = vsel %vm929_vm10, %v951_v44, %v893_v8 }
 0x156   :  { %v394_v25 = vunpack.c.l.bf16 %v366_v54  ;;  %v905_v26 = vpack.c.b16 %v901_v6, %v901_v6  ;;  %v906_v29 = vpack.c.b16 %v902_v10, %v902_v10  ;;  %v962_v63 = vsel %vm929_vm10, %v953_v47, %v894_v20 }
 0x157   :  { %v903_v30 = vpack.c.b16 %v899_v3, %v899_v3  ;;  %v904_v33 = vpack.c.b16 %v900_v16, %v900_v16  ;;  %v965_v24 = vsel %vm929_vm10, %v955_v53, %v895_v40  ;;  %v515_v27 = vunpack.c.l.bf16 %v507_v7 }
 0x158   :  { %v988_v58 = vsel %vm907_vm2, %v905_v26, 0  ;;  %v991_v1 = vsel %vm907_vm2, %v906_v29, 0  ;;  %v402_v45 = vmul.f32 %v398_v34, %v394_v25  ;;  %v957_v34 = vsel %vm920_vm4, %v4387_v61, %v4399_v39 }
 0x159   :  { %v982_v49 = vsel %vm907_vm2, %v903_v30, 0  ;;  %v985_v51 = vsel %vm907_vm2, %v904_v33, 0  ;;  %1024 = vmatpush.bf16.msra.mxu2 %v988_v58  ;;  %1037 = vmatpush.bf16.msra.mxu3 %v991_v1  ;;  %v968_v38 = vsel %vm929_vm10, %v957_v34, %v896_v43  ;;  %v819_v61 = vunpack.c.h.b16 %v4275_v52 }
 0x15a   :  { %998 = vmatpush.bf16.msra.mxu0 %v982_v49  ;;  %1011 = vmatpush.bf16.msra.mxu1 %v985_v51  ;;  %v406_v18 = vpack.c.bf16 %v403_v55, %v402_v45  ;;  %v514_v5 = vunpack.c.l.bf16 %v506_v17  ;;  %v940_v35 = vsel %vm929_vm10, %v4288_v15, %v853_v60 }
 0x15b   :  { %v823_v32 = vpack.c.b16 %v819_v61, %v819_v61 }
 0x15c   :  { %v539_v11 = vpop.permute.xlu1 %538  ;;  %v808_v10 = vunpack.c.l.b16 %v406_v18  ;;  %v809_v31 = vunpack.c.h.b16 %v406_v18 }
 0x15d   :  { %v547_v39 = vsel %vm546_vm5, %v539_v11, %v4290_v19  ;;  %v556_v36 = vsel %vm546_vm5, %v528_v9, %v539_v11  ;;  %v487_v56 = vpop.permute.xlu0 %486  ;;  %1025 = vmatpush.bf16.msra.mxu2 %v965_v24  ;;  %1038 = vmatpush.bf16.msra.mxu3 %v968_v38  ;;  %v937_v19 = vsel %vm929_vm10, %v4285_v14, %v852_v50  ;;  %v827_v29 = vrot.slane %v823_v32, 6 }
 0x15e   :  { %v562_v37 = vunpack.c.l.bf16 %v556_v36  ;;  %v563_v2 = vunpack.c.l.bf16 %v547_v39  ;;  %999 = vmatpush.bf16.msra.mxu0 %v959_v48  ;;  %1012 = vmatpush.bf16.msra.mxu1 %v962_v63  ;;  %v495_v23 = vsel %vm494_vm3, %v487_v56, %v4279_v59  ;;  %v504_v46 = vsel %vm494_vm3, %v476_v62, %v487_v56  ;;  %v970_v59 = vld [vmem:[#allocation2] sm:$0xf] }
 0x15f   :  { %v511_v21 = vunpack.c.l.bf16 %v495_v23  ;;  %v510_v6 = vunpack.c.l.bf16 %v504_v46  ;;  %v822_v14 = vpack.c.b16 %v818_v42, %v818_v42  ;;  %v812_v9 = vpack.c.b16 %v808_v10, %v808_v10  ;;  %v1555_v23 = vld [vmem:[%s5166_s9] sm:$0xff]  ;;  %v1053_v10 = vld [vmem:[%s5167_s27 + $0x10] sm:$0x11] }
 0x160   :  { %v570_v57 = vmul.f32 %v566_v0, %v562_v37  ;;  %v571_v13 = vmul.f32 %v567_v4, %v563_v2  ;;  %v813_v3 = vpack.c.b16 %v809_v31, %v809_v31 }
 0x161   :  { %1026 = vmatpush.bf16.msra.mxu2 %v937_v19  ;;  %1039 = vmatpush.bf16.msra.mxu3 %v940_v35  ;;  %v519_v28 = vmul.f32 %v515_v27, %v511_v21  ;;  %v518_v54 = vmul.f32 %v514_v5, %v510_v6  ;;  %v826_v26 = vrot.slane %v822_v14, 6  ;;  %v1051_v6 = vld [vmem:[%s5167_s27] sm:$0xff] }
 0x162   :  { %v574_v41 = vpack.c.bf16 %v571_v13, %v570_v57  ;;  %v913_v20 = vsel %vm907_vm2, %v813_v3, %v827_v29  ;;  %v1085_v31 = vunpack.c.l.b16 %v1051_v6  ;;  %v1052_v3 = vld [vmem:[%s5167_s27 + $0x8] sm:$0xff] }
 0x163   :  { %v522_v50 = vpack.c.bf16 %v519_v28, %v518_v54  ;;  %v910_v8 = vsel %vm907_vm2, %v812_v9, %v826_v26  ;;  %v1372_v28 = vunpack.c.h.b16 %v1053_v10  ;;  %v1086_v26 = vunpack.c.h.b16 %v1051_v6 }
 0x164   :  { %3145 = vmatmul.msk.bf16.vlgmr.msra.gmra.mxu2 %vm977_vm11, %v970_v59  ;;  %3146 = vmatmul.msk.bf16.vlgmr.msra.gmra.mxu3 %vm977_vm11, %v970_v59  ;;  %v842_v15 = vunpack.c.l.b16 %v574_v41  ;;  %v843_v60 = vunpack.c.h.b16 %v574_v41  ;;  %v1054_v41 = vld [vmem:[%s5167_s27 + $0x18] sm:$0x11]  ;;  %vm2483_vm2 = vcmask 23552  }
 0x165   :  { %v832_v16 = vunpack.c.l.b16 %v522_v50  ;;  %v833_v22 = vunpack.c.h.b16 %v522_v50  ;;  %v1373_v32 = vunpack.c.l.b16 %v1054_v41  ;;  %v1374_v50 = vunpack.c.h.b16 %v1054_v41 }
 0x166   :  { %v846_v12 = vpack.c.b16 %v842_v15, %v842_v15  ;;  %v847_v25 = vpack.c.b16 %v843_v60, %v843_v60  ;;  %v1089_v15 = vpack.c.b16 %v1085_v31, %v1085_v31 }
 0x167   :  { %v836_v30 = vpack.c.b16 %v832_v16, %v832_v16  ;;  %v837_v33 = vpack.c.b16 %v833_v22, %v833_v22  ;;  %v1376_v16 = vpack.c.b16 %v1372_v28, %v1372_v28  ;;  %v1377_v22 = vpack.c.b16 %v1373_v32, %v1373_v32 }
 0x168   :  { %v850_v52 = vrot.slane %v846_v12, 2  ;;  %v851_v42 = vrot.slane %v847_v25, 2  ;;  %v1087_v12 = vunpack.c.l.b16 %v1052_v3  ;;  %v1378_v25 = vpack.c.b16 %v1374_v50, %v1374_v50 }
 0x169   :  { %v922_v58 = vsel %vm920_vm4, %v910_v8, %v836_v30  ;;  %v924_v1 = vsel %vm920_vm4, %v913_v20, %v837_v33  ;;  %v4566_v29 = vpack.i.b16 %v1089_v15, %v1089_v15  ;;  %v1384_v33 = vpack.i.b16 %v1376_v16, %v1376_v16 }
 0x16a   :  { %v931_v40 = vsel %vm929_vm10, %v922_v58, %v850_v52  ;;  %v934_v43 = vsel %vm929_vm10, %v924_v1, %v851_v42  ;;  %v1141_v52 = vshrl.u32 %v1089_v15, 16  ;;  %v1088_v42 = vunpack.c.h.b16 %v1052_v3 }
 0x16b   :  { %1000 = vmatpush.bf16.msra.mxu0 %v931_v40  ;;  %1013 = vmatpush.bf16.msra.mxu1 %v934_v43  ;;  %v1091_v58 = vpack.c.b16 %v1087_v12, %v1087_v12  ;;  %v1388_v1 = vpack.i.b16 %v1377_v22, %v1377_v22  ;;  %v1392_v40 = vpack.i.b16 %v1378_v25, %v1378_v25  ;;  %vm3128_vm10 = vcmask 324864  }
 0x16c   :  { %v1090_v43 = vpack.c.b16 %v1086_v26, %v1086_v26 }
 0x16e   :  { %3143 = vmatmul.msk.bf16.vlgmr.msra.gmra.mxu0 %vm977_vm11, %v970_v59  ;;  %3144 = vmatmul.msk.bf16.vlgmr.msra.gmra.mxu1 %vm977_vm11, %v970_v59  ;;  %v1371_v59 = vunpack.c.l.b16 %v1053_v10 }
 0x170   :  { %v1375_v60 = vpack.c.b16 %v1371_v59, %v1371_v59 }
 0x172   :  { %v1380_v30 = vpack.i.b16 %v1375_v60, %v1375_v60 }
 0x1c1   :  { %v975_v51 = vpop.permute.xlu1 %974 }
 0x1e7   :  { %v1028_v45 = vpop.f32.mrf.mxu2  ;;  %v1041_v49 = vpop.f32.mrf.mxu3 }
 0x1e8   :  { %v1029_v61 = vadd.f32 %v1028_v45, %v975_v51  ;;  %v1042_v18 = vadd.f32 %v1041_v49, %v975_v51  ;;  %v1297_v45 = vperm.slane %v4566_v29, 3  ;;  %v1382_v49 = vperm.slane %v1380_v30, 0 }
 0x1ea   :  { %v1047_v39 = vmax.f32 %v1029_v61, 0.0  ;;  %v1048_v36 = vmax.f32 %v1042_v18, 0.0 }
 0x1eb   :  { %v1002_v7 = vpop.f32.mrf.mxu0  ;;  %v1015_v0 = vpop.f32.mrf.mxu1 }
 0x1ec   :  { %v1003_v17 = vadd.f32 %v1002_v7, %v975_v51  ;;  %v1016_v53 = vadd.f32 %v1015_v0, %v975_v51  ;;  %v1050_v56 = vpack.c.bf16 %v1048_v36, %v1047_v39  ;;  %v4575_v7 = vpack.i.b16 %v1141_v52, %v1141_v52 }
 0x1ed   :  { %v1386_v0 = vperm.slane %v1384_v33, 0  ;;  %v1145_v36 = vshrl.u32 %v1090_v43, 16 }
 0x1ee   :  { %v1045_v34 = vmax.f32 %v1003_v17, 0.0  ;;  %v1046_v55 = vmax.f32 %v1016_v53, 0.0  ;;  %v1056_v37 = vunpack.c.h.b16 %v1050_v56  ;;  %v1063_v2 = vunpack.c.l.b16 %v1050_v56 }
 0x1ef   :  { %v1030_v4 = vpop.f32.mrf.mxu2  ;;  %v1043_v44 = vpop.f32.mrf.mxu3  ;;  %v1149_v17 = vshrl.u32 %v1091_v58, 16  ;;  %v1092_v53 = vpack.c.b16 %v1088_v42, %v1088_v42  ;;  %v4600_v22 = vpack.i.b16 %v1145_v36, %v1145_v36 }
 0x1f0   :  { %v1049_v47 = vpack.c.bf16 %v1046_v55, %v1045_v34  ;;  %v4485_v27 = vpack.c.b16 %v1056_v37, %v1056_v37  ;;  %v4487_v5 = vpack.c.b16 %v1063_v2, %v1063_v2  ;;  %v1390_v34 = vperm.slane %v1388_v1, 0 }
 0x1f1   :  { %v1394_v55 = vperm.slane %v1392_v40, 0  ;;  %v4577_v4 = vpack.i.b16 %v1090_v43, %v1090_v43  ;;  %v1305_v44 = vunpack.c.l.bf16 %v1297_v45  ;;  %v4584_v61 = vpack.i.b16 %v1149_v17, %v1149_v17 }
 0x1f2   :  { %v1061_v11 = vunpack.c.l.b16 %v1049_v47  ;;  %v1062_v62 = vunpack.c.h.b16 %v1049_v47  ;;  %v1399_v47 = vunpack.c.l.bf16 %v1382_v49  ;;  %v4589_v39 = vpack.i.b16 %v1092_v53, %v1092_v53 }
 0x1f3   :  { %v1004_v48 = vpop.f32.mrf.mxu0  ;;  %v1017_v63 = vpop.f32.mrf.mxu1  ;;  %v1153_v56 = vshrl.u32 %v1092_v53, 16  ;;  %v1402_v6 = vunpack.c.l.bf16 %v1394_v55  ;;  %v1298_v31 = vperm.slane %v4577_v4, 3  ;;  %v1227_v42 = vperm.slane %v4584_v61, 1 }
 0x1f4   :  { %v4463_v24 = vpack.c.b16 %v1061_v11, %v1061_v11  ;;  %v4465_v38 = vpack.c.b16 %v1062_v62, %v1062_v62  ;;  %v1333_v62 = vperm.slane %v4575_v7, 3  ;;  %v4582_v48 = vpack.i.b16 %v1091_v58, %v1091_v58 }
 0x1f5   :  { %v1400_v63 = vunpack.c.l.bf16 %v1386_v0  ;;  %v1300_v12 = vperm.slane %v4589_v39, 3  ;;  %v4602_v25 = vpack.i.b16 %v1153_v56, %v1153_v56  ;;  %v1306_v58 = vunpack.c.l.bf16 %v1298_v31 }
 0x1f6   :  { %1281 = vrot.lane.b32.xlu0 %v4465_v38, %s3904_s6  ;;  %1175 = vrot.lane.b32.xlu1 %v4465_v38, %s3901_s22  ;;  %v1299_v50 = vperm.slane %v4582_v48, 3  ;;  %v4604_v33 = vunpack.c.l.bf16 %v1333_v62  ;;  %v1334_v0 = vperm.slane %v4600_v22, 3  ;;  %v1335_v17 = vperm.slane %v4584_v61, 3 }
 0x1f7   :  { %1351 = vrot.lane.b32.xlu2 %v4463_v24, %s3906_s18  ;;  %v1308_v49 = vunpack.c.l.bf16 %v1300_v12  ;;  %v1336_v53 = vperm.slane %v4602_v25, 3 }
 0x1f8   :  { %v1307_v40 = vunpack.c.l.bf16 %v1299_v50 }
 0x1fe   :  { %1069 = vrot.lane.b32.xlu0 %v4465_v38, %s3899_s13  ;;  %1211 = vrot.lane.b32.xlu1 %v4465_v38, %s3902_s15 }
 0x1ff   :  { %1279 = vrot.lane.b32.xlu2 %v4463_v24, %s3904_s6 }
 0x206   :  { %1127 = vrot.lane.b32.xlu0 %v4465_v38, %s3900_s29  ;;  %1317 = vrot.lane.b32.xlu1 %v4465_v38, %s3905_s26 }
 0x207   :  { %1315 = vrot.lane.b32.xlu2 %v4463_v24, %s3905_s26 }
 0x20e   :  { %1355 = vrot.lane.b32.xlu0 %v4487_v5, %s3906_s18  ;;  %1357 = vrot.lane.b32.xlu1 %v4485_v27, %s3906_s18 }
 0x20f   :  { %1243 = vrot.lane.b32.xlu2 %v4463_v24, %s3903_s2 }
 0x216   :  { %1283 = vrot.lane.b32.xlu0 %v4487_v5, %s3904_s6  ;;  %1285 = vrot.lane.b32.xlu1 %v4485_v27, %s3904_s6  ;;  %s3918_s6 = smov 97  }
 0x217   :  { %1353 = vrot.lane.b32.xlu2 %v4465_v38, %s3906_s18  ;;  %s3922_s18 = smov 100  }
 0x21e   :  { %1319 = vrot.lane.b32.xlu0 %v4487_v5, %s3905_s26  ;;  %1321 = vrot.lane.b32.xlu1 %v4485_v27, %s3905_s26  ;;  %s5169_s26 = sld [smem:[#allocation44_spill]] }
 0x21f   :  { %1177 = vrot.lane.b32.xlu2 %v4487_v5, %s3901_s22 }
 0x226   :  { %1247 = vrot.lane.b32.xlu0 %v4487_v5, %s3903_s2  ;;  %1249 = vrot.lane.b32.xlu1 %v4485_v27, %s3903_s2 }
 0x227   :  { %1213 = vrot.lane.b32.xlu2 %v4487_v5, %s3902_s15 }
 0x22e   :  { %1171 = vrot.lane.b32.xlu0 %v4485_v27, %s3901_s22  ;;  %1071 = vrot.lane.b32.xlu1 %v4487_v5, %s3899_s13 }
 0x22f   :  { %1058 = vrot.lane.b32.xlu2 %v4485_v27, %s3899_s13 }
 0x236   :  { %1207 = vrot.lane.b32.xlu0 %v4485_v27, %s3902_s15  ;;  %1129 = vrot.lane.b32.xlu1 %v4487_v5, %s3900_s29 }
 0x237   :  { %1123 = vrot.lane.b32.xlu2 %v4485_v27, %s3900_s29 }
 0x23e   :  { %1209 = vrot.lane.b32.xlu1 %v4463_v24, %s3902_s15  ;;  %1173 = vrot.lane.b32.xlu0 %v4463_v24, %s3901_s22  ;;  %s3912_s22 = smov 9  }
 0x23f   :  { %1245 = vrot.lane.b32.xlu2 %v4465_v38, %s3903_s2 }
 0x246   :  { %1559 = vperm.xlu1 %3474, %v1555_v23   ;;  %1125 = vrot.lane.b32.xlu0 %v4463_v24, %s3900_s29  ;;  %v1401_v23 = vunpack.c.l.bf16 %v1390_v34  ;;  %s3910_s29 = smov 7  }
 0x247   :  { %1067 = vrot.lane.b32.xlu2 %v4463_v24, %s3899_s13  ;;  %s3911_s13 = smov 119  }
 0x251   :  { %v4538_v46 = vpop.permute.xlu2 %1351 }
 0x259   :  { %v4540_v19 = vpop.permute.xlu2 %1279 }
 0x261   :  { %v4542_v35 = vpop.permute.xlu2 %1315 }
 0x268   :  { %v4544_v57 = vpop.permute.xlu0 %1281  ;;  %v4546_v13 = vpop.permute.xlu1 %1175 }
 0x269   :  { %v4548_v21 = vpop.permute.xlu2 %1243  ;;  %v1287_v18 = vsel %vm645_vm7, %v4540_v19, %v4544_v57 }
 0x26a   :  { %v1301_v15 = vunpack.c.l.bf16 %v1287_v18 }
 0x26c   :  { %v1309_v1 = vmul.f32 %v1305_v44, %v1301_v15 }
 0x270   :  { %v4559_v54 = vpop.permute.xlu0 %1069  ;;  %v4561_v14 = vpop.permute.xlu1 %1211 }
 0x271   :  { %v1354_v9 = vpop.permute.xlu2 %1353 }
 0x272   :  { %v1359_v11 = vsel %vm749_vm9, %v4538_v46, %v1354_v9 }
 0x273   :  { %v1395_v37 = vunpack.c.l.bf16 %v1359_v11 }
 0x278   :  { %v4568_v8 = vpop.permute.xlu0 %1127  ;;  %v4570_v20 = vpop.permute.xlu1 %1317 }
 0x279   :  { %v4573_v51 = vpop.permute.xlu2 %1177  ;;  %v1323_v31 = vsel %vm697_vm8, %v4542_v35, %v4570_v20 }
 0x280   :  { %v1356_v2 = vpop.permute.xlu0 %1355  ;;  %v1358_v10 = vpop.permute.xlu1 %1357 }
 0x281   :  { %v1360_v59 = vsel %vm749_vm9, %v1354_v9, %v1356_v2  ;;  %v1361_v41 = vsel %vm749_vm9, %v1356_v2, %v1358_v10  ;;  %v1367_v28 = vsel %vm749_vm9, %v1358_v10, %v4538_v46  ;;  %v4596_v32 = vpop.permute.xlu2 %1213  ;;  %v1403_v9 = vmul.f32 %v1399_v47, %v1395_v37 }
 0x282   :  { %v1396_v60 = vunpack.c.l.bf16 %v1360_v59  ;;  %v1397_v3 = vunpack.c.l.bf16 %v1361_v41  ;;  %v1398_v16 = vunpack.c.l.bf16 %v1367_v28  ;;  %v1191_v46 = vperm.slane %v4582_v48, 1 }
 0x283   :  { %v1263_v37 = vperm.slane %v4584_v61, 2  ;;  %v1180_v28 = vsel %vm494_vm3, %v4546_v13, %v4573_v51  ;;  %vm2919_vm9 = vcmask 15360  }
 0x284   :  { %v1404_v26 = vmul.f32 %v1400_v63, %v1396_v60  ;;  %v1405_v30 = vmul.f32 %v1401_v23, %v1397_v3  ;;  %v1406_v52 = vmul.f32 %v1402_v6, %v1398_v16 }
 0x286   :  { %v1407_v43 = vpack.c.bf16 %v1404_v26, %v1403_v9  ;;  %v1408_v45 = vpack.c.bf16 %v1406_v52, %v1405_v30  ;;  %v1199_v9 = vunpack.c.l.bf16 %v1191_v46  ;;  %v4629_v26 = vunpack.c.l.bf16 %v1227_v42 }
 0x287   :  { %v1342_v30 = vunpack.c.l.bf16 %v1334_v0  ;;  %v1343_v52 = vunpack.c.l.bf16 %v1335_v17  ;;  %v1262_v46 = vperm.slane %v4600_v22, 2 }
 0x288   :  { %v1284_v34 = vpop.permute.xlu0 %1283  ;;  %v1286_v55 = vpop.permute.xlu1 %1285  ;;  %v1481_v47 = vunpack.c.l.b16 %v1407_v43  ;;  %v1482_v11 = vunpack.c.h.b16 %v1407_v43  ;;  %v1483_v62 = vunpack.c.l.b16 %v1408_v45  ;;  %v1484_v63 = vunpack.c.h.b16 %v1408_v45 }
 0x289   :  { %v1288_v18 = vsel %vm645_vm7, %v4544_v57, %v1284_v34  ;;  %v1289_v44 = vsel %vm645_vm7, %v1284_v34, %v1286_v55  ;;  %v1295_v36 = vsel %vm645_vm7, %v1286_v55, %v4540_v19  ;;  %v4616_v56 = vpop.permute.xlu2 %1058  ;;  %v1337_v43 = vunpack.c.l.bf16 %v1323_v31 }
 0x28a   :  { %v1302_v2 = vunpack.c.l.bf16 %v1288_v18  ;;  %v1303_v23 = vunpack.c.l.bf16 %v1289_v44  ;;  %v1304_v6 = vunpack.c.l.bf16 %v1295_v36  ;;  %v1485_v10 = vpack.c.b16 %v1481_v47, %v1481_v47 }
 0x28b   :  { %v1486_v59 = vpack.c.b16 %v1482_v11, %v1482_v11  ;;  %v1487_v41 = vpack.c.b16 %v1483_v62, %v1483_v62  ;;  %v1488_v57 = vpack.c.b16 %v1484_v63, %v1484_v63  ;;  %v1264_v45 = vperm.slane %v4602_v25, 2 }
 0x28c   :  { %v1310_v19 = vmul.f32 %v1306_v58, %v1302_v2  ;;  %v1311_v50 = vmul.f32 %v1307_v40, %v1303_v23  ;;  %v1577_v15 = vsel %vm920_vm4, %v1485_v10, 0  ;;  %v1312_v60 = vmul.f32 %v1308_v49, %v1304_v6 }
 0x28d   :  { %1591 = vmatpush.bf16.msrb.mxu0 %v1577_v15  ;;  %v1580_v3 = vsel %vm920_vm4, %v1486_v59, 0  ;;  %v1583_v16 = vsel %vm920_vm4, %v1487_v41, 0  ;;  %v1586_v12 = vsel %vm920_vm4, %v1488_v57, 0  ;;  %v1344_v40 = vunpack.c.l.bf16 %v1336_v53 }
 0x28e   :  { %1605 = vmatpush.bf16.msrb.mxu1 %v1580_v3  ;;  %1619 = vmatpush.bf16.msrb.mxu2 %v1583_v16  ;;  %v1313_v58 = vpack.c.bf16 %v1310_v19, %v1309_v1  ;;  %v1195_v49 = vunpack.c.l.bf16 %v1180_v28  ;;  %v1271_v47 = vunpack.c.l.bf16 %v1263_v37  ;;  %v1261_v11 = vperm.slane %v4575_v7, 2 }
 0x28f   :  { %1633 = vmatpush.bf16.msrb.mxu3 %v1586_v12  ;;  %v1314_v42 = vpack.c.bf16 %v1312_v60, %v1311_v50  ;;  %v1192_v44 = vperm.slane %v4589_v39, 1  ;;  %v1345_v36 = vmul.f32 %v4604_v33, %v1337_v43  ;;  %v1272_v37 = vunpack.c.l.bf16 %v1264_v45 }
 0x290   :  { %v1320_v34 = vpop.permute.xlu0 %1319  ;;  %v1322_v55 = vpop.permute.xlu1 %1321  ;;  %v1461_v2 = vunpack.c.l.b16 %v1313_v58  ;;  %v1462_v23 = vunpack.c.h.b16 %v1313_v58  ;;  %v1269_v59 = vunpack.c.l.bf16 %v1261_v11  ;;  %v1270_v50 = vunpack.c.l.bf16 %v1262_v46 }
 0x291   :  { %v1324_v62 = vsel %vm697_vm8, %v4570_v20, %v1320_v34  ;;  %v1325_v0 = vsel %vm697_vm8, %v1320_v34, %v1322_v55  ;;  %v1331_v1 = vsel %vm697_vm8, %v1322_v55, %v4542_v35  ;;  %v4639_v17 = vpop.permute.xlu2 %1123  ;;  %v1216_v20 = vsel %vm546_vm5, %v4561_v14, %v4596_v32 }
 0x292   :  { %v1338_v53 = vunpack.c.l.bf16 %v1324_v62  ;;  %v1339_v63 = vunpack.c.l.bf16 %v1325_v0  ;;  %v1340_v18 = vunpack.c.l.bf16 %v1331_v1  ;;  %v4646_v35 = vmul.f32 %v1199_v9, %v1195_v49 }
 0x293   :  { %v1463_v41 = vunpack.c.l.b16 %v1314_v42  ;;  %v1464_v57 = vunpack.c.h.b16 %v1314_v42  ;;  %v4648_v15 = vunpack.c.l.bf16 %v1192_v44  ;;  %v1231_v33 = vunpack.c.l.bf16 %v1216_v20 }
 0x294   :  { %v1346_v6 = vmul.f32 %v1342_v30, %v1338_v53  ;;  %v1347_v10 = vmul.f32 %v1343_v52, %v1339_v63  ;;  %v1348_v31 = vmul.f32 %v1344_v40, %v1340_v18  ;;  %v1465_v60 = vpack.c.b16 %v1461_v2, %v1461_v2 }
 0x295   :  { %v1466_v3 = vpack.c.b16 %v1462_v23, %v1462_v23  ;;  %v1104_v16 = vperm.slane %v4582_v48, 0  ;;  %v1467_v34 = vpack.c.b16 %v1463_v41, %v1463_v41  ;;  %v1468_v55 = vpack.c.b16 %v1464_v57, %v1464_v57 }
 0x296   :  { %v1349_v28 = vpack.c.bf16 %v1346_v6, %v1345_v36  ;;  %v1350_v19 = vpack.c.bf16 %v1348_v31, %v1347_v10  ;;  %v1108_v41 = vperm.slane %v4589_v39, 0  ;;  %v1100_v57 = vperm.slane %v4577_v4, 0 }
 0x297   :  { %vm2009_vm7 = vcmask 56320   ;;  %vm2983_vm8 = vcmask 48128  }
 0x298   :  { %v1248_v12 = vpop.permute.xlu0 %1247  ;;  %v1250_v43 = vpop.permute.xlu1 %1249  ;;  %v1471_v30 = vunpack.c.l.b16 %v1349_v28  ;;  %v1472_v52 = vunpack.c.h.b16 %v1349_v28  ;;  %v1473_v58 = vunpack.c.l.b16 %v1350_v19  ;;  %v1474_v9 = vunpack.c.h.b16 %v1350_v19 }
 0x299   :  { %v1253_v40 = vsel %vm593_vm6, %v1248_v12, %v1250_v43  ;;  %v1259_v45 = vsel %vm593_vm6, %v1250_v43, %v4548_v21  ;;  %v1246_v49 = vpop.permute.xlu2 %1245  ;;  %v1115_v19 = vunpack.c.l.bf16 %v1104_v16 }
 0x29a   :  { %v1267_v11 = vunpack.c.l.bf16 %v1253_v40  ;;  %v1268_v46 = vunpack.c.l.bf16 %v1259_v45  ;;  %v1251_v42 = vsel %vm593_vm6, %v4548_v21, %v1246_v49  ;;  %v1252_v48 = vsel %vm593_vm6, %v1246_v49, %v1248_v12 }
 0x29b   :  { %v1265_v62 = vunpack.c.l.bf16 %v1251_v42  ;;  %v1266_v0 = vunpack.c.l.bf16 %v1252_v48  ;;  %v1475_v1 = vpack.c.b16 %v1471_v30, %v1471_v30  ;;  %v1476_v53 = vpack.c.b16 %v1472_v52, %v1472_v52 }
 0x29c   :  { %v1275_v63 = vmul.f32 %v1271_v47, %v1267_v11  ;;  %v1276_v18 = vmul.f32 %v1272_v37, %v1268_v46  ;;  %v1477_v44 = vpack.c.b16 %v1473_v58, %v1473_v58  ;;  %v1478_v36 = vpack.c.b16 %v1474_v9, %v1474_v9 }
 0x29d   :  { %v1273_v2 = vmul.f32 %v1269_v59, %v1265_v62  ;;  %v1274_v23 = vmul.f32 %v1270_v50, %v1266_v0  ;;  %v1539_v20 = vsel %vm920_vm4, %v1465_v60, %v1475_v1  ;;  %v1543_v6 = vsel %vm920_vm4, %v1466_v3, %v1476_v53 }
 0x29e   :  { %v1278_v10 = vpack.c.bf16 %v1276_v18, %v1275_v63  ;;  %1592 = vmatpush.bf16.msrb.mxu0 %v1539_v20  ;;  %1606 = vmatpush.bf16.msrb.mxu1 %v1543_v6  ;;  %v1547_v21 = vsel %vm920_vm4, %v1467_v34, %v1477_v44  ;;  %v1551_v31 = vsel %vm920_vm4, %v1468_v55, %v1478_v36  ;;  %v1096_v59 = vperm.slane %v4566_v29, 0 }
 0x29f   :  { %v4663_v47 = vmul.f32 %v4629_v26, %v1231_v33  ;;  %v1277_v37 = vpack.c.bf16 %v1274_v23, %v1273_v2  ;;  %1620 = vmatpush.bf16.msrb.mxu2 %v1547_v21  ;;  %1634 = vmatpush.bf16.msrb.mxu3 %v1551_v31  ;;  %v1228_v3 = vperm.slane %v4602_v25, 1  ;;  %v1152_v12 = vperm.slane %v4584_v61, 0 }
 0x2a0   :  { %v4667_v28 = vpop.permute.xlu0 %1171  ;;  %v1072_v50 = vpop.permute.xlu1 %1071  ;;  %v1453_v60 = vunpack.c.l.b16 %v1278_v10  ;;  %v1116_v52 = vunpack.c.l.bf16 %v1108_v41  ;;  %v1454_v58 = vunpack.c.h.b16 %v1278_v10  ;;  %v1114_v40 = vunpack.c.l.bf16 %v1100_v57 }
 0x2a1   :  { %v1181_v39 = vsel %vm494_vm3, %v4573_v51, %v4667_v28  ;;  %v1074_v26 = vsel %vm356_vm0, %v4559_v54, %v1072_v50  ;;  %v1075_v33 = vsel %vm356_vm0, %v1072_v50, %v4616_v56  ;;  %v1451_v43 = vunpack.c.l.b16 %v1277_v37  ;;  %v1068_v45 = vpop.permute.xlu2 %1067 }
 0x2a2   :  { %v1196_v30 = vunpack.c.l.bf16 %v1181_v39  ;;  %v1111_v16 = vunpack.c.l.bf16 %v1074_v26  ;;  %v1112_v9 = vunpack.c.l.bf16 %v1075_v33  ;;  %v1452_v61 = vunpack.c.h.b16 %v1277_v37 }
 0x2a3   :  { %v1455_v49 = vpack.c.b16 %v1451_v43, %v1451_v43  ;;  %v1236_v55 = vunpack.c.l.bf16 %v1228_v3  ;;  %v1156_v51 = vperm.slane %v4602_v25, 0  ;;  %v1225_v11 = vperm.slane %v4575_v7, 1 }
 0x2a4   :  { %v1204_v34 = vmul.f32 %v4648_v15, %v1196_v30  ;;  %v1456_v42 = vpack.c.b16 %v1452_v61, %v1452_v61  ;;  %v1457_v48 = vpack.c.b16 %v1453_v60, %v1453_v60  ;;  %v1163_v62 = vunpack.c.l.bf16 %v1152_v12 }
 0x2a5   :  { %v1523_v46 = vsel %vm920_vm4, %v4463_v24, %v1455_v49  ;;  %v1119_v0 = vmul.f32 %v1115_v19, %v1111_v16  ;;  %v1073_v1 = vsel %vm356_vm0, %v1068_v45, %v4559_v54  ;;  %v1458_v53 = vpack.c.b16 %v1454_v58, %v1454_v58 }
 0x2a6   :  { %1593 = vmatpush.bf16.msrb.mxu0 %v1523_v46  ;;  %v1226_v63 = vperm.slane %v4600_v22, 1  ;;  %v1206_v15 = vpack.c.bf16 %v1204_v34, %v4646_v35  ;;  %v1120_v18 = vmul.f32 %v1116_v52, %v1112_v9  ;;  %v1527_v25 = vsel %vm920_vm4, %v4465_v38, %v1456_v42  ;;  %v1556_v38 = vld [vmem:[%s5166_s9 + $0x8] sm:$0xff] }
 0x2a7   :  { %v1531_v24 = vsel %vm920_vm4, %v4487_v5, %v1457_v48  ;;  %v1081_v44 = vsel %vm356_vm0, %v4616_v56, %v1068_v45  ;;  %1607 = vmatpush.bf16.msrb.mxu1 %v1527_v25  ;;  %v1535_v54 = vsel %vm920_vm4, %v4485_v27, %v1458_v53  ;;  %v1164_v2 = vunpack.c.l.bf16 %v1156_v51  ;;  %1564 = vperm.xlu2 %3475, %v1556_v38   ;;  %v3393_v38 = vld [vmem:[%s5168_s7 + $0xb8] sm:$0xff] }
 0x2a8   :  { %1621 = vmatpush.bf16.msrb.mxu2 %v1531_v24  ;;  %v1208_v36 = vpop.permute.xlu0 %1207  ;;  %v1130_v23 = vpop.permute.xlu1 %1129  ;;  %v1189_v35 = vperm.slane %v4566_v29, 1  ;;  %1635 = vmatpush.bf16.msrb.mxu3 %v1535_v54  ;;  %v1190_v27 = vperm.slane %v4577_v4, 1  ;;  %v1110_v6 = vunpack.c.l.bf16 %v1073_v1  ;;  %v1122_v31 = vpack.c.bf16 %v1120_v18, %v1119_v0 }
 0x2a9   :  { %v1217_v5 = vsel %vm546_vm5, %v4596_v32, %v1208_v36  ;;  %v1132_v56 = vsel %vm430_vm1, %v4568_v8, %v1130_v23  ;;  %v1133_v20 = vsel %vm430_vm1, %v1130_v23, %v4639_v17  ;;  %v1113_v41 = vunpack.c.l.bf16 %v1096_v59 }
 0x2aa   :  { %v1232_v10 = vunpack.c.l.bf16 %v1217_v5  ;;  %v1159_v29 = vunpack.c.l.bf16 %v1132_v56  ;;  %v1160_v21 = vunpack.c.l.bf16 %v1133_v20  ;;  %v1109_v37 = vunpack.c.l.bf16 %v1081_v44  ;;  %v3401_v5 = vld [vmem:[%s5168_s7 + $0xf8] sm:$0xff] }
 0x2ab   :  { %v1433_v57 = vunpack.c.l.b16 %v1206_v15  ;;  %v1233_v60 = vunpack.c.l.bf16 %v1225_v11  ;;  %v1234_v3 = vunpack.c.l.bf16 %v1226_v63  ;;  %v1197_v12 = vunpack.c.l.bf16 %v1189_v35 }
 0x2ac   :  { %v1240_v19 = vmul.f32 %v1236_v55, %v1232_v10  ;;  %v1167_v50 = vmul.f32 %v1163_v62, %v1159_v29  ;;  %v1168_v32 = vmul.f32 %v1164_v2, %v1160_v21  ;;  %v1198_v39 = vunpack.c.l.bf16 %v1190_v27 }
 0x2ad   :  { %v1144_v26 = vperm.slane %v4575_v7, 0  ;;  %v1118_v33 = vmul.f32 %v1114_v40, %v1110_v6  ;;  %v1148_v30 = vperm.slane %v4600_v22, 0  ;;  %v1117_v52 = vmul.f32 %v1113_v41, %v1109_v37  ;;  %v3369_v37 = vld [vmem:[#allocation4] sm:$0xff] }
 0x2ae   :  { %v1242_v4 = vpack.c.bf16 %v1240_v19, %v4663_v47  ;;  %v1170_v43 = vpack.c.bf16 %v1168_v32, %v1167_v50  ;;  %v1437_v16 = vpack.c.b16 %v1433_v57, %v1433_v57  ;;  %v1434_v59 = vunpack.c.h.b16 %v1206_v15 }
 0x2af   :  { %v1413_v58 = vunpack.c.l.b16 %v1122_v31  ;;  %v1414_v1 = vunpack.c.h.b16 %v1122_v31  ;;  %v1161_v54 = vunpack.c.l.bf16 %v1144_v26  ;;  %v1121_v2 = vpack.c.bf16 %v1118_v33, %v1117_v52  ;;  %v3391_v52 = vld [vmem:[%s5168_s7 + $0xa8] sm:$0xff] }
 0x2b0   :  { %v1210_v9 = vpop.permute.xlu1 %1209  ;;  %v1174_v45 = vpop.permute.xlu0 %1173  ;;  %v1443_v49 = vunpack.c.l.b16 %v1242_v4  ;;  %v1444_v61 = vunpack.c.h.b16 %v1242_v4  ;;  %v1423_v34 = vunpack.c.l.b16 %v1170_v43  ;;  %v1424_v55 = vunpack.c.h.b16 %v1170_v43 }
 0x2b1   :  { %v1215_v51 = vsel %vm546_vm5, %v1210_v9, %v4561_v14  ;;  %v1223_v7 = vsel %vm546_vm5, %v1208_v36, %v1210_v9  ;;  %v1179_v47 = vsel %vm494_vm3, %v1174_v45, %v4546_v13  ;;  %v1187_v22 = vsel %vm494_vm3, %v4667_v28, %v1174_v45 }
 0x2b2   :  { %v1229_v40 = vunpack.c.l.bf16 %v1223_v7  ;;  %v1230_v11 = vunpack.c.l.bf16 %v1215_v51  ;;  %v1193_v46 = vunpack.c.l.bf16 %v1187_v22  ;;  %v1194_v42 = vunpack.c.l.bf16 %v1179_v47  ;;  %v3390_v51 = vld [vmem:[%s5168_s7 + $0xa0] sm:$0xff] }
 0x2b3   :  { %v1447_v48 = vpack.c.b16 %v1443_v49, %v1443_v49  ;;  %v1438_v62 = vpack.c.b16 %v1434_v59, %v1434_v59  ;;  %v1448_v0 = vpack.c.b16 %v1444_v61, %v1444_v61  ;;  %v1427_v13 = vpack.c.b16 %v1423_v34, %v1423_v34  ;;  %v3377_v34 = vld [vmem:[%s5168_s7 + $0x38] sm:$0xff]  ;;  %v3398_v7 = vld [vmem:[%s5168_s7 + $0xe0] sm:$0xff] }
 0x2b4   :  { %v1237_v53 = vmul.f32 %v1233_v60, %v1229_v40  ;;  %v1238_v63 = vmul.f32 %v1234_v3, %v1230_v11  ;;  %v1201_v15 = vmul.f32 %v1197_v12, %v1193_v46  ;;  %v1202_v14 = vmul.f32 %v1198_v39, %v1194_v42  ;;  %v3376_v40 = vld [vmem:[%s5168_s7 + $0x30] sm:$0xff]  ;;  %v3375_v46 = vld [vmem:[%s5168_s7 + $0x28] sm:$0xff] }
 0x2b5   :  { %v1515_v18 = vsel %vm920_vm4, %v1437_v16, %v1447_v48  ;;  %v1519_v25 = vsel %vm920_vm4, %v1438_v62, %v1448_v0  ;;  %v1428_v24 = vpack.c.b16 %v1424_v55, %v1424_v55  ;;  %v1162_v36 = vunpack.c.l.bf16 %v1148_v30  ;;  %v3399_v16 = vld [vmem:[%s5168_s7 + $0xe8] sm:$0xff]  ;;  %v3385_v55 = vld [vmem:[%s5168_s7 + $0x78] sm:$0xff]  ;;  %v3384_v11 = vld [vmem:[%s5168_s7 + $0x70] sm:$0xff] }
 0x2b6   :  { %v1241_v44 = vpack.c.bf16 %v1238_v63, %v1237_v53  ;;  %v1205_v28 = vpack.c.bf16 %v1202_v14, %v1201_v15  ;;  %1622 = vmatpush.bf16.msrb.mxu2 %v1515_v18  ;;  %1636 = vmatpush.bf16.msrb.mxu3 %v1519_v25  ;;  %v1417_v23 = vpack.c.b16 %v1413_v58, %v1413_v58  ;;  %v1411_v43 = vunpack.c.l.b16 %v1121_v2  ;;  %v3383_v42 = vld [vmem:[%s5168_s7 + $0x68] sm:$0xff]  ;;  %v3389_v48 = vld [vmem:[%s5168_s7 + $0x98] sm:$0xff]  ;;  %v3374_v0 = vld [vmem:[%s5168_s7 + $0x20] sm:$0xff] }
 0x2b7   :  { %v1418_v35 = vpack.c.b16 %v1414_v1, %v1414_v1  ;;  %v1412_v30 = vunpack.c.h.b16 %v1121_v2  ;;  %v3397_v62 = vld [vmem:[%s5168_s7 + $0xd8] sm:$0xff]  ;;  %v3382_v1 = vld [vmem:[%s5168_s7 + $0x60] sm:$0xff]  ;;  %v3388_v53 = vld [vmem:[%s5168_s7 + $0x90] sm:$0xff]  ;;  %vm2463_vm0 = vcmask 31744   ;;  %vm2567_vm3 = vcmask 220160  }
 0x2b8   :  { %v1126_v56 = vpop.permute.xlu0 %1125  ;;  %v1431_v20 = vunpack.c.l.b16 %v1205_v28  ;;  %v1441_v27 = vunpack.c.l.b16 %v1241_v44  ;;  %v1432_v6 = vunpack.c.h.b16 %v1205_v28  ;;  %v1442_v10 = vunpack.c.h.b16 %v1241_v44  ;;  %v3396_v63 = vld [vmem:[%s5168_s7 + $0xd0] sm:$0xff]  ;;  %v3373_v15 = vld [vmem:[%s5168_s7 + $0x18] sm:$0xff]  ;;  %v3387_v18 = vld [vmem:[%s5168_s7 + $0x88] sm:$0xff] }
 0x2b9   :  { %v1131_v29 = vsel %vm430_vm1, %v1126_v56, %v4568_v8  ;;  %v1139_v21 = vsel %vm430_vm1, %v4639_v17, %v1126_v56  ;;  %v1499_v31 = vsel %vm920_vm4, %v1417_v23, %v1427_v13  ;;  %v1503_v41 = vsel %vm920_vm4, %v1418_v35, %v1428_v24  ;;  %v3392_v8 = vld [vmem:[%s5168_s7 + $0xb0] sm:$0xff]  ;;  %v3381_v14 = vld [vmem:[%s5168_s7 + $0x58] sm:$0xff]  ;;  %v3395_v25 = vld [vmem:[%s5168_s7 + $0xc8] sm:$0xff] }
 0x2ba   :  { %v1157_v57 = vunpack.c.l.bf16 %v1139_v21  ;;  %v1158_v19 = vunpack.c.l.bf16 %v1131_v29  ;;  %1623 = vmatpush.bf16.msrb.mxu2 %v1499_v31  ;;  %1637 = vmatpush.bf16.msrb.mxu3 %v1503_v41  ;;  %v1435_v50 = vpack.c.b16 %v1431_v20, %v1431_v20  ;;  %v1445_v32 = vpack.c.b16 %v1441_v27, %v1441_v27  ;;  %v3400_v17 = vld [vmem:[%s5168_s7 + $0xf0] sm:$0xff]  ;;  %v3386_v44 = vld [vmem:[%s5168_s7 + $0x80] sm:$0xff]  ;;  %v1560_v20 = vpop.permute.xlu1 %1559 }
 0x2bb   :  { %v1436_v60 = vpack.c.b16 %v1432_v6, %v1432_v6  ;;  %v1446_v3 = vpack.c.b16 %v1442_v10, %v1442_v10  ;;  %v1415_v9 = vpack.c.b16 %v1411_v43, %v1411_v43  ;;  %v1416_v49 = vpack.c.b16 %v1412_v30, %v1412_v30  ;;  %v3372_v13 = vld [vmem:[%s5168_s7 + $0x10] sm:$0xff]  ;;  %v3394_v28 = vld [vmem:[%s5168_s7 + $0xc0] sm:$0xff] }
 0x2bc   :  { %v1165_v12 = vmul.f32 %v1161_v54, %v1157_v57  ;;  %v1166_v39 = vmul.f32 %v1162_v36, %v1158_v19  ;;  %v1507_v26 = vsel %vm920_vm4, %v1435_v50, %v1445_v32  ;;  %v3380_v24 = vld [vmem:[%s5168_s7 + $0x50] sm:$0xff]  ;;  %v3371_v54 = vld [vmem:[%s5168_s7 + $0x8] sm:$0xff]  ;;  %v3370_v2 = vld [vmem:[%s5168_s7] sm:$0xff]  ;;  %vm2686_vm6 = vcmask 261120  }
 0x2bd   :  { %3153 = vmatmul.msk.bf16.vlgmr.msrb.gmra.mxu2 %vm1572_vm12, %v3369_v37  ;;  %3154 = vmatmul.msk.bf16.vlgmr.msrb.gmra.mxu3 %vm1572_vm12, %v3369_v37  ;;  %v1511_v33 = vsel %vm920_vm4, %v1436_v60, %v1446_v3  ;;  %v3379_v36 = vld [vmem:[%s5168_s7 + $0x48] sm:$0xff]  ;;  %v3378_v23 = vld [vmem:[%s5168_s7 + $0x40] sm:$0xff]  ;;  %s3908_s7 = smov 121  }
 0x2be   :  { %1940 = vmatpush.bf16.msra.mxu2 %v3393_v38  ;;  %1954 = vmatpush.bf16.msra.mxu3 %v3401_v5  ;;  %v1169_v4 = vpack.c.bf16 %v1166_v39, %v1165_v12 }
 0x2bf   :  { %1594 = vmatpush.bf16.msrb.mxu0 %v1507_v26  ;;  %1608 = vmatpush.bf16.msrb.mxu1 %v1511_v33 }
 0x2c0   :  { %v1421_v59 = vunpack.c.l.b16 %v1169_v4  ;;  %v1422_v58 = vunpack.c.h.b16 %v1169_v4 }
 0x2c2   :  { %1941 = vmatpush.bf16.msra.mxu2 %v3392_v8  ;;  %1955 = vmatpush.bf16.msra.mxu3 %v3400_v17  ;;  %v1425_v45 = vpack.c.b16 %v1421_v59, %v1421_v59  ;;  %v1426_v61 = vpack.c.b16 %v1422_v58, %v1422_v58 }
 0x2c4   :  { %v1491_v47 = vsel %vm920_vm4, %v1415_v9, %v1425_v45  ;;  %v1495_v22 = vsel %vm920_vm4, %v1416_v49, %v1426_v61  ;;  %vm2443_vm4 = vcmask 39936  }
 0x2c5   :  { %1595 = vmatpush.bf16.msrb.mxu0 %v1491_v47  ;;  %1609 = vmatpush.bf16.msrb.mxu1 %v1495_v22 }
 0x2c6   :  { %1942 = vmatpush.bf16.msra.mxu2 %v3391_v52  ;;  %1956 = vmatpush.bf16.msra.mxu3 %v3399_v16 }
 0x2c8   :  { %3151 = vmatmul.msk.bf16.vlgmr.msrb.gmra.mxu0 %vm1572_vm12, %v3369_v37  ;;  %3152 = vmatmul.msk.bf16.vlgmr.msrb.gmra.mxu1 %vm1572_vm12, %v3369_v37 }
 0x2c9   :  { %1912 = vmatpush.bf16.msra.mxu0 %v3377_v34  ;;  %1926 = vmatpush.bf16.msra.mxu1 %v3385_v55 }
 0x2ca   :  { %1943 = vmatpush.bf16.msra.mxu2 %v3390_v51  ;;  %1957 = vmatpush.bf16.msra.mxu3 %v3398_v7 }
 0x2cd   :  { %1913 = vmatpush.bf16.msra.mxu0 %v3376_v40  ;;  %1927 = vmatpush.bf16.msra.mxu1 %v3384_v11 }
 0x2ce   :  { %1944 = vmatpush.bf16.msra.mxu2 %v3389_v48  ;;  %1958 = vmatpush.bf16.msra.mxu3 %v3397_v62 }
 0x2d1   :  { %1914 = vmatpush.bf16.msra.mxu0 %v3375_v46  ;;  %1928 = vmatpush.bf16.msra.mxu1 %v3383_v42 }
 0x2d2   :  { %1945 = vmatpush.bf16.msra.mxu2 %v3388_v53  ;;  %1959 = vmatpush.bf16.msra.mxu3 %v3396_v63  ;;  %v1970_v53 = vld [vmem:[#allocation6] sm:$0xf]  ;;  %v2188_v63 = vld [vmem:[#allocation10] sm:$0xf] }
 0x2d5   :  { %1915 = vmatpush.bf16.msra.mxu0 %v3374_v0  ;;  %1929 = vmatpush.bf16.msra.mxu1 %v3382_v1  ;;  %v2297_v1 = vld [vmem:[#allocation9] sm:$0xff] }
 0x2d6   :  { %1946 = vmatpush.bf16.msra.mxu2 %v3387_v18  ;;  %1960 = vmatpush.bf16.msra.mxu3 %v3395_v25 }
 0x2d9   :  { %1916 = vmatpush.bf16.msra.mxu0 %v3373_v15  ;;  %1930 = vmatpush.bf16.msra.mxu1 %v3381_v14  ;;  %v1996_v15 = vshrl.u32 %v1970_v53, 16  ;;  %v2199_v14 = vshrl.u32 %v2188_v63, 16 }
 0x2da   :  { %1947 = vmatpush.bf16.msra.mxu2 %v3386_v44  ;;  %1961 = vmatpush.bf16.msra.mxu3 %v3394_v28 }
 0x2db   :  { %v1997_v18 = vpack.i.b16 %v1996_v15, %v1996_v15  ;;  %v2200_v25 = vpack.i.b16 %v2199_v14, %v2199_v14 }
 0x2dd   :  { %1917 = vmatpush.bf16.msra.mxu0 %v3372_v13  ;;  %1931 = vmatpush.bf16.msra.mxu1 %v3380_v24  ;;  %v2036_v13 = vperm.slane %v1997_v18, 2  ;;  %v2220_v24 = vperm.slane %v2200_v25, 2 }
 0x2df   :  { %v2039_v28 = vunpack.c.l.bf16 %v2036_v13 }
 0x2e1   :  { %1918 = vmatpush.bf16.msra.mxu0 %v3371_v54  ;;  %1932 = vmatpush.bf16.msra.mxu1 %v3379_v36  ;;  %v2221_v54 = vunpack.c.l.bf16 %v2220_v24 }
 0x2e5   :  { %1919 = vmatpush.bf16.msra.mxu0 %v3370_v2  ;;  %1933 = vmatpush.bf16.msra.mxu1 %v3378_v23  ;;  %v4843_v23 = vpack.i.b16 %v1970_v53, %v1970_v53 }
 0x301   :  { %v1565_v27 = vpop.permute.xlu2 %1564 }
 0x340   :  { %v1625_v35 = vpop.f32.mrf.mxu2  ;;  %v1639_v38 = vpop.f32.mrf.mxu3 }
 0x341   :  { %v1626_v6 = vadd.f32 %v1625_v35, %v1560_v20  ;;  %v1640_v10 = vadd.f32 %v1639_v38, %v1560_v20  ;;  %v4845_v35 = vpack.i.b16 %v2188_v63, %v2188_v63 }
 0x343   :  { %v1646_v37 = vmax.f32 %v1626_v6, 0.0  ;;  %v1647_v57 = vmax.f32 %v1640_v10, 0.0  ;;  %v2202_v6 = vperm.slane %v2200_v25, 0  ;;  %v2048_v10 = vperm.slane %v4843_v23, 3 }
 0x345   :  { %v1597_v5 = vpop.f32.mrf.mxu0  ;;  %v1611_v56 = vpop.f32.mrf.mxu1 }
 0x346   :  { %v1598_v32 = vadd.f32 %v1597_v5, %v1560_v20  ;;  %v1612_v60 = vadd.f32 %v1611_v56, %v1560_v20 }
 0x348   :  { %v1627_v29 = vpop.f32.mrf.mxu2  ;;  %v1641_v21 = vpop.f32.mrf.mxu3  ;;  %v1644_v33 = vmax.f32 %v1598_v32, 0.0  ;;  %v1645_v4 = vmax.f32 %v1612_v60, 0.0 }
 0x349   :  { %v1628_v31 = vadd.f32 %v1627_v29, %v1565_v27  ;;  %v1642_v41 = vadd.f32 %v1641_v21, %v1565_v27  ;;  %v2226_v29 = vperm.slane %v4845_v35, 3  ;;  %v2060_v21 = vperm.slane %v1997_v18, 3 }
 0x34b   :  { %v1650_v19 = vmax.f32 %v1628_v31, 0.0  ;;  %v1651_v50 = vmax.f32 %v1642_v41, 0.0  ;;  %v2232_v31 = vperm.slane %v2200_v25, 3  ;;  %v2012_v41 = vperm.slane %v4843_v23, 1 }
 0x34d   :  { %v1599_v3 = vpop.f32.mrf.mxu0  ;;  %v1613_v8 = vpop.f32.mrf.mxu1  ;;  %v1654_v17 = vpack.c.bf16 %v1650_v19, %v1646_v37  ;;  %v1655_v12 = vpack.c.bf16 %v1651_v50, %v1647_v57  ;;  %v2208_v37 = vperm.slane %v4845_v35, 1  ;;  %v2024_v57 = vperm.slane %v1997_v18, 1 }
 0x34e   :  { %v1600_v39 = vadd.f32 %v1599_v3, %v1565_v27  ;;  %v1614_v26 = vadd.f32 %v1613_v8, %v1565_v27  ;;  %v1999_v27 = vperm.slane %v1997_v18, 0  ;;  %v2214_v19 = vperm.slane %v2200_v25, 1 }
 0x34f   :  { %1948 = vmatmul.bf16.vlgmr.msra.gmra.mxu2 %v1654_v17  ;;  %1962 = vmatmul.bf16.vlgmr.msra.gmra.mxu3 %v1655_v12  ;;  %v4851_v17 = vunpack.c.l.bf16 %v2202_v6 }
 0x350   :  { %v1648_v43 = vmax.f32 %v1600_v39, 0.0  ;;  %v1649_v30 = vmax.f32 %v1614_v26, 0.0  ;;  %v2002_v8 = vunpack.c.l.bf16 %v1999_v27  ;;  %v2051_v39 = vunpack.c.l.bf16 %v2048_v10 }
 0x351   :  { %v2227_v26 = vunpack.c.l.bf16 %v2226_v29 }
 0x352   :  { %v1652_v52 = vpack.c.bf16 %v1648_v43, %v1644_v33  ;;  %v1653_v16 = vpack.c.bf16 %v1649_v30, %v1645_v4  ;;  %v2063_v33 = vunpack.c.l.bf16 %v2060_v21  ;;  %v2233_v4 = vunpack.c.l.bf16 %v2232_v31 }
 0x353   :  { %v4855_v43 = vunpack.c.l.bf16 %v2012_v41  ;;  %v4857_v30 = vunpack.c.l.bf16 %v2208_v37 }
 0x354   :  { %1920 = vmatmul.bf16.vlgmr.msra.gmra.mxu0 %v1652_v52  ;;  %1934 = vmatmul.bf16.vlgmr.msra.gmra.mxu1 %v1653_v16  ;;  %v2027_v52 = vunpack.c.l.bf16 %v2024_v57  ;;  %v4859_v16 = vunpack.c.l.bf16 %v2214_v19 }
 0x3d1   :  { %v1921_v59 = vpop.f32.mrf.mxu0  ;;  %v1935_v58 = vpop.f32.mrf.mxu1 }
 0x3d2   :  { %v1936_v9 = vadd.f32 %v1935_v58, %v1921_v59  ;;  %v1949_v45 = vpop.f32.mrf.mxu2  ;;  %v1963_v49 = vpop.f32.mrf.mxu3  ;;  %v1971_v59 = vld [vmem:[#allocation6 + $0x4] sm:$0x1]  ;;  %v2189_v58 = vld [vmem:[#allocation10 + $0x4] sm:$0x1] }
 0x3d4   :  { %v1950_v61 = vadd.f32 %v1949_v45, %v1936_v9 }
 0x3d6   :  { %v1964_v51 = vadd.f32 %v1963_v49, %v1950_v61 }
 0x3d8   :  { %v1968_v11 = vpack.c.bf16 %v1964_v51, %v1964_v51 }
 0x3d9   :  { %v1923_v34 = vpop.f32.mrf.mxu0  ;;  %v1937_v55 = vpop.f32.mrf.mxu1 }
 0x3da   :  { %v1938_v7 = vadd.f32 %v1937_v55, %v1923_v34  ;;  %v1951_v47 = vpop.f32.mrf.mxu2  ;;  %v1965_v40 = vpop.f32.mrf.mxu3  ;;  %v1974_v48 = vunpack.c.l.b16 %v1968_v11 }
 0x3dc   :  { %v1952_v22 = vadd.f32 %v1951_v47, %v1938_v7 }
 0x3de   :  { %v1966_v46 = vadd.f32 %v1965_v40, %v1952_v22 }
 0x3e0   :  { %v1969_v42 = vpack.c.bf16 %v1966_v46, %v1966_v46  ;;  %v2073_v46 = vpack.i.b16 %v1971_v59, %v1971_v59 }
 0x3e2   :  { %v1975_v62 = vunpack.c.l.b16 %v1969_v42  ;;  %v2239_v42 = vpack.i.b16 %v2189_v58, %v2189_v58 }
 0x3e4   :  { %v4828_v0 = vpack.c.b16 %v1975_v62, %v1974_v48 }
 0x3e6   :  { %2032 = vrot.lane.b32.xlu2 %v4828_v0, %s3903_s2  ;;  %2044 = vrot.lane.b32.xlu1 %v4828_v0, %s3908_s7 }
 0x3e7   :  { %2056 = vrot.lane.b32.xlu0 %v4828_v0, %s3909_s5  ;;  %s3914_s5 = smov 124  }
 0x3ee   :  { %1992 = vrot.lane.b32.xlu2 %v4828_v0, %s3884_s0  ;;  %2007 = vrot.lane.b32.xlu1 %v4828_v0, %s3910_s29  ;;  %s3917_s0 = smov 123  }
 0x3ef   :  { %2020 = vrot.lane.b32.xlu0 %v4828_v0, %s3902_s15 }
 0x3f6   :  { %2301 = vperm.xlu2 %3475, %v2297_v1   ;;  %2068 = vrot.lane.b32.xlu1 %v4828_v0, %s3911_s13  ;;  %s3915_s13 = smov 29  }
 0x3f7   :  { %1977 = vrot.lane.b32.xlu0 %v4828_v0, %s3912_s22  ;;  %s3916_s22 = smov 125  }
 0x440   :  { %v2033_v44 = vpop.permute.xlu2 %2032 }
 0x441   :  { %v2037_v36 = vunpack.c.l.bf16 %v2033_v44  ;;  %v2038_v2 = vunpack.c.h.bf16 %v2033_v44 }
 0x443   :  { %v2040_v38 = vmul.f32 %v2039_v28, %v2037_v36  ;;  %v2041_v5 = vmul.f32 %v2039_v28, %v2038_v2  ;;  %v2222_v56 = vmul.f32 %v2221_v54, %v2037_v36  ;;  %v2223_v20 = vmul.f32 %v2221_v54, %v2038_v2 }
 0x445   :  { %v2042_v50 = vpack.c.bf16 %v2040_v38, %v2040_v38  ;;  %v2043_v32 = vpack.c.bf16 %v2041_v5, %v2041_v5  ;;  %v2224_v60 = vpack.c.bf16 %v2222_v56, %v2222_v56  ;;  %v2225_v3 = vpack.c.bf16 %v2223_v20, %v2223_v20 }
 0x447   :  { %v4861_v9 = vunpack.c.l.b16 %v2042_v50  ;;  %v4863_v45 = vunpack.c.l.b16 %v2043_v32  ;;  %v4865_v49 = vunpack.c.l.b16 %v2224_v60  ;;  %v4867_v61 = vunpack.c.l.b16 %v2225_v3 }
 0x448   :  { %v4853_v12 = vpop.permute.xlu2 %1992 }
 0x449   :  { %v2000_v55 = vunpack.c.l.bf16 %v4853_v12  ;;  %v2001_v51 = vunpack.c.h.bf16 %v4853_v12  ;;  %v2112_v24 = vpack.c.b16 %v4863_v45, %v4861_v9  ;;  %v2275_v44 = vpack.c.b16 %v4867_v61, %v4865_v49  ;;  %v3402_v9 = vld [vmem:[%s5169_s26 + $0x4] sm:$0xf]  ;;  %v3287_v45 = vld [vmem:[%s5169_s26 + $0x8] sm:$0x70] }
 0x44b   :  { %v4875_v38 = vmul.f32 %v2002_v8, %v2000_v55  ;;  %v4877_v5 = vmul.f32 %v2002_v8, %v2001_v51  ;;  %v2075_v8 = vperm.slane %v2073_v46, 0 }
 0x458   :  { %v2045_v34 = vpop.permute.xlu1 %2044 }
 0x459   :  { %v2049_v7 = vunpack.c.l.bf16 %v2045_v34  ;;  %v2050_v47 = vunpack.c.h.bf16 %v2045_v34  ;;  %v2057_v22 = vpop.permute.xlu0 %2056  ;;  %v2298_v34 = vld [vmem:[#allocation9 + $0x8] sm:$0xff] }
 0x45a   :  { %v2061_v40 = vunpack.c.l.bf16 %v2057_v22  ;;  %v2062_v11 = vunpack.c.h.bf16 %v2057_v22  ;;  %v1984_v22 = vperm.slane %v4843_v23, 0  ;;  %2306 = vperm.xlu0 %3476, %v2298_v34  }
 0x45b   :  { %v2052_v48 = vmul.f32 %v2051_v39, %v2049_v7  ;;  %v2053_v62 = vmul.f32 %v2051_v39, %v2050_v47  ;;  %v2228_v1 = vmul.f32 %v2227_v26, %v2049_v7  ;;  %v2229_v53 = vmul.f32 %v2227_v26, %v2050_v47 }
 0x45c   :  { %v2064_v63 = vmul.f32 %v2063_v33, %v2061_v40  ;;  %v2065_v15 = vmul.f32 %v2063_v33, %v2062_v11  ;;  %v2234_v14 = vmul.f32 %v2233_v4, %v2061_v40  ;;  %v2235_v18 = vmul.f32 %v2233_v4, %v2062_v11 }
 0x45d   :  { %v2054_v25 = vpack.c.bf16 %v2052_v48, %v2052_v48  ;;  %v2055_v13 = vpack.c.bf16 %v2053_v62, %v2053_v62  ;;  %v2230_v56 = vpack.c.bf16 %v2228_v1, %v2228_v1  ;;  %v2231_v20 = vpack.c.bf16 %v2229_v53, %v2229_v53 }
 0x45e   :  { %v2066_v28 = vpack.c.bf16 %v2064_v63, %v2064_v63  ;;  %v2067_v54 = vpack.c.bf16 %v2065_v15, %v2065_v15  ;;  %v2236_v36 = vpack.c.bf16 %v2234_v14, %v2234_v14  ;;  %v2237_v2 = vpack.c.bf16 %v2235_v18, %v2235_v18 }
 0x45f   :  { %v2116_v31 = vunpack.c.l.b16 %v2054_v25  ;;  %v2117_v41 = vunpack.c.l.b16 %v2055_v13  ;;  %v2279_v12 = vunpack.c.l.b16 %v2230_v56  ;;  %v2280_v39 = vunpack.c.l.b16 %v2231_v20 }
 0x460   :  { %v2122_v27 = vunpack.c.l.b16 %v2066_v28  ;;  %v2123_v6 = vunpack.c.l.b16 %v2067_v54  ;;  %v2285_v10 = vunpack.c.l.b16 %v2236_v36  ;;  %v2286_v29 = vunpack.c.l.b16 %v2237_v2  ;;  %v2008_v21 = vpop.permute.xlu1 %2007 }
 0x461   :  { %v2013_v37 = vunpack.c.l.bf16 %v2008_v21  ;;  %v2014_v57 = vunpack.c.h.bf16 %v2008_v21  ;;  %v2021_v19 = vpop.permute.xlu0 %2020  ;;  %v2241_v26 = vperm.slane %v2239_v42, 0  ;;  %v4880_v33 = vmul.f32 %v4851_v17, %v2000_v55 }
 0x462   :  { %v2124_v50 = vpack.c.b16 %v2123_v6, %v2122_v27  ;;  %v2287_v32 = vpack.c.b16 %v2286_v29, %v2285_v10  ;;  %v2025_v60 = vunpack.c.l.bf16 %v2021_v19  ;;  %v2026_v3 = vunpack.c.h.bf16 %v2021_v19 }
 0x463   :  { %v4883_v4 = vmul.f32 %v4851_v17, %v2001_v51  ;;  %v2005_v7 = vpack.c.bf16 %v4875_v38, %v4875_v38  ;;  %v2118_v47 = vpack.c.b16 %v2117_v41, %v2116_v31  ;;  %v2193_v40 = vperm.slane %v4845_v35, 0 }
 0x464   :  { %v2028_v59 = vmul.f32 %v2027_v52, %v2025_v60  ;;  %v2029_v58 = vmul.f32 %v2027_v52, %v2026_v3  ;;  %2158 = vmatpush.bf16.msrb.mxu0 %v2124_v50  ;;  %2321 = vmatpush.bf16.msrb.mxu2 %v2287_v32  ;;  %v2016_v11 = vmul.f32 %v4855_v43, %v2013_v37  ;;  %v2078_v42 = vunpack.c.l.bf16 %v2075_v8  ;;  %v3404_v50 = vld [vmem:[#allocation7 + $0x4] sm:$0xf]  ;;  %v3413_v8 = vld [vmem:[%s5133_s14 + $0x38] sm:$0xff] }
 0x465   :  { %v2017_v55 = vmul.f32 %v4855_v43, %v2014_v57  ;;  %v2216_v17 = vmul.f32 %v4859_v16, %v2025_v60  ;;  %v2217_v51 = vmul.f32 %v4859_v16, %v2026_v3  ;;  %v2006_v52 = vpack.c.bf16 %v4877_v5, %v4877_v5 }
 0x466   :  { %v2281_v46 = vpack.c.b16 %v2280_v39, %v2279_v12  ;;  %v2242_v48 = vunpack.c.l.bf16 %v2241_v26  ;;  %v2210_v62 = vmul.f32 %v4857_v30, %v2013_v37  ;;  %v2211_v23 = vmul.f32 %v4857_v30, %v2014_v57  ;;  %v3296_v39 = vld [vmem:[#allocation7 + $0x8] sm:$0xf0] }
 0x467   :  { %v2030_v35 = vpack.c.bf16 %v2028_v59, %v2028_v59  ;;  %v2031_v1 = vpack.c.bf16 %v2029_v58, %v2029_v58  ;;  %v1987_v15 = vunpack.c.l.bf16 %v1984_v22  ;;  %v2194_v16 = vunpack.c.l.bf16 %v2193_v40 }
 0x468   :  { %2159 = vmatpush.bf16.msrb.mxu0 %v2118_v47  ;;  %v2069_v53 = vpop.permute.xlu1 %2068  ;;  %2322 = vmatpush.bf16.msrb.mxu2 %v2281_v46  ;;  %v2018_v14 = vpack.c.bf16 %v2016_v11, %v2016_v11  ;;  %v2019_v18 = vpack.c.bf16 %v2017_v55, %v2017_v55  ;;  %v2218_v25 = vpack.c.bf16 %v2216_v17, %v2216_v17  ;;  %v2092_v46 = vunpack.c.l.b16 %v2006_v52 }
 0x469   :  { %v2076_v43 = vunpack.c.l.bf16 %v2069_v53  ;;  %v2077_v63 = vunpack.c.h.bf16 %v2069_v53  ;;  %v2219_v13 = vpack.c.bf16 %v2217_v51, %v2217_v51  ;;  %v1978_v56 = vpop.permute.xlu0 %1977  ;;  %v2212_v20 = vpack.c.bf16 %v2210_v62, %v2210_v62  ;;  %v3412_v51 = vld [vmem:[%s5133_s14 + $0x30] sm:$0xff] }
 0x46a   :  { %v2213_v30 = vpack.c.bf16 %v2211_v23, %v2211_v23  ;;  %v2103_v27 = vunpack.c.l.b16 %v2030_v35  ;;  %v2104_v6 = vunpack.c.l.b16 %v2031_v1  ;;  %v2267_v41 = vunpack.c.l.b16 %v2218_v25 }
 0x46b   :  { %v2079_v28 = vmul.f32 %v2078_v42, %v2076_v43  ;;  %v2080_v54 = vmul.f32 %v2078_v42, %v2077_v63  ;;  %v2243_v36 = vmul.f32 %v2242_v48, %v2076_v43  ;;  %v2244_v2 = vmul.f32 %v2242_v48, %v2077_v63 }
 0x46c   :  { %2160 = vmatpush.bf16.msrb.mxu0 %v2112_v24  ;;  %2323 = vmatpush.bf16.msrb.mxu2 %v2275_v44  ;;  %v2268_v37 = vunpack.c.l.b16 %v2219_v13  ;;  %v1985_v57 = vunpack.c.l.bf16 %v1978_v56  ;;  %v1986_v19 = vunpack.c.h.bf16 %v1978_v56  ;;  %v2206_v49 = vpack.c.bf16 %v4880_v33, %v4880_v33  ;;  %v3407_v56 = vld [vmem:[%s5133_s14 + $0x8] sm:$0xff] }
 0x46d   :  { %v2081_v10 = vpack.c.bf16 %v2079_v28, %v2079_v28  ;;  %v2082_v29 = vpack.c.bf16 %v2080_v54, %v2080_v54  ;;  %v2245_v21 = vpack.c.bf16 %v2243_v36, %v2243_v36  ;;  %v2246_v31 = vpack.c.bf16 %v2244_v2, %v2244_v2  ;;  %v3411_v28 = vld [vmem:[%s5133_s14 + $0x28] sm:$0xff]  ;;  %v3410_v54 = vld [vmem:[%s5133_s14 + $0x20] sm:$0xff]  ;;  %v3409_v36 = vld [vmem:[%s5133_s14 + $0x18] sm:$0xff] }
 0x46e   :  { %v2207_v61 = vpack.c.bf16 %v4883_v4, %v4883_v4  ;;  %v2097_v24 = vunpack.c.l.b16 %v2018_v14  ;;  %v2098_v44 = vunpack.c.l.b16 %v2019_v18  ;;  %v2261_v26 = vunpack.c.l.b16 %v2212_v20  ;;  %v3405_v14 = vld [vmem:[#allocation7 + $0x4] sm:$0xf0]  ;;  %v3408_v2 = vld [vmem:[%s5133_s14 + $0x10] sm:$0xff] }
 0x46f   :  { %v2128_v32 = vunpack.c.l.b16 %v2081_v10  ;;  %v2129_v60 = vunpack.c.l.b16 %v2082_v29  ;;  %v2291_v3 = vunpack.c.l.b16 %v2245_v21  ;;  %v2292_v12 = vunpack.c.l.b16 %v2246_v31  ;;  %v3406_v20 = vld [vmem:[%s5133_s14] sm:$0xff]  ;;  %s3913_s14 = smov 28  }
 0x470   :  { %2161 = vmatpush.bf16.msrb.mxu0 %v4828_v0  ;;  %2324 = vmatpush.bf16.msrb.mxu2 %v4828_v0  ;;  %v2105_v34 = vpack.c.b16 %v2104_v6, %v2103_v27  ;;  %v1988_v47 = vmul.f32 %v1987_v15, %v1985_v57  ;;  %v1989_v22 = vmul.f32 %v1987_v15, %v1986_v19  ;;  %v2262_v11 = vunpack.c.l.b16 %v2213_v30  ;;  %v2302_v6 = vpop.permute.xlu2 %2301 }
 0x471   :  { %v2130_v59 = vpack.c.b16 %v2129_v60, %v2128_v32  ;;  %v2293_v58 = vpack.c.b16 %v2292_v12, %v2291_v3  ;;  %v3299_v33 = vor.u32 %v3404_v50, %v3296_v39  ;;  %v3290_v40 = vor.u32 %v3402_v9, %v3287_v45 }
 0x472   :  { %v2195_v4 = vmul.f32 %v2194_v16, %v1985_v57  ;;  %v2196_v55 = vmul.f32 %v2194_v16, %v1986_v19  ;;  %v2269_v17 = vpack.c.b16 %v2268_v37, %v2267_v41  ;;  %v2091_v0 = vunpack.c.l.b16 %v2005_v7  ;;  %v3294_v16 = vld [vmem:[#allocation7] sm:$0xf] }
 0x473   :  { %2179 = vmatpush.bf16.msrb.mxu1 %v2130_v59  ;;  %2342 = vmatpush.bf16.msrb.mxu3 %v2293_v58  ;;  %v2255_v42 = vunpack.c.l.b16 %v2206_v49  ;;  %v1990_v48 = vpack.c.bf16 %v1988_v47, %v1988_v47  ;;  %v1991_v62 = vpack.c.bf16 %v1989_v22, %v1989_v22  ;;  %v2099_v23 = vpack.c.b16 %v2098_v44, %v2097_v24  ;;  %v2799_v44 = vld [vmem:[#allocation18] sm:$0xff]  ;;  %v2432_v59 = vld [vmem:[#allocation15] sm:$0xf]  ;;  %v2690_v58 = vld [vmem:[#allocation19] sm:$0xf] }
 0x474   :  { %2162 = vmatpush.bf16.msrb.mxu0 %v2105_v34  ;;  %2325 = vmatpush.bf16.msrb.mxu2 %v2269_v17  ;;  %v2256_v35 = vunpack.c.l.b16 %v2207_v61  ;;  %v2197_v1 = vpack.c.bf16 %v2195_v4, %v2195_v4  ;;  %v2198_v53 = vpack.c.bf16 %v2196_v55, %v2196_v55  ;;  %v2263_v43 = vpack.c.b16 %v2262_v11, %v2261_v26  ;;  %v3285_v22 = vld [vmem:[%s5169_s26] sm:$0xf] }
 0x475   :  { %v2085_v38 = vunpack.c.l.b16 %v1990_v48  ;;  %v2086_v7 = vunpack.c.l.b16 %v1991_v62  ;;  %v2093_v5 = vpack.c.b16 %v2092_v46, %v2091_v0  ;;  %v3295_v13 = vor.u32 %v3405_v14, %v3294_v16 }
 0x476   :  { %3300 = vmatmul.msk.bf16.vlgmr.msrb.gmra.mxu3 %vm430_vm1, %v3299_v33  ;;  %3291 = vmatmul.msk.bf16.vlgmr.msrb.gmra.mxu1 %vm430_vm1, %v3290_v40  ;;  %v2249_v52 = vunpack.c.l.b16 %v2197_v1  ;;  %v2250_v63 = vunpack.c.l.b16 %v2198_v53  ;;  %v2257_v15 = vpack.c.b16 %v2256_v35, %v2255_v42  ;;  %v2468_v34 = vshrl.u32 %v2432_v59, 16  ;;  %v3403_v33 = vld [vmem:[%s5169_s26 + $0x4] sm:$0x70]  ;;  %s3926_s26 = smov 6  }
 0x477   :  { %2416 = vmatpush.bf16.msra.mxu1 %v3413_v8  ;;  %v2087_v18 = vpack.c.b16 %v2086_v7, %v2085_v38  ;;  %v2800_v8 = vld [vmem:[#allocation18 + $0x8] sm:$0xff]  ;;  %v2701_v47 = vshrl.u32 %v2690_v58, 16  ;;  %v3286_v40 = vor.u32 %v3403_v33, %v3285_v22  ;;  %v4992_v35 = vpack.i.b16 %v2690_v58, %v2690_v58 }
 0x478   :  { %2163 = vmatpush.bf16.msrb.mxu0 %v2099_v23  ;;  %2326 = vmatpush.bf16.msrb.mxu2 %v2263_v43  ;;  %v2251_v25 = vpack.c.b16 %v2250_v63, %v2249_v52  ;;  %v4982_v11 = vpack.i.b16 %v2468_v34, %v2468_v34  ;;  %v4990_v23 = vpack.i.b16 %v2432_v59, %v2432_v59  ;;  %v2433_v33 = vld [vmem:[#allocation15 + $0x4] sm:$0x1] }
 0x479   :  { %v4984_v4 = vpack.i.b16 %v2701_v47, %v2701_v47 }
 0x47a   :  { %v2555_v17 = vperm.slane %v4982_v11, 3  ;;  %v2538_v63 = vperm.slane %v4990_v23, 3 }
 0x47b   :  { %2417 = vmatpush.bf16.msra.mxu1 %v3412_v51  ;;  %v2734_v51 = vperm.slane %v4984_v4, 3 }
 0x47c   :  { %2164 = vmatpush.bf16.msrb.mxu0 %v2093_v5  ;;  %2327 = vmatpush.bf16.msrb.mxu2 %v2257_v15  ;;  %v2558_v46 = vunpack.c.l.bf16 %v2555_v17  ;;  %v2728_v15 = vperm.slane %v4992_v35, 3 }
 0x47d   :  { %v2735_v42 = vunpack.c.l.bf16 %v2734_v51 }
 0x47f   :  { %2418 = vmatpush.bf16.msra.mxu1 %v3411_v28  ;;  %v2716_v28 = vperm.slane %v4984_v4, 1 }
 0x480   :  { %2165 = vmatpush.bf16.msrb.mxu0 %v2087_v18  ;;  %2328 = vmatpush.bf16.msrb.mxu2 %v2251_v25 }
 0x483   :  { %2329 = vmatmul.bf16.vlgmr.msrb.gmra.mxu2 %v3295_v13  ;;  %2419 = vmatpush.bf16.msra.mxu1 %v3410_v54  ;;  %v2504_v13 = vperm.slane %v4982_v11, 1 }
 0x484   :  { %2166 = vmatmul.bf16.vlgmr.msrb.gmra.mxu0 %v3286_v40  ;;  %v2691_v40 = vld [vmem:[#allocation19 + $0x4] sm:$0x1] }
 0x487   :  { %2420 = vmatpush.bf16.msra.mxu1 %v3409_v36  ;;  %v2521_v36 = vperm.slane %v4982_v11, 2 }
 0x48b   :  { %2421 = vmatpush.bf16.msra.mxu1 %v3408_v2 }
 0x48f   :  { %2422 = vmatpush.bf16.msra.mxu1 %v3407_v56 }
 0x493   :  { %2423 = vmatpush.bf16.msra.mxu1 %v3406_v20 }
 0x4cc   :  { %v2307_v29 = vpop.permute.xlu0 %2306 }
 0x4f3   :  { %v4947_v60 = vpop.f32.mrf.mxu1 }
 0x4f9   :  { %v2344_v30 = vpop.f32.mrf.mxu3 }
 0x4fb   :  { %v4949_v3 = vpop.f32.mrf.mxu1 }
 0x501   :  { %v2346_v37 = vpop.f32.mrf.mxu3 }
 0x506   :  { %v2330_v27 = vpop.f32.mrf.mxu2 }
 0x507   :  { %v2331_v10 = vadd.f32 %v2330_v27, %v2302_v6  ;;  %v2541_v6 = vunpack.c.l.bf16 %v2538_v63 }
 0x509   :  { %v2345_v31 = vadd.f32 %v2344_v30, %v2331_v10  ;;  %v2729_v10 = vunpack.c.l.bf16 %v2728_v15 }
 0x50b   :  { %v2349_v19 = vmax.f32 %v2345_v31, 0.0 }
 0x50e   :  { %v2332_v21 = vpop.f32.mrf.mxu2 }
 0x50f   :  { %v2333_v41 = vadd.f32 %v2332_v21, %v2307_v29 }
 0x511   :  { %v2347_v57 = vadd.f32 %v2346_v37, %v2333_v41  ;;  %v2722_v41 = vperm.slane %v4984_v4, 2  ;;  %v2507_v37 = vunpack.c.l.bf16 %v2504_v13 }
 0x513   :  { %v2350_v50 = vmax.f32 %v2347_v57, 0.0 }
 0x515   :  { %v2351_v32 = vpack.c.bf16 %v2350_v50, %v2349_v19  ;;  %v2717_v50 = vunpack.c.l.bf16 %v2716_v28 }
 0x517   :  { %2424 = vmatmul.bf16.vlgmr.msra.gmra.mxu1 %v2351_v32 }
 0x594   :  { %v2425_v12 = vpop.f32.mrf.mxu1 }
 0x595   :  { %v2430_v39 = vpack.c.bf16 %v2425_v12, %v2425_v12  ;;  %v2524_v12 = vunpack.c.l.bf16 %v2521_v36 }
 0x597   :  { %v2436_v49 = vunpack.c.l.b16 %v2430_v39 }
 0x59c   :  { %v2427_v9 = vpop.f32.mrf.mxu1 }
 0x59d   :  { %v2431_v45 = vpack.c.bf16 %v2427_v9, %v2427_v9 }
 0x59f   :  { %v2437_v61 = vunpack.c.l.b16 %v2431_v45 }
 0x5a1   :  { %v4951_v24 = vpack.c.b16 %v2437_v61, %v2436_v49 }
 0x5a3   :  { %2512 = vrot.lane.b32.xlu0 %v4951_v24, %s3903_s2  ;;  %2548 = vrot.lane.b32.xlu2 %v4951_v24, %s3913_s14 }
 0x5a4   :  { %2546 = vrot.lane.b32.xlu1 %v4951_v24, %s3914_s5 }
 0x5ab   :  { %2498 = vrot.lane.b32.xlu0 %v4951_v24, %s3902_s15  ;;  %2531 = vrot.lane.b32.xlu2 %v4951_v24, %s3915_s13 }
 0x5ac   :  { %2529 = vrot.lane.b32.xlu1 %v4951_v24, %s3916_s22 }
 0x5b3   :  { %2563 = vrot.lane.b32.xlu0 %v4951_v24, %s3917_s0  ;;  %2496 = vrot.lane.b32.xlu2 %v4951_v24, %s3918_s6 }
 0x5b4   :  { %2514 = vrot.lane.b32.xlu1 %v4951_v24, %s3919_s17 }
 0x5bb   :  { %2461 = vrot.lane.b32.xlu0 %v4951_v24, %s3881_s4  ;;  %2481 = vrot.lane.b32.xlu2 %v4951_v24, %s3920_s16  ;;  %s3925_s4 = smov 101  }
 0x5bc   :  { %2479 = vrot.lane.b32.xlu1 %v4951_v24, %s3921_s11 }
 0x5c3   :  { %2803 = vperm.xlu0 %3476, %v2799_v44   ;;  %2459 = vrot.lane.b32.xlu2 %v4951_v24, %s3922_s18  ;;  %v2723_v44 = vunpack.c.l.bf16 %v2722_v41 }
 0x5c4   :  { %2565 = vrot.lane.b32.xlu1 %v4951_v24, %s3923_s30 }
 0x5cb   :  { %2441 = vrot.lane.b32.xlu2 %v4951_v24, %s3924_s19 }
 0x5cc   :  { %2439 = vrot.lane.b32.xlu1 %v4951_v24, %s3925_s4 }
 0x5d4   :  { %2808 = vperm.xlu1 %3474, %v2800_v8   ;;  %v2471_v8 = vperm.slane %v4982_v11, 0 }
 0x5fd   :  { %v2549_v26 = vpop.permute.xlu2 %2548 }
 0x605   :  { %v2532_v55 = vpop.permute.xlu2 %2531 }
 0x60d   :  { %v2497_v43 = vpop.permute.xlu2 %2496 }
 0x615   :  { %v4988_v0 = vpop.permute.xlu0 %2512  ;;  %v5002_v39 = vpop.permute.xlu2 %2481 }
 0x616   :  { %v2547_v48 = vpop.permute.xlu1 %2546 }
 0x617   :  { %v2553_v62 = vsel %vm2550_vm13, %v2547_v48, %v2549_v26  ;;  %v2704_v26 = vperm.slane %v4984_v4, 0 }
 0x618   :  { %v2556_v1 = vunpack.c.l.bf16 %v2553_v62  ;;  %v2557_v53 = vunpack.c.h.bf16 %v2553_v62 }
 0x61a   :  { %v2559_v38 = vmul.f32 %v2558_v46, %v2556_v1  ;;  %v2560_v7 = vmul.f32 %v2558_v46, %v2557_v53  ;;  %v2736_v5 = vmul.f32 %v2735_v42, %v2556_v1  ;;  %v2737_v52 = vmul.f32 %v2735_v42, %v2557_v53 }
 0x61b   :  { %v2488_v46 = vperm.slane %v4990_v23, 1  ;;  %v2710_v42 = vperm.slane %v4992_v35, 1 }
 0x61c   :  { %v2561_v16 = vpack.c.bf16 %v2559_v38, %v2559_v38  ;;  %v2562_v14 = vpack.c.bf16 %v2560_v7, %v2560_v7  ;;  %v2738_v18 = vpack.c.bf16 %v2736_v5, %v2736_v5  ;;  %v2739_v25 = vpack.c.bf16 %v2737_v52, %v2737_v52 }
 0x61d   :  { %v2499_v54 = vpop.permute.xlu0 %2498  ;;  %v2573_v38 = vpack.i.b16 %v2433_v33, %v2433_v33  ;;  %v2741_v7 = vpack.i.b16 %v2691_v40, %v2691_v40  ;;  %v2705_v40 = vunpack.c.l.bf16 %v2704_v26 }
 0x61e   :  { %v2622_v2 = vunpack.c.l.b16 %v2561_v16  ;;  %v2623_v56 = vunpack.c.l.b16 %v2562_v14  ;;  %v2787_v20 = vunpack.c.l.b16 %v2738_v18  ;;  %v2788_v30 = vunpack.c.l.b16 %v2739_v25  ;;  %v2530_v27 = vpop.permute.xlu1 %2529 }
 0x61f   :  { %v2536_v29 = vsel %vm2533_vm14, %v2530_v27, %v2532_v55  ;;  %v2502_v32 = vsel %vm546_vm5, %v2497_v43, %v2499_v54  ;;  %v2474_v43 = vunpack.c.l.bf16 %v2471_v8  ;;  %v2491_v25 = vunpack.c.l.bf16 %v2488_v46 }
 0x620   :  { %v2539_v21 = vunpack.c.l.bf16 %v2536_v29  ;;  %v2540_v31 = vunpack.c.h.bf16 %v2536_v29  ;;  %v2624_v57 = vpack.c.b16 %v2623_v56, %v2622_v2  ;;  %v2789_v19 = vpack.c.b16 %v2788_v30, %v2787_v20  ;;  %v2460_v30 = vpop.permute.xlu2 %2459 }
 0x621   :  { %v2505_v55 = vunpack.c.l.bf16 %v2502_v32  ;;  %v2506_v17 = vunpack.c.h.bf16 %v2502_v32  ;;  %v2711_v56 = vunpack.c.l.bf16 %v2710_v42  ;;  %v5014_v20 = vperm.slane %v2741_v7, 0 }
 0x622   :  { %v2542_v9 = vmul.f32 %v2541_v6, %v2539_v21  ;;  %v2543_v45 = vmul.f32 %v2541_v6, %v2540_v31  ;;  %v2730_v49 = vmul.f32 %v2729_v10, %v2539_v21  ;;  %v2731_v61 = vmul.f32 %v2729_v10, %v2540_v31  ;;  %2658 = vmatpush.bf16.msra.mxu3 %v2624_v57 }
 0x623   :  { %2823 = vmatpush.bf16.msra.mxu2 %v2789_v19  ;;  %v2508_v16 = vmul.f32 %v2507_v37, %v2505_v55  ;;  %v2509_v14 = vmul.f32 %v2507_v37, %v2506_v17  ;;  %v2718_v18 = vmul.f32 %v2717_v50, %v2505_v55  ;;  %v2719_v2 = vmul.f32 %v2717_v50, %v2506_v17 }
 0x624   :  { %v2544_v59 = vpack.c.bf16 %v2542_v9, %v2542_v9  ;;  %v2545_v58 = vpack.c.bf16 %v2543_v45, %v2543_v45  ;;  %v2732_v34 = vpack.c.bf16 %v2730_v49, %v2730_v49  ;;  %v2733_v47 = vpack.c.bf16 %v2731_v61, %v2731_v61 }
 0x625   :  { %v5006_v22 = vpop.permute.xlu0 %2563  ;;  %v2510_v31 = vpack.c.bf16 %v2508_v16, %v2508_v16  ;;  %v2511_v41 = vpack.c.bf16 %v2509_v14, %v2509_v14  ;;  %v2720_v37 = vpack.c.bf16 %v2718_v18, %v2718_v18  ;;  %v2721_v45 = vpack.c.bf16 %v2719_v2, %v2719_v2 }
 0x626   :  { %v2515_v51 = vpop.permute.xlu1 %2514  ;;  %v2616_v48 = vunpack.c.l.b16 %v2544_v59  ;;  %v2617_v11 = vunpack.c.l.b16 %v2545_v58  ;;  %v2781_v62 = vunpack.c.l.b16 %v2732_v34  ;;  %v2782_v1 = vunpack.c.l.b16 %v2733_v47 }
 0x627   :  { %v2519_v53 = vsel %vm2516_vm15, %v4988_v0, %v2515_v51  ;;  %v5012_v0 = vperm.slane %v2573_v38, 0  ;;  %v2603_v47 = vunpack.c.l.b16 %v2510_v31  ;;  %v2604_v33 = vunpack.c.l.b16 %v2511_v41 }
 0x628   :  { %v2522_v5 = vunpack.c.l.bf16 %v2519_v53  ;;  %v2523_v52 = vunpack.c.h.bf16 %v2519_v53  ;;  %v2618_v63 = vpack.c.b16 %v2617_v11, %v2616_v48  ;;  %v2783_v15 = vpack.c.b16 %v2782_v1, %v2781_v62 }
 0x629   :  { %v2744_v11 = vunpack.c.l.bf16 %v5014_v20  ;;  %v2769_v62 = vunpack.c.l.b16 %v2720_v37  ;;  %v2770_v1 = vunpack.c.l.b16 %v2721_v45 }
 0x62a   :  { %v2525_v13 = vmul.f32 %v2524_v12, %v2522_v5  ;;  %v2526_v28 = vmul.f32 %v2524_v12, %v2523_v52  ;;  %v2724_v54 = vmul.f32 %v2723_v44, %v2522_v5  ;;  %v2725_v36 = vmul.f32 %v2723_v44, %v2523_v52  ;;  %2659 = vmatpush.bf16.msra.mxu3 %v2618_v63 }
 0x62b   :  { %2824 = vmatpush.bf16.msra.mxu2 %v2783_v15  ;;  %v2605_v15 = vpack.c.b16 %v2604_v33, %v2603_v47 }
 0x62c   :  { %v2527_v27 = vpack.c.bf16 %v2525_v13, %v2525_v13  ;;  %v2528_v6 = vpack.c.bf16 %v2526_v28, %v2526_v28  ;;  %v2726_v10 = vpack.c.bf16 %v2724_v54, %v2724_v54  ;;  %v2727_v29 = vpack.c.bf16 %v2725_v36, %v2725_v36 }
 0x62d   :  { %v2462_v21 = vpop.permute.xlu0 %2461  ;;  %v2771_v54 = vpack.c.b16 %v2770_v1, %v2769_v62  ;;  %v2695_v36 = vperm.slane %v4992_v35, 0 }
 0x62e   :  { %v2466_v57 = vsel %vm2463_vm0, %v2460_v30, %v2462_v21  ;;  %v2480_v19 = vpop.permute.xlu1 %2479  ;;  %v2610_v32 = vunpack.c.l.b16 %v2527_v27  ;;  %v2611_v50 = vunpack.c.l.b16 %v2528_v6  ;;  %v2775_v12 = vunpack.c.l.b16 %v2726_v10 }
 0x62f   :  { %v2776_v9 = vunpack.c.l.b16 %v2727_v29  ;;  %v2472_v49 = vunpack.c.l.bf16 %v2466_v57  ;;  %v2473_v61 = vunpack.c.h.bf16 %v2466_v57  ;;  %v2486_v44 = vsel %vm2483_vm2, %v2480_v19, %v5002_v39 }
 0x630   :  { %v2489_v8 = vunpack.c.l.bf16 %v2486_v44  ;;  %v2490_v59 = vunpack.c.h.bf16 %v2486_v44  ;;  %v2612_v58 = vpack.c.b16 %v2611_v50, %v2610_v32  ;;  %v2578_v39 = vunpack.c.l.bf16 %v5012_v0  ;;  %v3414_v44 = vld [vmem:[#allocation12 + $0x4] sm:$0xf] }
 0x631   :  { %v2777_v34 = vpack.c.b16 %v2776_v9, %v2775_v12  ;;  %v2475_v55 = vmul.f32 %v2474_v43, %v2472_v49  ;;  %v2476_v48 = vmul.f32 %v2474_v43, %v2473_v61  ;;  %v2706_v7 = vmul.f32 %v2705_v40, %v2472_v49  ;;  %v2442_v12 = vpop.permute.xlu2 %2441 }
 0x632   :  { %v2492_v17 = vmul.f32 %v2491_v25, %v2489_v8  ;;  %v2493_v51 = vmul.f32 %v2491_v25, %v2490_v59  ;;  %v2712_v46 = vmul.f32 %v2711_v56, %v2489_v8  ;;  %v2713_v42 = vmul.f32 %v2711_v56, %v2490_v59  ;;  %2660 = vmatpush.bf16.msra.mxu3 %v2612_v58  ;;  %v3337_v8 = vld [vmem:[#allocation12 + $0x8] sm:$0x70] }
 0x633   :  { %2825 = vmatpush.bf16.msra.mxu2 %v2777_v34  ;;  %v2707_v4 = vmul.f32 %v2705_v40, %v2473_v61  ;;  %v2477_v63 = vpack.c.bf16 %v2475_v55, %v2475_v55  ;;  %v2451_v43 = vperm.slane %v4990_v23, 0  ;;  %v2478_v16 = vpack.c.bf16 %v2476_v48, %v2476_v48 }
 0x634   :  { %v2494_v53 = vpack.c.bf16 %v2492_v17, %v2492_v17  ;;  %v2495_v38 = vpack.c.bf16 %v2493_v51, %v2493_v51  ;;  %v2714_v26 = vpack.c.bf16 %v2712_v46, %v2712_v46  ;;  %v2715_v5 = vpack.c.bf16 %v2713_v42, %v2713_v42 }
 0x635   :  { %v2708_v2 = vpack.c.bf16 %v2706_v7, %v2706_v7  ;;  %v2709_v56 = vpack.c.bf16 %v2707_v4, %v2707_v4  ;;  %v2591_v10 = vunpack.c.l.b16 %v2477_v63  ;;  %v2592_v29 = vunpack.c.l.b16 %v2478_v16  ;;  %v3346_v16 = vld [vmem:[#allocation16 + $0x8] sm:$0xf0] }
 0x636   :  { %v2566_v52 = vpop.permute.xlu1 %2565  ;;  %2661 = vmatpush.bf16.msra.mxu3 %v4951_v24  ;;  %v2597_v14 = vunpack.c.l.b16 %v2494_v53  ;;  %v2598_v18 = vunpack.c.l.b16 %v2495_v38  ;;  %v2763_v0 = vunpack.c.l.b16 %v2714_v26  ;;  %v2764_v20 = vunpack.c.l.b16 %v2715_v5  ;;  %v3344_v26 = vld [vmem:[#allocation16] sm:$0xf]  ;;  %v3417_v5 = vld [vmem:[#allocation16 + $0x4] sm:$0xf0] }
 0x637   :  { %2826 = vmatpush.bf16.msra.mxu2 %v4951_v24  ;;  %v2570_v25 = vsel %vm2567_vm3, %v5006_v22, %v2566_v52  ;;  %v2454_v21 = vunpack.c.l.bf16 %v2451_v43  ;;  %v2757_v57 = vunpack.c.l.b16 %v2708_v2  ;;  %v2758_v35 = vunpack.c.l.b16 %v2709_v56  ;;  %v3416_v43 = vld [vmem:[#allocation16 + $0x4] sm:$0xf] }
 0x638   :  { %v2576_v13 = vunpack.c.l.bf16 %v2570_v25  ;;  %v2577_v28 = vunpack.c.h.bf16 %v2570_v25  ;;  %v2599_v24 = vpack.c.b16 %v2598_v18, %v2597_v14  ;;  %v2765_v19 = vpack.c.b16 %v2764_v20, %v2763_v0  ;;  %v5032_v18 = vpop.f32.mrf.mxu0  ;;  %v3419_v25 = vld [vmem:[#allocation21 + $0x8] sm:$0xff]  ;;  %v2804_v0 = vpop.permute.xlu0 %2803 }
 0x639   :  { %v2696_v32 = vunpack.c.l.bf16 %v2695_v36  ;;  %v2593_v58 = vpack.c.b16 %v2592_v29, %v2591_v10  ;;  %v2759_v55 = vpack.c.b16 %v2758_v35, %v2757_v57  ;;  %v3340_v17 = vor.u32 %v3414_v44, %v3337_v8  ;;  %2879 = vmatpush.bf16.msrb.mxu1 %v3419_v25 }
 0x63a   :  { %v2579_v30 = vmul.f32 %v2578_v39, %v2576_v13  ;;  %v2580_v27 = vmul.f32 %v2578_v39, %v2577_v28  ;;  %v2745_v23 = vmul.f32 %v2744_v11, %v2576_v13  ;;  %v2746_v6 = vmul.f32 %v2744_v11, %v2577_v28  ;;  %2662 = vmatpush.bf16.msra.mxu3 %v2605_v15  ;;  %v3418_v28 = vld [vmem:[#allocation21] sm:$0xff] }
 0x63b   :  { %2827 = vmatpush.bf16.msra.mxu2 %v2771_v54  ;;  %v3345_v15 = vor.u32 %v3417_v5, %v3344_v26  ;;  %v3349_v14 = vor.u32 %v3416_v43, %v3346_v16 }
 0x63c   :  { %v2581_v22 = vpack.c.bf16 %v2579_v30, %v2579_v30  ;;  %v2582_v31 = vpack.c.bf16 %v2580_v27, %v2580_v27  ;;  %v2747_v41 = vpack.c.bf16 %v2745_v23, %v2745_v23  ;;  %v2748_v37 = vpack.c.bf16 %v2746_v6, %v2746_v6 }
 0x63d   :  { %2880 = vmatpush.bf16.msrb.mxu1 %v3418_v28 }
 0x63e   :  { %v2440_v50 = vpop.permute.xlu1 %2439  ;;  %v2628_v9 = vunpack.c.l.b16 %v2581_v22  ;;  %v2629_v45 = vunpack.c.l.b16 %v2582_v31  ;;  %v2793_v49 = vunpack.c.l.b16 %v2747_v41  ;;  %v2794_v61 = vunpack.c.l.b16 %v2748_v37  ;;  %2663 = vmatpush.bf16.msra.mxu3 %v2599_v24  ;;  %v3335_v31 = vld [vmem:[#allocation12] sm:$0xf]  ;;  %v3415_v41 = vld [vmem:[#allocation12 + $0x4] sm:$0x70] }
 0x63f   :  { %2828 = vmatpush.bf16.msra.mxu2 %v2765_v19  ;;  %v2446_v59 = vsel %vm2443_vm4, %v2440_v50, %v2442_v12  ;;  %v3336_v37 = vor.u32 %v3415_v41, %v3335_v31 }
 0x640   :  { %v2452_v34 = vunpack.c.l.bf16 %v2446_v59  ;;  %v2453_v47 = vunpack.c.h.bf16 %v2446_v59  ;;  %v2630_v33 = vpack.c.b16 %v2629_v45, %v2628_v9  ;;  %v2795_v40 = vpack.c.b16 %v2794_v61, %v2793_v49  ;;  %v5034_v13 = vpop.f32.mrf.mxu0  ;;  %v2634_v45 = vld [vmem:[#allocation13] sm:$0xff]  ;;  %v3067_v49 = vld [vmem:[#allocation24 + $0x8] sm:$0x3f] }
 0x641   :  { %v3066_v61 = vld [vmem:[#allocation24] sm:$0xff]  ;;  %v2635_v59 = vld [vmem:[#allocation13 + $0x8] sm:$0x3f] }
 0x642   :  { %v2455_v51 = vmul.f32 %v2454_v21, %v2452_v34  ;;  %v2456_v46 = vmul.f32 %v2454_v21, %v2453_v47  ;;  %v2697_v42 = vmul.f32 %v2696_v32, %v2452_v34  ;;  %v2698_v48 = vmul.f32 %v2696_v32, %v2453_v47  ;;  %2664 = vmatpush.bf16.msra.mxu3 %v2593_v58  ;;  %v2889_v47 = vld [vmem:[#allocation25] sm:$0xf] }
 0x643   :  { %2679 = vmatpush.bf16.msra.mxu0 %v2630_v33  ;;  %2829 = vmatpush.bf16.msra.mxu2 %v2759_v55  ;;  %v2924_v33 = vshrl.u32 %v2889_v47, 16 }
 0x644   :  { %v2457_v39 = vpack.c.bf16 %v2455_v51, %v2455_v51  ;;  %v2458_v11 = vpack.c.bf16 %v2456_v46, %v2456_v46  ;;  %v2699_v62 = vpack.c.bf16 %v2697_v42, %v2697_v42  ;;  %v2700_v1 = vpack.c.bf16 %v2698_v48, %v2698_v48 }
 0x646   :  { %v2585_v53 = vunpack.c.l.b16 %v2457_v39  ;;  %v2586_v38 = vunpack.c.l.b16 %v2458_v11  ;;  %v2751_v7 = vunpack.c.l.b16 %v2699_v62  ;;  %v2752_v4 = vunpack.c.l.b16 %v2700_v1  ;;  %3341 = vmatmul.msk.bf16.vlgmr.msra.gmra.mxu0 %vm430_vm1, %v3340_v17  ;;  %v2809_v30 = vpop.permute.xlu1 %2808 }
 0x647   :  { %2844 = vmatpush.bf16.msrb.mxu0 %v2795_v40  ;;  %v5069_v40 = vpack.i.b16 %v2889_v47, %v2889_v47  ;;  %v5073_v17 = vpack.i.b16 %v2924_v33, %v2924_v33 }
 0x648   :  { %v2587_v52 = vpack.c.b16 %v2586_v38, %v2585_v53  ;;  %v2753_v63 = vpack.c.b16 %v2752_v4, %v2751_v7 }
 0x649   :  { %v2973_v51 = vperm.slane %v5069_v40, 3  ;;  %v2965_v46 = vperm.slane %v5073_v17, 2  ;;  %v2988_v42 = vperm.slane %v5073_v17, 3 }
 0x64a   :  { %2665 = vmatpush.bf16.msra.mxu3 %v2587_v52  ;;  %2830 = vmatpush.bf16.msra.mxu2 %v2753_v63 }
 0x64b   :  { %v2974_v48 = vunpack.c.l.bf16 %v2973_v51  ;;  %v2968_v62 = vunpack.c.l.bf16 %v2965_v46  ;;  %v2991_v53 = vunpack.c.l.bf16 %v2988_v42  ;;  %v2907_v46 = vperm.slane %v5069_v40, 0 }
 0x64d   :  { %2831 = vmatmul.bf16.vlgmr.msra.gmra.mxu2 %v3345_v15  ;;  %2666 = vmatmul.bf16.vlgmr.msra.gmra.mxu3 %v3336_v37 }
 0x656   :  { %3350 = vmatmul.msk.bf16.vlgmr.msrb.gmra.mxu0 %vm430_vm1, %v3349_v14 }
 0x6c3   :  { %v5036_v54 = vpop.f32.mrf.mxu0 }
 0x6cb   :  { %v5038_v36 = vpop.f32.mrf.mxu0 }
 0x6d0   :  { %v2832_v2 = vpop.f32.mrf.mxu2  ;;  %v5078_v14 = vpop.f32.mrf.mxu3 }
 0x6d1   :  { %v2833_v20 = vadd.f32 %v2832_v2, %v2804_v0  ;;  %v2951_v2 = vperm.slane %v5073_v17, 1 }
 0x6d3   :  { %v2846_v56 = vpop.f32.mrf.mxu0  ;;  %v2952_v31 = vunpack.c.l.bf16 %v2951_v2 }
 0x6d4   :  { %v2847_v6 = vadd.f32 %v2846_v56, %v2833_v20 }
 0x6d6   :  { %v2851_v24 = vmax.f32 %v2847_v6, 0.0 }
 0x6d8   :  { %v2834_v27 = vpop.f32.mrf.mxu2 }
 0x6d9   :  { %v2835_v23 = vadd.f32 %v2834_v27, %v2809_v30 }
 0x6db   :  { %v2848_v10 = vpop.f32.mrf.mxu0 }
 0x6dc   :  { %v2849_v29 = vadd.f32 %v2848_v10, %v2835_v23 }
 0x6de   :  { %v2852_v21 = vmax.f32 %v2849_v29, 0.0  ;;  %v2943_v29 = vperm.slane %v5069_v40, 1 }
 0x6e0   :  { %v2853_v22 = vpack.c.bf16 %v2852_v21, %v2851_v24 }
 0x6e2   :  { %3359 = vmatmul.msk.bf16.vlgmr.msrb.gmra.mxu1 %vm2686_vm6, %v2853_v22 }
 0x75f   :  { %v2882_v57 = vpop.f32.mrf.mxu1 }
 0x760   :  { %v2887_v35 = vpack.c.bf16 %v2882_v57, %v2882_v57 }
 0x762   :  { %v2893_v50 = vunpack.c.l.b16 %v2887_v35 }
 0x767   :  { %v2884_v19 = vpop.f32.mrf.mxu1 }
 0x768   :  { %v2888_v32 = vpack.c.bf16 %v2884_v19, %v2884_v19 }
 0x76a   :  { %v2894_v12 = vunpack.c.l.b16 %v2888_v32 }
 0x76c   :  { %v5041_v9 = vpack.c.b16 %v2894_v12, %v2893_v50  ;;  %v2946_v50 = vunpack.c.l.bf16 %v2943_v29  ;;  %v2890_v12 = vld [vmem:[#allocation25 + $0x4] sm:$0x1] }
 0x76d   :  { %v3005_v33 = vpack.i.b16 %v2890_v12, %v2890_v12 }
 0x76e   :  { %2957 = vrot.lane.b32.xlu1 %v5041_v9, %s3903_s2  ;;  %2981 = vrot.lane.b32.xlu0 %v5041_v9, %s3926_s26  ;;  %s3929_s2 = smov 122  }
 0x76f   :  { %2979 = vrot.lane.b32.xlu2 %v5041_v9, %s3927_s28 }
 0x776   :  { %2937 = vrot.lane.b32.xlu1 %v5041_v9, %s3902_s15  ;;  %2935 = vrot.lane.b32.xlu0 %v5041_v9, %s3908_s7 }
 0x777   :  { %2959 = vrot.lane.b32.xlu2 %v5041_v9, %s3910_s29  ;;  %s5170_s29 = sld [smem:[#allocation45_spill]] }
 0x77d   :  { %v2135_v44 = vld [vmem:[%s5170_s29 + $0x8] sm:$0x3f]  ;;  %v2134_v8 = vld [vmem:[%s5170_s29] sm:$0xff] }
 0x77e   :  { %2896 = vrot.lane.b32.xlu1 %v5041_v9, %s3917_s0  ;;  %2917 = vrot.lane.b32.xlu0 %v5041_v9, %s3928_s10  ;;  %s3930_s0 = smov 32  }
 0x77f   :  { %2915 = vrot.lane.b32.xlu2 %v5041_v9, %s3929_s2 }
 0x786   :  { %2998 = vrot.lane.b32.xlu1 %v5041_v9, %s3924_s19  ;;  %2996 = vrot.lane.b32.xlu0 %v5041_v9, %s3916_s22 }
 0x787   :  { %2898 = vrot.lane.b32.xlu2 %v5041_v9, %s3920_s16 }
 0x78e   :  { %2638 = vperm.xlu1 %3474, %v2634_v45   ;;  %3075 = vperm.xlu0 %3476, %v3067_v49  }
 0x78f   :  { %3070 = vperm.xlu2 %3475, %v3066_v61   ;;  %v2927_v61 = vperm.slane %v5073_v17, 0 }
 0x796   :  { %2143 = vperm.xlu1 %3474, %v2135_v44   ;;  %2138 = vperm.xlu0 %3476, %v2134_v8  }
 0x797   :  { %2643 = vperm.xlu2 %3475, %v2635_v59   ;;  %v2669_v59 = vpop.f32.mrf.mxu3 }
 0x7c9   :  { %v2980_v58 = vpop.permute.xlu2 %2979 }
 0x7d1   :  { %v2960_v34 = vpop.permute.xlu2 %2959 }
 0x7d9   :  { %v5071_v55 = vpop.permute.xlu2 %2915 }
 0x7e0   :  { %v2958_v39 = vpop.permute.xlu1 %2957  ;;  %v2982_v11 = vpop.permute.xlu0 %2981 }
 0x7e1   :  { %v2963_v1 = vsel %vm2009_vm7, %v2958_v39, %v2960_v34  ;;  %v2986_v38 = vsel %vm2983_vm8, %v2980_v58, %v2982_v11  ;;  %v2899_v7 = vpop.permute.xlu2 %2898 }
 0x7e2   :  { %v2966_v4 = vunpack.c.l.bf16 %v2963_v1  ;;  %v2967_v26 = vunpack.c.h.bf16 %v2963_v1  ;;  %v2989_v5 = vunpack.c.l.bf16 %v2986_v38  ;;  %v2990_v52 = vunpack.c.h.bf16 %v2986_v38 }
 0x7e3   :  { %v2930_v1 = vunpack.c.l.bf16 %v2927_v61 }
 0x7e4   :  { %v2975_v63 = vmul.f32 %v2974_v48, %v2966_v4  ;;  %v2976_v15 = vmul.f32 %v2974_v48, %v2967_v26  ;;  %v2992_v43 = vmul.f32 %v2991_v53, %v2989_v5  ;;  %v2993_v16 = vmul.f32 %v2991_v53, %v2990_v52 }
 0x7e5   :  { %v2969_v25 = vmul.f32 %v2968_v62, %v2966_v4  ;;  %v2970_v28 = vmul.f32 %v2968_v62, %v2967_v26  ;;  %v3007_v5 = vperm.slane %v3005_v33, 0 }
 0x7e6   :  { %v2977_v56 = vpack.c.bf16 %v2975_v63, %v2975_v63  ;;  %v2978_v0 = vpack.c.bf16 %v2976_v15, %v2976_v15  ;;  %v2994_v20 = vpack.c.bf16 %v2992_v43, %v2992_v43  ;;  %v2995_v30 = vpack.c.bf16 %v2993_v16, %v2993_v16 }
 0x7e7   :  { %v2971_v22 = vpack.c.bf16 %v2969_v25, %v2969_v25  ;;  %v2972_v57 = vpack.c.bf16 %v2970_v28, %v2970_v28  ;;  %v2910_v43 = vunpack.c.l.bf16 %v2907_v46 }
 0x7e8   :  { %v2938_v27 = vpop.permute.xlu1 %2937  ;;  %v2936_v23 = vpop.permute.xlu0 %2935  ;;  %v3054_v6 = vunpack.c.l.b16 %v2994_v20  ;;  %v3055_v10 = vunpack.c.l.b16 %v2995_v30  ;;  %v3048_v35 = vunpack.c.l.b16 %v2977_v56  ;;  %v3049_v19 = vunpack.c.l.b16 %v2978_v0 }
 0x7e9   :  { %v2941_v24 = vsel %vm546_vm5, %v2936_v23, %v2938_v27  ;;  %v5083_v21 = vpop.permute.xlu2 %3070  ;;  %v3042_v44 = vunpack.c.l.b16 %v2971_v22  ;;  %v3043_v8 = vunpack.c.l.b16 %v2972_v57  ;;  %vm2688_vm5 = vcmask 259072  }
 0x7ea   :  { %v2944_v41 = vunpack.c.l.bf16 %v2941_v24  ;;  %v2945_v37 = vunpack.c.h.bf16 %v2941_v24  ;;  %v3056_v32 = vpack.c.b16 %v3055_v10, %v3054_v6  ;;  %v3050_v58 = vpack.c.b16 %v3049_v19, %v3048_v35 }
 0x7eb   :  { %v3044_v4 = vpack.c.b16 %v3043_v8, %v3042_v44 }
 0x7ec   :  { %3090 = vmatpush.bf16.msrb.mxu3 %v3056_v32  ;;  %v2953_v45 = vmul.f32 %v2952_v31, %v2944_v41  ;;  %v2954_v49 = vmul.f32 %v2952_v31, %v2945_v37  ;;  %v2947_v51 = vmul.f32 %v2946_v50, %v2944_v41  ;;  %v2948_v39 = vmul.f32 %v2946_v50, %v2945_v37 }
 0x7ee   :  { %v2955_v11 = vpack.c.bf16 %v2953_v45, %v2953_v45  ;;  %v2956_v62 = vpack.c.bf16 %v2954_v49, %v2954_v49  ;;  %v2949_v52 = vpack.c.bf16 %v2947_v51, %v2947_v51  ;;  %v2950_v40 = vpack.c.bf16 %v2948_v39, %v2948_v39  ;;  %v3420_v45 = vld [vmem:[#allocation22 + $0x4] sm:$0xf] }
 0x7f0   :  { %v2897_v34 = vpop.permute.xlu1 %2896  ;;  %v2918_v47 = vpop.permute.xlu0 %2917  ;;  %3091 = vmatpush.bf16.msrb.mxu3 %v3050_v58  ;;  %v3036_v15 = vunpack.c.l.b16 %v2956_v62  ;;  %v3029_v20 = vunpack.c.l.b16 %v2949_v52 }
 0x7f1   :  { %v2922_v42 = vsel %vm2919_vm9, %v5071_v55, %v2918_v47  ;;  %v2644_v48 = vpop.permute.xlu2 %2643  ;;  %v2902_v26 = vsel %vm2483_vm2, %v2897_v34, %v2899_v7  ;;  %v3035_v55 = vunpack.c.l.b16 %v2955_v11  ;;  %v3010_v7 = vunpack.c.l.bf16 %v3007_v5 }
 0x7f2   :  { %v2928_v53 = vunpack.c.l.bf16 %v2922_v42  ;;  %v2929_v17 = vunpack.c.h.bf16 %v2922_v42  ;;  %v2670_v38 = vadd.f32 %v2669_v59, %v2644_v48  ;;  %v2908_v16 = vunpack.c.l.bf16 %v2902_v26  ;;  %v3362_v42 = vld [vmem:[#allocation22] sm:$0xf]  ;;  %v3421_v48 = vld [vmem:[#allocation22 + $0x4] sm:$0x70] }
 0x7f3   :  { %v2909_v25 = vunpack.c.h.bf16 %v2902_v26  ;;  %v3037_v6 = vpack.c.b16 %v3036_v15, %v3035_v55  ;;  %v3363_v62 = vor.u32 %v3421_v48, %v3362_v42 }
 0x7f4   :  { %v2684_v63 = vadd.f32 %v5038_v36, %v2670_v38  ;;  %3092 = vmatpush.bf16.msrb.mxu3 %v3044_v4  ;;  %v2931_v28 = vmul.f32 %v2930_v1, %v2928_v53  ;;  %v2932_v2 = vmul.f32 %v2930_v1, %v2929_v17  ;;  %v3030_v36 = vunpack.c.l.b16 %v2950_v40 }
 0x7f5   :  { %v2911_v10 = vmul.f32 %v2910_v43, %v2908_v16  ;;  %v2912_v29 = vmul.f32 %v2910_v43, %v2909_v25 }
 0x7f6   :  { %2689 = vst.msk [vmem:[%s5144_s25 + $0x18] sm:$0x3f] %vm2688_vm5, %v2684_v63  ;;  %v2933_v24 = vpack.c.bf16 %v2931_v28, %v2931_v28  ;;  %v2934_v22 = vpack.c.bf16 %v2932_v2, %v2932_v2  ;;  %v3031_v35 = vpack.c.b16 %v3030_v36, %v3029_v20 }
 0x7f7   :  { %v2913_v19 = vpack.c.bf16 %v2911_v10, %v2911_v10  ;;  %v2914_v32 = vpack.c.bf16 %v2912_v29, %v2912_v29 }
 0x7f8   :  { %v2999_v56 = vpop.permute.xlu1 %2998  ;;  %v2997_v0 = vpop.permute.xlu0 %2996  ;;  %3093 = vmatpush.bf16.msrb.mxu3 %v5041_v9  ;;  %v3023_v50 = vunpack.c.l.b16 %v2933_v24  ;;  %v3024_v12 = vunpack.c.l.b16 %v2934_v22  ;;  %v3364_v9 = vld [vmem:[#allocation22 + $0x8] sm:$0x70] }
 0x7f9   :  { %v3002_v30 = vsel %vm2443_vm4, %v2997_v0, %v2999_v56  ;;  %v3367_v34 = vor.u32 %v3420_v45, %v3364_v9  ;;  %v3017_v47 = vunpack.c.l.b16 %v2913_v19  ;;  %v3018_v33 = vunpack.c.l.b16 %v2914_v32 }
 0x7fa   :  { %v3008_v27 = vunpack.c.l.bf16 %v3002_v30  ;;  %v3009_v23 = vunpack.c.h.bf16 %v3002_v30  ;;  %v3025_v46 = vpack.c.b16 %v3024_v12, %v3023_v50 }
 0x7fb   :  { %v3019_v39 = vpack.c.b16 %v3018_v33, %v3017_v47 }
 0x7fc   :  { %v3011_v31 = vmul.f32 %v3010_v7, %v3008_v27  ;;  %v3012_v41 = vmul.f32 %v3010_v7, %v3009_v23  ;;  %3094 = vmatpush.bf16.msrb.mxu3 %v3037_v6 }
 0x7fe   :  { %v3013_v37 = vpack.c.bf16 %v3011_v31, %v3011_v31  ;;  %v3014_v57 = vpack.c.bf16 %v3012_v41, %v3012_v41 }
 0x800   :  { %v3060_v49 = vunpack.c.l.b16 %v3013_v37  ;;  %v3061_v61 = vunpack.c.l.b16 %v3014_v57  ;;  %v2639_v44 = vpop.permute.xlu1 %2638  ;;  %v3076_v8 = vpop.permute.xlu0 %3075  ;;  %3095 = vmatpush.bf16.msrb.mxu3 %v3031_v35 }
 0x801   :  { %v2668_v59 = vadd.f32 %v5078_v14, %v2639_v44 }
 0x802   :  { %v3062_v58 = vpack.c.b16 %v3061_v61, %v3060_v49 }
 0x803   :  { %v2682_v51 = vadd.f32 %v5036_v54, %v2668_v59 }
 0x804   :  { %3111 = vmatpush.bf16.msra.mxu0 %v3062_v58  ;;  %3096 = vmatpush.bf16.msrb.mxu3 %v3025_v46 }
 0x805   :  { %2687 = vst.msk [vmem:[%s5144_s25 + $0x8] sm:$0xff] %vm2686_vm6, %v2682_v51 }
 0x807   :  { %3368 = vmatmul.msk.bf16.vlgmr.msra.gmra.mxu0 %vm430_vm1, %v3367_v34  ;;  %vm3126_vm1 = vcmask 326912  }
 0x808   :  { %v2144_v14 = vpop.permute.xlu1 %2143  ;;  %v2139_v11 = vpop.permute.xlu0 %2138  ;;  %3097 = vmatpush.bf16.msrb.mxu3 %v3019_v39 }
 0x809   :  { %v2170_v1 = vadd.f32 %v5034_v13, %v2144_v14  ;;  %v2168_v54 = vadd.f32 %v5032_v18, %v2139_v11 }
 0x80b   :  { %v2184_v53 = vadd.f32 %v4949_v3, %v2170_v1  ;;  %v2182_v17 = vadd.f32 %v4947_v60, %v2168_v54  ;;  %3098 = vmatmul.bf16.vlgmr.msrb.gmra.mxu3 %v3363_v62 }
 0x80d   :  { %2187 = vst [vmem:[%s5144_s25 + $0x10] sm:$0x3f] %v2184_v53 }
 0x80e   :  { %2186 = vst [vmem:[%s5144_s25] sm:$0xff] %v2182_v17 }
 0x884   :  { %v3113_v4 = vpop.f32.mrf.mxu0 }
 0x88c   :  { %v3115_v5 = vpop.f32.mrf.mxu0 }
 0x88e   :  { %v3099_v38 = vpop.f32.mrf.mxu3 }
 0x88f   :  { %v3100_v13 = vadd.f32 %v3099_v38, %v5083_v21 }
 0x891   :  { %v3114_v26 = vadd.f32 %v3113_v4, %v3100_v13 }
 0x893   :  { %3120 = vrot.lane.b32.xlu2 %v3114_v26, %s3930_s0 }
 0x896   :  { %v3101_v18 = vpop.f32.mrf.mxu3 }
 0x897   :  { %v3102_v3 = vadd.f32 %v3101_v18, %v3076_v8 }
 0x899   :  { %v3116_v60 = vadd.f32 %v3115_v5, %v3102_v3 }
 0x89b   :  { %3122 = vrot.lane.b32.xlu0 %v3116_v60, %s3930_s0 }
 0x8ed   :  { %v3121_v52 = vpop.permute.xlu2 %3120 }
 0x8ee   :  { %3127 = vst.msk [vmem:[%s5144_s25 + $0x8] sm:$0xff] %vm3126_vm1, %v3121_v52 }
 0x90d   :  { %v3123_v63 = vpop.permute.xlu0 %3122 }
 0x90e   :  { %3129 = vst.msk [vmem:[%s5144_s25 + $0x18] sm:$0x3f] %vm3128_vm10, %v3123_v63 }
 0x90f   :  { %3134 = vsyncpa [#allocation3], 1 }
 0x910   :  { %3135 = vsyncpa [#allocation5], 1 }
 0x911   :  { %3136 = vsyncpa [#allocation8], 1 }
 0x912   :  { %3137 = vsyncpa [#allocation11], 1 }
 0x913   :  { %3138 = vsyncpa [#allocation14], 1 }
 0x914   :  { %3139 = vsyncpa [#allocation17], 1 }
 0x915   :  { %3140 = vsyncpa [#allocation20], 1 }
 0x916   :  { %3141 = vsyncpa [#allocation23], 1 }
 0x917   :  { %3142 = vsyncpa [#allocation26], 1 }

</bundles_post_ra>
